<compile_context>
chip_gen: v7x
topology: tpu7x:2x2x1
jax: 0.10.0
libtpu: 0.0.40
codegen_flags: <defaults>
</compile_context>

<pallas_src>
import jax
import jax.numpy as jnp
from jax.experimental import pallas as pl
from jax.experimental.pallas import tpu as pltpu

H = 32        # hidden size
V = 64        # vocab size
V_PAD = 128   # vocab padded to full lane width
G_PAD = 128   # fused gate width: 3*H = 96 -> 128
B = 2         # batch
S_IN = 8      # encoder (input) sequence length
T_DEC = 8     # decoder (target) sequence length

NEG_BIG = -1e30


# ----------------------------------------------------------------------------
# Fused Seq2Seq kernel (single invocation, no grid).
# ----------------------------------------------------------------------------
def seq2seq_kernel(emb_ref, w_ref, b_ref, mask_ref, out_ref, hT_ref):
    # ---------------- hoisted parameter slices / loads (once) ----------------
    e_wih = w_ref[0 * H:1 * H, :]          # (H, G_PAD)
    e_whh = w_ref[1 * H:2 * H, :]
    d_wih = w_ref[2 * H:3 * H, :]
    d_whh = w_ref[3 * H:4 * H, :]
    wa_h = w_ref[4 * H:5 * H, 0:H]         # (H, H)
    wa_c = w_ref[5 * H:6 * H, 0:H]         # (H, H)
    wo = w_ref[6 * H:7 * H, :]             # (H, V_PAD)

    bias = b_ref[...]                      # (8, 128)
    e_bi = bias[0:1, :]                    # (1, G_PAD): bih + [bhh_r|bhh_z|0]
    e_bhn = bias[1:2, 0:H]                 # (1, H): hidden-side n-gate bias
    d_bi = bias[2:3, :]
    d_bhn = bias[3:4, 0:H]
    ba = bias[4:5, 0:H]                    # (1, H)
    bo = bias[5:6, :]                      # (1, V_PAD)

    mask = mask_ref[...]                   # (B, S) float {0, 1}

    # --------- hoisted input-side GRU matmuls (off the recurrent path) -------
    gi_enc = jnp.dot(emb_ref[0:S_IN * B, :], e_wih,
                     preferred_element_type=jnp.float32) + e_bi          # (S*B, G_PAD)
    gi_dec = jnp.dot(emb_ref[S_IN * B:(S_IN + T_DEC) * B, :], d_wih,
                     preferred_element_type=jnp.float32) + d_bi          # (T*B, G_PAD)

    def gru_cell(gi, h, whh, bhn):
        # Single recurrent matmul per step; gates [r | z | n | pad] on lanes.
        gh = jnp.dot(h, whh, preferred_element_type=jnp.float32)         # (B, G_PAD)
        r = jax.nn.sigmoid(gi[:, 0:H] + gh[:, 0:H])
        z = jax.nn.sigmoid(gi[:, H:2 * H] + gh[:, H:2 * H])
        n = jnp.tanh(gi[:, 2 * H:3 * H] + r * (gh[:, 2 * H:3 * H] + bhn))
        return (1.0 - z) * n + z * h

    # ------------------------- encoder (unrolled) ----------------------------
    s_pos = jax.lax.broadcasted_iota(jnp.int32, (1, S_IN, 1), 1)
    h = jnp.zeros((B, H), jnp.float32)
    enc = jnp.zeros((B, S_IN, H), jnp.float32)
    for s in range(S_IN):
        h_new = gru_cell(gi_enc[s * B:(s + 1) * B, :], h, e_whh, e_bhn)
        m = mask[:, s:s + 1]                            # (B, 1)
        h = m * h_new + (1.0 - m) * h                   # freeze past length
        # Assemble encoder outputs in vregs (no scratch stores); zero past len.
        enc = enc + jnp.where(s_pos == s, (m * h_new)[:, None, :], 0.0)

    # ---------------- decoder GRU, teacher forcing (unrolled) ----------------
    t_pos = jax.lax.broadcasted_iota(jnp.int32, (1, T_DEC, 1), 1)
    dec_hs = jnp.zeros((B, T_DEC, H), jnp.float32)
    for t in range(T_DEC):
        h = gru_cell(gi_dec[t * B:(t + 1) * B, :], h, d_whh, d_bhn)
        dec_hs = dec_hs + jnp.where(t_pos == t, h[:, None, :], 0.0)
    hT_ref[...] = h                                     # final decoder hidden

    # ------------- Luong dot attention, batched over all T steps -------------
    # NOTE: an input_length of 0 would make attention uniform over padding
    # (same as the unguarded reference); lengths here are always >= 1.
    scores = jnp.sum(dec_hs[:, :, None, :] * enc[:, None, :, :], axis=-1)  # (B,T,S)
    scores = jnp.where(mask[:, None, :] > 0.5, scores, NEG_BIG)
    scores = scores - jnp.max(scores, axis=-1, keepdims=True)
    e_s = jnp.exp(scores)
    attn = e_s / jnp.sum(e_s, axis=-1, keepdims=True)   # exact normalization
    ctx = jnp.sum(attn[:, :, :, None] * enc[:, None, :, :], axis=2)        # (B,T,H)

    # --------------- output projection + log-softmax (batched) ---------------
    h2 = dec_hs.reshape(B * T_DEC, H)
    c2 = ctx.reshape(B * T_DEC, H)
    cat = jnp.tanh(jnp.dot(h2, wa_h, preferred_element_type=jnp.float32)
                   + jnp.dot(c2, wa_c, preferred_element_type=jnp.float32) + ba)
    logits = jnp.dot(cat, wo, preferred_element_type=jnp.float32) + bo      # (B*T, V_PAD)
    v_idx = jax.lax.broadcasted_iota(jnp.int32, logits.shape, 1)
    logits = jnp.where(v_idx < V, logits, NEG_BIG)      # mask vocab padding
    m_l = jnp.max(logits, axis=-1, keepdims=True)
    lse = m_l + jnp.log(jnp.sum(jnp.exp(logits - m_l), axis=-1, keepdims=True))
    out_ref[...] = (logits - lse).reshape(B, T_DEC, V_PAD)   # (B,T,V_PAD) log-probs


def run_seq2seq_kernel(emb, weights, biases, mask):
    vmem = pl.BlockSpec(memory_space=pltpu.MemorySpace.VMEM)
    return pl.pallas_call(
        seq2seq_kernel,
        out_shape=(jax.ShapeDtypeStruct((B, T_DEC, V_PAD), jnp.float32),
                   jax.ShapeDtypeStruct((B, H), jnp.float32)),
        in_specs=[vmem, vmem, vmem, vmem],
        out_specs=(vmem, vmem),
    )(emb, weights, biases, mask)


# ----------------------------------------------------------------------------
# Parameter init (deterministic, synthetic) and one-time packing.
# ----------------------------------------------------------------------------
def init_params(key):
    ks = jax.random.split(key, 16)
    s = 0.1
    return {
        "enc_emb": jax.random.normal(ks[0], (V, H), jnp.float32) * s,
        "dec_emb": jax.random.normal(ks[1], (V, H), jnp.float32) * s,
        "enc_wih": jax.random.normal(ks[2], (3, H, H), jnp.float32) * s,
        "enc_whh": jax.random.normal(ks[3], (3, H, H), jnp.float32) * s,
        "enc_bih": jax.random.normal(ks[4], (3, 1, H), jnp.float32) * s,
        "enc_bhh": jax.random.normal(ks[5], (3, 1, H), jnp.float32) * s,
        "dec_wih": jax.random.normal(ks[6], (3, H, H), jnp.float32) * s,
        "dec_whh": jax.random.normal(ks[7], (3, H, H), jnp.float32) * s,
        "dec_bih": jax.random.normal(ks[8], (3, 1, H), jnp.float32) * s,
        "dec_bhh": jax.random.normal(ks[9], (3, 1, H), jnp.float32) * s,
        "wa_h": jax.random.normal(ks[10], (H, H), jnp.float32) * s,
        "wa_c": jax.random.normal(ks[11], (H, H), jnp.float32) * s,
        "ba": jax.random.normal(ks[12], (1, H), jnp.float32) * s,
        "wo": jax.random.normal(ks[13], (H, V), jnp.float32) * s,
        "bo": jax.random.normal(ks[14], (1, V), jnp.float32) * s,
    }


def pack_params(params):
    """One-time gate fusion + lane padding + slab packing (NOT per-call)."""
    def pack_gru(wih3, whh3, bih3, bhh3):
        wih = jnp.pad(jnp.concatenate([wih3[0], wih3[1], wih3[2]], axis=1),
                      ((0, 0), (0, G_PAD - 3 * H)))                       # (H, G_PAD)
        whh = jnp.pad(jnp.concatenate([whh3[0], whh3[1], whh3[2]], axis=1),
                      ((0, 0), (0, G_PAD - 3 * H)))                       # (H, G_PAD)
        # Fold input bias + hidden-side r/z biases; n-gate hidden bias stays
        # separate (it sits inside r * (.) in the GRU formulation).
        bi = jnp.concatenate([bih3[0] + bhh3[0], bih3[1] + bhh3[1], bih3[2]], axis=1)
        bi = jnp.pad(bi, ((0, 0), (0, G_PAD - 3 * H)))                    # (1, G_PAD)
        return wih, whh, bi, bhh3[2]                                      # bhn (1, H)

    e_wih, e_whh, e_bi, e_bhn = pack_gru(params["enc_wih"], params["enc_whh"],
                                         params["enc_bih"], params["enc_bhh"])
    d_wih, d_whh, d_bi, d_bhn = pack_gru(params["dec_wih"], params["dec_whh"],
                                         params["dec_bih"], params["dec_bhh"])

    def pad_lane(a):
        return jnp.pad(a, ((0, 0), (0, V_PAD - a.shape[1])))

    weights = jnp.concatenate([
        e_wih, e_whh, d_wih, d_whh,
        pad_lane(params["wa_h"]), pad_lane(params["wa_c"]), pad_lane(params["wo"]),
    ], axis=0)                                                            # (224, 128)

    biases = jnp.concatenate([
        e_bi, pad_lane(e_bhn), d_bi, pad_lane(d_bhn),
        pad_lane(params["ba"]), pad_lane(params["bo"]),
        jnp.zeros((2, V_PAD), jnp.float32),
    ], axis=0)                                                            # (8, 128)

    return {"weights": weights, "biases": biases,
            "enc_emb": params["enc_emb"], "dec_emb": params["dec_emb"]}


# ----------------------------------------------------------------------------
# Seq2Seq.forward equivalent (takes pre-packed params).
# ----------------------------------------------------------------------------
@jax.jit
def seq2seq_forward(packed, input_ids, target_ids, input_length, target_length):
    # target_length kept for signature parity with the reference module (unused).
    del target_length
    # Embedding lookups (plain-JAX glue); time-major gather so the float slab
    # is already in the row order (s*B + b) the hoisted kernel matmuls expect.
    x_emb = jnp.take(packed["enc_emb"], input_ids.T, axis=0).reshape(S_IN * B, H)
    y_emb = jnp.take(packed["dec_emb"], target_ids.T, axis=0).reshape(T_DEC * B, H)
    emb = jnp.concatenate([x_emb, y_emb], axis=0)                         # (32, 32)

    # Length mask computed once per call (used for recurrence freeze, encoder
    # output zeroing and attention masking).
    mask = (jnp.arange(S_IN, dtype=jnp.int32)[None, :]
            < input_length.astype(jnp.int32)[:, None]).astype(jnp.float32)  # (B, S)

    logp_pad, dec_h = run_seq2seq_kernel(
        emb, packed["weights"], packed["biases"], mask)

    decoder_outputs = logp_pad[:, :, :V]          # (B, T_dec, V) log-probs
    decoder_hidden = dec_h[None, :, :]            # (1, B, H)
    return decoder_outputs, decoder_hidden


if __name__ == "__main__":
    key = jax.random.PRNGKey(0)
    pkey, k_in, k_tg = jax.random.split(key, 3)
    raw_params = init_params(pkey)
    packed = pack_params(raw_params)      # one-time fusion/padding, not per call

    input_ids = jax.random.randint(k_in, (B, S_IN), 0, V, dtype=jnp.int32)
    target_ids = jax.random.randint(k_tg, (B, T_DEC), 0, V, dtype=jnp.int32)
    input_length = jnp.array([S_IN, 5], dtype=jnp.int32)
    target_length = jnp.array([T_DEC, T_DEC], dtype=jnp.int32)

    dec_outputs, dec_hidden = seq2seq_forward(
        packed, input_ids, target_ids, input_length, target_length)
    jax.block_until_ready((dec_outputs, dec_hidden))

    assert dec_outputs.shape == (B, T_DEC, V)
    assert dec_hidden.shape == (1, B, H)
    assert bool(jnp.all(jnp.isfinite(dec_outputs)))
    assert bool(jnp.all(jnp.isfinite(dec_hidden)))
    print("KERNEL_OK")
</pallas_src>

<mosaic_0001>
module attributes {stable_mosaic.version = 11 : i64} {
  func.func @seq2seq_kernel(%arg0: memref<32x32xf32, #tpu.memory_space<vmem>>, %arg1: memref<224x128xf32, #tpu.memory_space<vmem>>, %arg2: memref<8x128xf32, #tpu.memory_space<vmem>>, %arg3: memref<2x8xf32, #tpu.memory_space<vmem>>, %arg4: memref<2x8x128xf32, #tpu.memory_space<vmem>>, %arg5: memref<2x32xf32, #tpu.memory_space<vmem>>) attributes {dimension_semantics = [], scalar_prefetch = 0 : i64, scratch_operands = 0 : i64, tpu.core_type = #tpu.core_type<tc>} {
    %c0 = arith.constant 0 : index
    %c0_0 = arith.constant 0 : index
    %0 = vector.load %arg1[%c0, %c0_0] : memref<224x128xf32, #tpu.memory_space<vmem>>, vector<32x128xf32>
    %c32 = arith.constant 32 : index
    %c0_1 = arith.constant 0 : index
    %1 = vector.load %arg1[%c32, %c0_1] : memref<224x128xf32, #tpu.memory_space<vmem>>, vector<32x128xf32>
    %c64 = arith.constant 64 : index
    %c0_2 = arith.constant 0 : index
    %2 = vector.load %arg1[%c64, %c0_2] : memref<224x128xf32, #tpu.memory_space<vmem>>, vector<32x128xf32>
    %c96 = arith.constant 96 : index
    %c0_3 = arith.constant 0 : index
    %3 = vector.load %arg1[%c96, %c0_3] : memref<224x128xf32, #tpu.memory_space<vmem>>, vector<32x128xf32>
    %c128 = arith.constant 128 : index
    %c0_4 = arith.constant 0 : index
    %4 = vector.load %arg1[%c128, %c0_4] : memref<224x128xf32, #tpu.memory_space<vmem>>, vector<32x32xf32>
    %c160 = arith.constant 160 : index
    %c0_5 = arith.constant 0 : index
    %5 = vector.load %arg1[%c160, %c0_5] : memref<224x128xf32, #tpu.memory_space<vmem>>, vector<32x32xf32>
    %c192 = arith.constant 192 : index
    %c0_6 = arith.constant 0 : index
    %6 = vector.load %arg1[%c192, %c0_6] : memref<224x128xf32, #tpu.memory_space<vmem>>, vector<32x128xf32>
    %c0_7 = arith.constant 0 : index
    %c0_8 = arith.constant 0 : index
    %7 = vector.load %arg2[%c0_7, %c0_8] : memref<8x128xf32, #tpu.memory_space<vmem>>, vector<8x128xf32>
    %8 = vector.extract_strided_slice %7 {offsets = [0, 0], sizes = [1, 128], strides = [1, 1]} : vector<8x128xf32> to vector<1x128xf32>
    %9 = vector.extract_strided_slice %7 {offsets = [1, 0], sizes = [1, 32], strides = [1, 1]} : vector<8x128xf32> to vector<1x32xf32>
    %10 = vector.extract_strided_slice %7 {offsets = [2, 0], sizes = [1, 128], strides = [1, 1]} : vector<8x128xf32> to vector<1x128xf32>
    %11 = vector.extract_strided_slice %7 {offsets = [3, 0], sizes = [1, 32], strides = [1, 1]} : vector<8x128xf32> to vector<1x32xf32>
    %12 = vector.extract_strided_slice %7 {offsets = [4, 0], sizes = [1, 32], strides = [1, 1]} : vector<8x128xf32> to vector<1x32xf32>
    %13 = vector.extract_strided_slice %7 {offsets = [5, 0], sizes = [1, 128], strides = [1, 1]} : vector<8x128xf32> to vector<1x128xf32>
    %c0_9 = arith.constant 0 : index
    %c0_10 = arith.constant 0 : index
    %14 = vector.load %arg3[%c0_9, %c0_10] : memref<2x8xf32, #tpu.memory_space<vmem>>, vector<2x8xf32>
    %c0_11 = arith.constant 0 : index
    %c0_12 = arith.constant 0 : index
    %15 = vector.load %arg0[%c0_11, %c0_12] : memref<32x32xf32, #tpu.memory_space<vmem>>, vector<16x32xf32>
    %cst = arith.constant dense<0.000000e+00> : vector<16x128xf32>
    %16 = tpu.matmul %15, %0, %cst {dimension_numbers = #tpu.dot_dimension_numbers<[1], [0], [0], [1], [0, 0, 1, 1], [], []>} : vector<16x32xf32>, vector<32x128xf32>, vector<16x128xf32> -> vector<16x128xf32>
    %17 = vector.broadcast %8 : vector<1x128xf32> to vector<16x128xf32>
    %18 = arith.addf %16, %17 : vector<16x128xf32>
    %c16 = arith.constant 16 : index
    %c0_13 = arith.constant 0 : index
    %19 = vector.load %arg0[%c16, %c0_13] : memref<32x32xf32, #tpu.memory_space<vmem>>, vector<16x32xf32>
    %cst_14 = arith.constant dense<0.000000e+00> : vector<16x128xf32>
    %20 = tpu.matmul %19, %2, %cst_14 {dimension_numbers = #tpu.dot_dimension_numbers<[1], [0], [0], [1], [0, 0, 1, 1], [], []>} : vector<16x32xf32>, vector<32x128xf32>, vector<16x128xf32> -> vector<16x128xf32>
    %21 = vector.broadcast %10 : vector<1x128xf32> to vector<16x128xf32>
    %22 = arith.addf %20, %21 : vector<16x128xf32>
    %23 = tpu.iota {dimensions = array<i32: 1>} : vector<1x8x1xi32>
    %cst_15 = arith.constant 0.000000e+00 : f32
    %24 = vector.broadcast %cst_15 : f32 to vector<2x32xf32>
    %cst_16 = arith.constant 0.000000e+00 : f32
    %25 = vector.broadcast %cst_16 : f32 to vector<2x8x32xf32>
    %26 = vector.extract_strided_slice %18 {offsets = [0, 0], sizes = [2, 128], strides = [1, 1]} : vector<16x128xf32> to vector<2x128xf32>
    %cst_17 = arith.constant dense<0.000000e+00> : vector<2x128xf32>
    %27 = tpu.matmul %24, %1, %cst_17 {dimension_numbers = #tpu.dot_dimension_numbers<[1], [0], [0], [1], [0, 0, 1, 1], [], []>} : vector<2x32xf32>, vector<32x128xf32>, vector<2x128xf32> -> vector<2x128xf32>
    %28 = vector.extract_strided_slice %26 {offsets = [0, 0], sizes = [2, 32], strides = [1, 1]} : vector<2x128xf32> to vector<2x32xf32>
    %29 = vector.extract_strided_slice %27 {offsets = [0, 0], sizes = [2, 32], strides = [1, 1]} : vector<2x128xf32> to vector<2x32xf32>
    %30 = arith.addf %28, %29 : vector<2x32xf32>
    %31 = arith.negf %30 : vector<2x32xf32>
    %32 = math.exp %31 : vector<2x32xf32>
    %cst_18 = arith.constant 1.000000e+00 : f32
    %33 = vector.broadcast %cst_18 : f32 to vector<2x32xf32>
    %34 = arith.addf %33, %32 : vector<2x32xf32>
    %35 = arith.divf %33, %34 : vector<2x32xf32>
    %36 = vector.extract_strided_slice %26 {offsets = [0, 32], sizes = [2, 32], strides = [1, 1]} : vector<2x128xf32> to vector<2x32xf32>
    %37 = vector.extract_strided_slice %27 {offsets = [0, 32], sizes = [2, 32], strides = [1, 1]} : vector<2x128xf32> to vector<2x32xf32>
    %38 = arith.addf %36, %37 : vector<2x32xf32>
    %39 = arith.negf %38 : vector<2x32xf32>
    %40 = math.exp %39 : vector<2x32xf32>
    %cst_19 = arith.constant 1.000000e+00 : f32
    %41 = vector.broadcast %cst_19 : f32 to vector<2x32xf32>
    %42 = arith.addf %41, %40 : vector<2x32xf32>
    %43 = arith.divf %41, %42 : vector<2x32xf32>
    %44 = vector.extract_strided_slice %26 {offsets = [0, 64], sizes = [2, 32], strides = [1, 1]} : vector<2x128xf32> to vector<2x32xf32>
    %45 = vector.extract_strided_slice %27 {offsets = [0, 64], sizes = [2, 32], strides = [1, 1]} : vector<2x128xf32> to vector<2x32xf32>
    %46 = vector.broadcast %9 : vector<1x32xf32> to vector<2x32xf32>
    %47 = arith.addf %45, %46 : vector<2x32xf32>
    %48 = arith.mulf %35, %47 : vector<2x32xf32>
    %49 = arith.addf %44, %48 : vector<2x32xf32>
    %50 = math.tanh %49 : vector<2x32xf32>
    %cst_20 = arith.constant 1.000000e+00 : f32
    %51 = vector.broadcast %cst_20 : f32 to vector<2x32xf32>
    %52 = arith.subf %51, %43 : vector<2x32xf32>
    %53 = arith.mulf %52, %50 : vector<2x32xf32>
    %54 = arith.mulf %43, %24 : vector<2x32xf32>
    %55 = arith.addf %53, %54 : vector<2x32xf32>
    %56 = vector.extract_strided_slice %14 {offsets = [0, 0], sizes = [2, 1], strides = [1, 1]} : vector<2x8xf32> to vector<2x1xf32>
    %57 = vector.broadcast %56 : vector<2x1xf32> to vector<2x32xf32>
    %58 = arith.mulf %57, %55 : vector<2x32xf32>
    %cst_21 = arith.constant 1.000000e+00 : f32
    %59 = vector.broadcast %cst_21 : f32 to vector<2x1xf32>
    %60 = arith.subf %59, %56 : vector<2x1xf32>
    %61 = vector.broadcast %60 : vector<2x1xf32> to vector<2x32xf32>
    %62 = arith.mulf %61, %24 : vector<2x32xf32>
    %63 = arith.addf %58, %62 : vector<2x32xf32>
    %c0_i32 = arith.constant 0 : i32
    %64 = vector.broadcast %c0_i32 : i32 to vector<1x8x1xi32>
    %65 = arith.cmpi eq, %23, %64 : vector<1x8x1xi32>
    %66 = vector.broadcast %56 : vector<2x1xf32> to vector<2x32xf32>
    %67 = arith.mulf %66, %55 : vector<2x32xf32>
    %68 = vector.shape_cast %67 : vector<2x32xf32> to vector<2x1x32xf32>
    %cst_22 = arith.constant 0.000000e+00 : f32
    %69 = vector.shape_cast %65 : vector<1x8x1xi1> to vector<1x8x1xi1>
    %70 = vector.broadcast %69 : vector<1x8x1xi1> to vector<2x8x32xi1>
    %71 = vector.shape_cast %68 : vector<2x1x32xf32> to vector<2x1x32xf32>
    %72 = vector.broadcast %71 : vector<2x1x32xf32> to vector<2x8x32xf32>
    %73 = vector.broadcast %cst_22 : f32 to vector<2x8x32xf32>
    %74 = arith.select %70, %72, %73 : vector<2x8x32xi1>, vector<2x8x32xf32>
    %75 = arith.addf %25, %74 : vector<2x8x32xf32>
    %76 = vector.extract_strided_slice %18 {offsets = [2, 0], sizes = [2, 128], strides = [1, 1]} : vector<16x128xf32> to vector<2x128xf32>
    %cst_23 = arith.constant dense<0.000000e+00> : vector<2x128xf32>
    %77 = tpu.matmul %63, %1, %cst_23 {dimension_numbers = #tpu.dot_dimension_numbers<[1], [0], [0], [1], [0, 0, 1, 1], [], []>} : vector<2x32xf32>, vector<32x128xf32>, vector<2x128xf32> -> vector<2x128xf32>
    %78 = vector.extract_strided_slice %76 {offsets = [0, 0], sizes = [2, 32], strides = [1, 1]} : vector<2x128xf32> to vector<2x32xf32>
    %79 = vector.extract_strided_slice %77 {offsets = [0, 0], sizes = [2, 32], strides = [1, 1]} : vector<2x128xf32> to vector<2x32xf32>
    %80 = arith.addf %78, %79 : vector<2x32xf32>
    %81 = arith.negf %80 : vector<2x32xf32>
    %82 = math.exp %81 : vector<2x32xf32>
    %cst_24 = arith.constant 1.000000e+00 : f32
    %83 = vector.broadcast %cst_24 : f32 to vector<2x32xf32>
    %84 = arith.addf %83, %82 : vector<2x32xf32>
    %85 = arith.divf %83, %84 : vector<2x32xf32>
    %86 = vector.extract_strided_slice %76 {offsets = [0, 32], sizes = [2, 32], strides = [1, 1]} : vector<2x128xf32> to vector<2x32xf32>
    %87 = vector.extract_strided_slice %77 {offsets = [0, 32], sizes = [2, 32], strides = [1, 1]} : vector<2x128xf32> to vector<2x32xf32>
    %88 = arith.addf %86, %87 : vector<2x32xf32>
    %89 = arith.negf %88 : vector<2x32xf32>
    %90 = math.exp %89 : vector<2x32xf32>
    %cst_25 = arith.constant 1.000000e+00 : f32
    %91 = vector.broadcast %cst_25 : f32 to vector<2x32xf32>
    %92 = arith.addf %91, %90 : vector<2x32xf32>
    %93 = arith.divf %91, %92 : vector<2x32xf32>
    %94 = vector.extract_strided_slice %76 {offsets = [0, 64], sizes = [2, 32], strides = [1, 1]} : vector<2x128xf32> to vector<2x32xf32>
    %95 = vector.extract_strided_slice %77 {offsets = [0, 64], sizes = [2, 32], strides = [1, 1]} : vector<2x128xf32> to vector<2x32xf32>
    %96 = vector.broadcast %9 : vector<1x32xf32> to vector<2x32xf32>
    %97 = arith.addf %95, %96 : vector<2x32xf32>
    %98 = arith.mulf %85, %97 : vector<2x32xf32>
    %99 = arith.addf %94, %98 : vector<2x32xf32>
    %100 = math.tanh %99 : vector<2x32xf32>
    %cst_26 = arith.constant 1.000000e+00 : f32
    %101 = vector.broadcast %cst_26 : f32 to vector<2x32xf32>
    %102 = arith.subf %101, %93 : vector<2x32xf32>
    %103 = arith.mulf %102, %100 : vector<2x32xf32>
    %104 = arith.mulf %93, %63 : vector<2x32xf32>
    %105 = arith.addf %103, %104 : vector<2x32xf32>
    %106 = vector.extract_strided_slice %14 {offsets = [0, 1], sizes = [2, 1], strides = [1, 1]} : vector<2x8xf32> to vector<2x1xf32>
    %107 = vector.broadcast %106 : vector<2x1xf32> to vector<2x32xf32>
    %108 = arith.mulf %107, %105 : vector<2x32xf32>
    %cst_27 = arith.constant 1.000000e+00 : f32
    %109 = vector.broadcast %cst_27 : f32 to vector<2x1xf32>
    %110 = arith.subf %109, %106 : vector<2x1xf32>
    %111 = vector.broadcast %110 : vector<2x1xf32> to vector<2x32xf32>
    %112 = arith.mulf %111, %63 : vector<2x32xf32>
    %113 = arith.addf %108, %112 : vector<2x32xf32>
    %c1_i32 = arith.constant 1 : i32
    %114 = vector.broadcast %c1_i32 : i32 to vector<1x8x1xi32>
    %115 = arith.cmpi eq, %23, %114 : vector<1x8x1xi32>
    %116 = vector.broadcast %106 : vector<2x1xf32> to vector<2x32xf32>
    %117 = arith.mulf %116, %105 : vector<2x32xf32>
    %118 = vector.shape_cast %117 : vector<2x32xf32> to vector<2x1x32xf32>
    %cst_28 = arith.constant 0.000000e+00 : f32
    %119 = vector.shape_cast %115 : vector<1x8x1xi1> to vector<1x8x1xi1>
    %120 = vector.broadcast %119 : vector<1x8x1xi1> to vector<2x8x32xi1>
    %121 = vector.shape_cast %118 : vector<2x1x32xf32> to vector<2x1x32xf32>
    %122 = vector.broadcast %121 : vector<2x1x32xf32> to vector<2x8x32xf32>
    %123 = vector.broadcast %cst_28 : f32 to vector<2x8x32xf32>
    %124 = arith.select %120, %122, %123 : vector<2x8x32xi1>, vector<2x8x32xf32>
    %125 = arith.addf %75, %124 : vector<2x8x32xf32>
    %126 = vector.extract_strided_slice %18 {offsets = [4, 0], sizes = [2, 128], strides = [1, 1]} : vector<16x128xf32> to vector<2x128xf32>
    %cst_29 = arith.constant dense<0.000000e+00> : vector<2x128xf32>
    %127 = tpu.matmul %113, %1, %cst_29 {dimension_numbers = #tpu.dot_dimension_numbers<[1], [0], [0], [1], [0, 0, 1, 1], [], []>} : vector<2x32xf32>, vector<32x128xf32>, vector<2x128xf32> -> vector<2x128xf32>
    %128 = vector.extract_strided_slice %126 {offsets = [0, 0], sizes = [2, 32], strides = [1, 1]} : vector<2x128xf32> to vector<2x32xf32>
    %129 = vector.extract_strided_slice %127 {offsets = [0, 0], sizes = [2, 32], strides = [1, 1]} : vector<2x128xf32> to vector<2x32xf32>
    %130 = arith.addf %128, %129 : vector<2x32xf32>
    %131 = arith.negf %130 : vector<2x32xf32>
    %132 = math.exp %131 : vector<2x32xf32>
    %cst_30 = arith.constant 1.000000e+00 : f32
    %133 = vector.broadcast %cst_30 : f32 to vector<2x32xf32>
    %134 = arith.addf %133, %132 : vector<2x32xf32>
    %135 = arith.divf %133, %134 : vector<2x32xf32>
    %136 = vector.extract_strided_slice %126 {offsets = [0, 32], sizes = [2, 32], strides = [1, 1]} : vector<2x128xf32> to vector<2x32xf32>
    %137 = vector.extract_strided_slice %127 {offsets = [0, 32], sizes = [2, 32], strides = [1, 1]} : vector<2x128xf32> to vector<2x32xf32>
    %138 = arith.addf %136, %137 : vector<2x32xf32>
    %139 = arith.negf %138 : vector<2x32xf32>
    %140 = math.exp %139 : vector<2x32xf32>
    %cst_31 = arith.constant 1.000000e+00 : f32
    %141 = vector.broadcast %cst_31 : f32 to vector<2x32xf32>
    %142 = arith.addf %141, %140 : vector<2x32xf32>
    %143 = arith.divf %141, %142 : vector<2x32xf32>
    %144 = vector.extract_strided_slice %126 {offsets = [0, 64], sizes = [2, 32], strides = [1, 1]} : vector<2x128xf32> to vector<2x32xf32>
    %145 = vector.extract_strided_slice %127 {offsets = [0, 64], sizes = [2, 32], strides = [1, 1]} : vector<2x128xf32> to vector<2x32xf32>
    %146 = vector.broadcast %9 : vector<1x32xf32> to vector<2x32xf32>
    %147 = arith.addf %145, %146 : vector<2x32xf32>
    %148 = arith.mulf %135, %147 : vector<2x32xf32>
    %149 = arith.addf %144, %148 : vector<2x32xf32>
    %150 = math.tanh %149 : vector<2x32xf32>
    %cst_32 = arith.constant 1.000000e+00 : f32
    %151 = vector.broadcast %cst_32 : f32 to vector<2x32xf32>
    %152 = arith.subf %151, %143 : vector<2x32xf32>
    %153 = arith.mulf %152, %150 : vector<2x32xf32>
    %154 = arith.mulf %143, %113 : vector<2x32xf32>
    %155 = arith.addf %153, %154 : vector<2x32xf32>
    %156 = vector.extract_strided_slice %14 {offsets = [0, 2], sizes = [2, 1], strides = [1, 1]} : vector<2x8xf32> to vector<2x1xf32>
    %157 = vector.broadcast %156 : vector<2x1xf32> to vector<2x32xf32>
    %158 = arith.mulf %157, %155 : vector<2x32xf32>
    %cst_33 = arith.constant 1.000000e+00 : f32
    %159 = vector.broadcast %cst_33 : f32 to vector<2x1xf32>
    %160 = arith.subf %159, %156 : vector<2x1xf32>
    %161 = vector.broadcast %160 : vector<2x1xf32> to vector<2x32xf32>
    %162 = arith.mulf %161, %113 : vector<2x32xf32>
    %163 = arith.addf %158, %162 : vector<2x32xf32>
    %c2_i32 = arith.constant 2 : i32
    %164 = vector.broadcast %c2_i32 : i32 to vector<1x8x1xi32>
    %165 = arith.cmpi eq, %23, %164 : vector<1x8x1xi32>
    %166 = vector.broadcast %156 : vector<2x1xf32> to vector<2x32xf32>
    %167 = arith.mulf %166, %155 : vector<2x32xf32>
    %168 = vector.shape_cast %167 : vector<2x32xf32> to vector<2x1x32xf32>
    %cst_34 = arith.constant 0.000000e+00 : f32
    %169 = vector.shape_cast %165 : vector<1x8x1xi1> to vector<1x8x1xi1>
    %170 = vector.broadcast %169 : vector<1x8x1xi1> to vector<2x8x32xi1>
    %171 = vector.shape_cast %168 : vector<2x1x32xf32> to vector<2x1x32xf32>
    %172 = vector.broadcast %171 : vector<2x1x32xf32> to vector<2x8x32xf32>
    %173 = vector.broadcast %cst_34 : f32 to vector<2x8x32xf32>
    %174 = arith.select %170, %172, %173 : vector<2x8x32xi1>, vector<2x8x32xf32>
    %175 = arith.addf %125, %174 : vector<2x8x32xf32>
    %176 = vector.extract_strided_slice %18 {offsets = [6, 0], sizes = [2, 128], strides = [1, 1]} : vector<16x128xf32> to vector<2x128xf32>
    %cst_35 = arith.constant dense<0.000000e+00> : vector<2x128xf32>
    %177 = tpu.matmul %163, %1, %cst_35 {dimension_numbers = #tpu.dot_dimension_numbers<[1], [0], [0], [1], [0, 0, 1, 1], [], []>} : vector<2x32xf32>, vector<32x128xf32>, vector<2x128xf32> -> vector<2x128xf32>
    %178 = vector.extract_strided_slice %176 {offsets = [0, 0], sizes = [2, 32], strides = [1, 1]} : vector<2x128xf32> to vector<2x32xf32>
    %179 = vector.extract_strided_slice %177 {offsets = [0, 0], sizes = [2, 32], strides = [1, 1]} : vector<2x128xf32> to vector<2x32xf32>
    %180 = arith.addf %178, %179 : vector<2x32xf32>
    %181 = arith.negf %180 : vector<2x32xf32>
    %182 = math.exp %181 : vector<2x32xf32>
    %cst_36 = arith.constant 1.000000e+00 : f32
    %183 = vector.broadcast %cst_36 : f32 to vector<2x32xf32>
    %184 = arith.addf %183, %182 : vector<2x32xf32>
    %185 = arith.divf %183, %184 : vector<2x32xf32>
    %186 = vector.extract_strided_slice %176 {offsets = [0, 32], sizes = [2, 32], strides = [1, 1]} : vector<2x128xf32> to vector<2x32xf32>
    %187 = vector.extract_strided_slice %177 {offsets = [0, 32], sizes = [2, 32], strides = [1, 1]} : vector<2x128xf32> to vector<2x32xf32>
    %188 = arith.addf %186, %187 : vector<2x32xf32>
    %189 = arith.negf %188 : vector<2x32xf32>
    %190 = math.exp %189 : vector<2x32xf32>
    %cst_37 = arith.constant 1.000000e+00 : f32
    %191 = vector.broadcast %cst_37 : f32 to vector<2x32xf32>
    %192 = arith.addf %191, %190 : vector<2x32xf32>
    %193 = arith.divf %191, %192 : vector<2x32xf32>
    %194 = vector.extract_strided_slice %176 {offsets = [0, 64], sizes = [2, 32], strides = [1, 1]} : vector<2x128xf32> to vector<2x32xf32>
    %195 = vector.extract_strided_slice %177 {offsets = [0, 64], sizes = [2, 32], strides = [1, 1]} : vector<2x128xf32> to vector<2x32xf32>
    %196 = vector.broadcast %9 : vector<1x32xf32> to vector<2x32xf32>
    %197 = arith.addf %195, %196 : vector<2x32xf32>
    %198 = arith.mulf %185, %197 : vector<2x32xf32>
    %199 = arith.addf %194, %198 : vector<2x32xf32>
    %200 = math.tanh %199 : vector<2x32xf32>
    %cst_38 = arith.constant 1.000000e+00 : f32
    %201 = vector.broadcast %cst_38 : f32 to vector<2x32xf32>
    %202 = arith.subf %201, %193 : vector<2x32xf32>
    %203 = arith.mulf %202, %200 : vector<2x32xf32>
    %204 = arith.mulf %193, %163 : vector<2x32xf32>
    %205 = arith.addf %203, %204 : vector<2x32xf32>
    %206 = vector.extract_strided_slice %14 {offsets = [0, 3], sizes = [2, 1], strides = [1, 1]} : vector<2x8xf32> to vector<2x1xf32>
    %207 = vector.broadcast %206 : vector<2x1xf32> to vector<2x32xf32>
    %208 = arith.mulf %207, %205 : vector<2x32xf32>
    %cst_39 = arith.constant 1.000000e+00 : f32
    %209 = vector.broadcast %cst_39 : f32 to vector<2x1xf32>
    %210 = arith.subf %209, %206 : vector<2x1xf32>
    %211 = vector.broadcast %210 : vector<2x1xf32> to vector<2x32xf32>
    %212 = arith.mulf %211, %163 : vector<2x32xf32>
    %213 = arith.addf %208, %212 : vector<2x32xf32>
    %c3_i32 = arith.constant 3 : i32
    %214 = vector.broadcast %c3_i32 : i32 to vector<1x8x1xi32>
    %215 = arith.cmpi eq, %23, %214 : vector<1x8x1xi32>
    %216 = vector.broadcast %206 : vector<2x1xf32> to vector<2x32xf32>
    %217 = arith.mulf %216, %205 : vector<2x32xf32>
    %218 = vector.shape_cast %217 : vector<2x32xf32> to vector<2x1x32xf32>
    %cst_40 = arith.constant 0.000000e+00 : f32
    %219 = vector.shape_cast %215 : vector<1x8x1xi1> to vector<1x8x1xi1>
    %220 = vector.broadcast %219 : vector<1x8x1xi1> to vector<2x8x32xi1>
    %221 = vector.shape_cast %218 : vector<2x1x32xf32> to vector<2x1x32xf32>
    %222 = vector.broadcast %221 : vector<2x1x32xf32> to vector<2x8x32xf32>
    %223 = vector.broadcast %cst_40 : f32 to vector<2x8x32xf32>
    %224 = arith.select %220, %222, %223 : vector<2x8x32xi1>, vector<2x8x32xf32>
    %225 = arith.addf %175, %224 : vector<2x8x32xf32>
    %226 = vector.extract_strided_slice %18 {offsets = [8, 0], sizes = [2, 128], strides = [1, 1]} : vector<16x128xf32> to vector<2x128xf32>
    %cst_41 = arith.constant dense<0.000000e+00> : vector<2x128xf32>
    %227 = tpu.matmul %213, %1, %cst_41 {dimension_numbers = #tpu.dot_dimension_numbers<[1], [0], [0], [1], [0, 0, 1, 1], [], []>} : vector<2x32xf32>, vector<32x128xf32>, vector<2x128xf32> -> vector<2x128xf32>
    %228 = vector.extract_strided_slice %226 {offsets = [0, 0], sizes = [2, 32], strides = [1, 1]} : vector<2x128xf32> to vector<2x32xf32>
    %229 = vector.extract_strided_slice %227 {offsets = [0, 0], sizes = [2, 32], strides = [1, 1]} : vector<2x128xf32> to vector<2x32xf32>
    %230 = arith.addf %228, %229 : vector<2x32xf32>
    %231 = arith.negf %230 : vector<2x32xf32>
    %232 = math.exp %231 : vector<2x32xf32>
    %cst_42 = arith.constant 1.000000e+00 : f32
    %233 = vector.broadcast %cst_42 : f32 to vector<2x32xf32>
    %234 = arith.addf %233, %232 : vector<2x32xf32>
    %235 = arith.divf %233, %234 : vector<2x32xf32>
    %236 = vector.extract_strided_slice %226 {offsets = [0, 32], sizes = [2, 32], strides = [1, 1]} : vector<2x128xf32> to vector<2x32xf32>
    %237 = vector.extract_strided_slice %227 {offsets = [0, 32], sizes = [2, 32], strides = [1, 1]} : vector<2x128xf32> to vector<2x32xf32>
    %238 = arith.addf %236, %237 : vector<2x32xf32>
    %239 = arith.negf %238 : vector<2x32xf32>
    %240 = math.exp %239 : vector<2x32xf32>
    %cst_43 = arith.constant 1.000000e+00 : f32
    %241 = vector.broadcast %cst_43 : f32 to vector<2x32xf32>
    %242 = arith.addf %241, %240 : vector<2x32xf32>
    %243 = arith.divf %241, %242 : vector<2x32xf32>
    %244 = vector.extract_strided_slice %226 {offsets = [0, 64], sizes = [2, 32], strides = [1, 1]} : vector<2x128xf32> to vector<2x32xf32>
    %245 = vector.extract_strided_slice %227 {offsets = [0, 64], sizes = [2, 32], strides = [1, 1]} : vector<2x128xf32> to vector<2x32xf32>
    %246 = vector.broadcast %9 : vector<1x32xf32> to vector<2x32xf32>
    %247 = arith.addf %245, %246 : vector<2x32xf32>
    %248 = arith.mulf %235, %247 : vector<2x32xf32>
    %249 = arith.addf %244, %248 : vector<2x32xf32>
    %250 = math.tanh %249 : vector<2x32xf32>
    %cst_44 = arith.constant 1.000000e+00 : f32
    %251 = vector.broadcast %cst_44 : f32 to vector<2x32xf32>
    %252 = arith.subf %251, %243 : vector<2x32xf32>
    %253 = arith.mulf %252, %250 : vector<2x32xf32>
    %254 = arith.mulf %243, %213 : vector<2x32xf32>
    %255 = arith.addf %253, %254 : vector<2x32xf32>
    %256 = vector.extract_strided_slice %14 {offsets = [0, 4], sizes = [2, 1], strides = [1, 1]} : vector<2x8xf32> to vector<2x1xf32>
    %257 = vector.broadcast %256 : vector<2x1xf32> to vector<2x32xf32>
    %258 = arith.mulf %257, %255 : vector<2x32xf32>
    %cst_45 = arith.constant 1.000000e+00 : f32
    %259 = vector.broadcast %cst_45 : f32 to vector<2x1xf32>
    %260 = arith.subf %259, %256 : vector<2x1xf32>
    %261 = vector.broadcast %260 : vector<2x1xf32> to vector<2x32xf32>
    %262 = arith.mulf %261, %213 : vector<2x32xf32>
    %263 = arith.addf %258, %262 : vector<2x32xf32>
    %c4_i32 = arith.constant 4 : i32
    %264 = vector.broadcast %c4_i32 : i32 to vector<1x8x1xi32>
    %265 = arith.cmpi eq, %23, %264 : vector<1x8x1xi32>
    %266 = vector.broadcast %256 : vector<2x1xf32> to vector<2x32xf32>
    %267 = arith.mulf %266, %255 : vector<2x32xf32>
    %268 = vector.shape_cast %267 : vector<2x32xf32> to vector<2x1x32xf32>
    %cst_46 = arith.constant 0.000000e+00 : f32
    %269 = vector.shape_cast %265 : vector<1x8x1xi1> to vector<1x8x1xi1>
    %270 = vector.broadcast %269 : vector<1x8x1xi1> to vector<2x8x32xi1>
    %271 = vector.shape_cast %268 : vector<2x1x32xf32> to vector<2x1x32xf32>
    %272 = vector.broadcast %271 : vector<2x1x32xf32> to vector<2x8x32xf32>
    %273 = vector.broadcast %cst_46 : f32 to vector<2x8x32xf32>
    %274 = arith.select %270, %272, %273 : vector<2x8x32xi1>, vector<2x8x32xf32>
    %275 = arith.addf %225, %274 : vector<2x8x32xf32>
    %276 = vector.extract_strided_slice %18 {offsets = [10, 0], sizes = [2, 128], strides = [1, 1]} : vector<16x128xf32> to vector<2x128xf32>
    %cst_47 = arith.constant dense<0.000000e+00> : vector<2x128xf32>
    %277 = tpu.matmul %263, %1, %cst_47 {dimension_numbers = #tpu.dot_dimension_numbers<[1], [0], [0], [1], [0, 0, 1, 1], [], []>} : vector<2x32xf32>, vector<32x128xf32>, vector<2x128xf32> -> vector<2x128xf32>
    %278 = vector.extract_strided_slice %276 {offsets = [0, 0], sizes = [2, 32], strides = [1, 1]} : vector<2x128xf32> to vector<2x32xf32>
    %279 = vector.extract_strided_slice %277 {offsets = [0, 0], sizes = [2, 32], strides = [1, 1]} : vector<2x128xf32> to vector<2x32xf32>
    %280 = arith.addf %278, %279 : vector<2x32xf32>
    %281 = arith.negf %280 : vector<2x32xf32>
    %282 = math.exp %281 : vector<2x32xf32>
    %cst_48 = arith.constant 1.000000e+00 : f32
    %283 = vector.broadcast %cst_48 : f32 to vector<2x32xf32>
    %284 = arith.addf %283, %282 : vector<2x32xf32>
    %285 = arith.divf %283, %284 : vector<2x32xf32>
    %286 = vector.extract_strided_slice %276 {offsets = [0, 32], sizes = [2, 32], strides = [1, 1]} : vector<2x128xf32> to vector<2x32xf32>
    %287 = vector.extract_strided_slice %277 {offsets = [0, 32], sizes = [2, 32], strides = [1, 1]} : vector<2x128xf32> to vector<2x32xf32>
    %288 = arith.addf %286, %287 : vector<2x32xf32>
    %289 = arith.negf %288 : vector<2x32xf32>
    %290 = math.exp %289 : vector<2x32xf32>
    %cst_49 = arith.constant 1.000000e+00 : f32
    %291 = vector.broadcast %cst_49 : f32 to vector<2x32xf32>
    %292 = arith.addf %291, %290 : vector<2x32xf32>
    %293 = arith.divf %291, %292 : vector<2x32xf32>
    %294 = vector.extract_strided_slice %276 {offsets = [0, 64], sizes = [2, 32], strides = [1, 1]} : vector<2x128xf32> to vector<2x32xf32>
    %295 = vector.extract_strided_slice %277 {offsets = [0, 64], sizes = [2, 32], strides = [1, 1]} : vector<2x128xf32> to vector<2x32xf32>
    %296 = vector.broadcast %9 : vector<1x32xf32> to vector<2x32xf32>
    %297 = arith.addf %295, %296 : vector<2x32xf32>
    %298 = arith.mulf %285, %297 : vector<2x32xf32>
    %299 = arith.addf %294, %298 : vector<2x32xf32>
    %300 = math.tanh %299 : vector<2x32xf32>
    %cst_50 = arith.constant 1.000000e+00 : f32
    %301 = vector.broadcast %cst_50 : f32 to vector<2x32xf32>
    %302 = arith.subf %301, %293 : vector<2x32xf32>
    %303 = arith.mulf %302, %300 : vector<2x32xf32>
    %304 = arith.mulf %293, %263 : vector<2x32xf32>
    %305 = arith.addf %303, %304 : vector<2x32xf32>
    %306 = vector.extract_strided_slice %14 {offsets = [0, 5], sizes = [2, 1], strides = [1, 1]} : vector<2x8xf32> to vector<2x1xf32>
    %307 = vector.broadcast %306 : vector<2x1xf32> to vector<2x32xf32>
    %308 = arith.mulf %307, %305 : vector<2x32xf32>
    %cst_51 = arith.constant 1.000000e+00 : f32
    %309 = vector.broadcast %cst_51 : f32 to vector<2x1xf32>
    %310 = arith.subf %309, %306 : vector<2x1xf32>
    %311 = vector.broadcast %310 : vector<2x1xf32> to vector<2x32xf32>
    %312 = arith.mulf %311, %263 : vector<2x32xf32>
    %313 = arith.addf %308, %312 : vector<2x32xf32>
    %c5_i32 = arith.constant 5 : i32
    %314 = vector.broadcast %c5_i32 : i32 to vector<1x8x1xi32>
    %315 = arith.cmpi eq, %23, %314 : vector<1x8x1xi32>
    %316 = vector.broadcast %306 : vector<2x1xf32> to vector<2x32xf32>
    %317 = arith.mulf %316, %305 : vector<2x32xf32>
    %318 = vector.shape_cast %317 : vector<2x32xf32> to vector<2x1x32xf32>
    %cst_52 = arith.constant 0.000000e+00 : f32
    %319 = vector.shape_cast %315 : vector<1x8x1xi1> to vector<1x8x1xi1>
    %320 = vector.broadcast %319 : vector<1x8x1xi1> to vector<2x8x32xi1>
    %321 = vector.shape_cast %318 : vector<2x1x32xf32> to vector<2x1x32xf32>
    %322 = vector.broadcast %321 : vector<2x1x32xf32> to vector<2x8x32xf32>
    %323 = vector.broadcast %cst_52 : f32 to vector<2x8x32xf32>
    %324 = arith.select %320, %322, %323 : vector<2x8x32xi1>, vector<2x8x32xf32>
    %325 = arith.addf %275, %324 : vector<2x8x32xf32>
    %326 = vector.extract_strided_slice %18 {offsets = [12, 0], sizes = [2, 128], strides = [1, 1]} : vector<16x128xf32> to vector<2x128xf32>
    %cst_53 = arith.constant dense<0.000000e+00> : vector<2x128xf32>
    %327 = tpu.matmul %313, %1, %cst_53 {dimension_numbers = #tpu.dot_dimension_numbers<[1], [0], [0], [1], [0, 0, 1, 1], [], []>} : vector<2x32xf32>, vector<32x128xf32>, vector<2x128xf32> -> vector<2x128xf32>
    %328 = vector.extract_strided_slice %326 {offsets = [0, 0], sizes = [2, 32], strides = [1, 1]} : vector<2x128xf32> to vector<2x32xf32>
    %329 = vector.extract_strided_slice %327 {offsets = [0, 0], sizes = [2, 32], strides = [1, 1]} : vector<2x128xf32> to vector<2x32xf32>
    %330 = arith.addf %328, %329 : vector<2x32xf32>
    %331 = arith.negf %330 : vector<2x32xf32>
    %332 = math.exp %331 : vector<2x32xf32>
    %cst_54 = arith.constant 1.000000e+00 : f32
    %333 = vector.broadcast %cst_54 : f32 to vector<2x32xf32>
    %334 = arith.addf %333, %332 : vector<2x32xf32>
    %335 = arith.divf %333, %334 : vector<2x32xf32>
    %336 = vector.extract_strided_slice %326 {offsets = [0, 32], sizes = [2, 32], strides = [1, 1]} : vector<2x128xf32> to vector<2x32xf32>
    %337 = vector.extract_strided_slice %327 {offsets = [0, 32], sizes = [2, 32], strides = [1, 1]} : vector<2x128xf32> to vector<2x32xf32>
    %338 = arith.addf %336, %337 : vector<2x32xf32>
    %339 = arith.negf %338 : vector<2x32xf32>
    %340 = math.exp %339 : vector<2x32xf32>
    %cst_55 = arith.constant 1.000000e+00 : f32
    %341 = vector.broadcast %cst_55 : f32 to vector<2x32xf32>
    %342 = arith.addf %341, %340 : vector<2x32xf32>
    %343 = arith.divf %341, %342 : vector<2x32xf32>
    %344 = vector.extract_strided_slice %326 {offsets = [0, 64], sizes = [2, 32], strides = [1, 1]} : vector<2x128xf32> to vector<2x32xf32>
    %345 = vector.extract_strided_slice %327 {offsets = [0, 64], sizes = [2, 32], strides = [1, 1]} : vector<2x128xf32> to vector<2x32xf32>
    %346 = vector.broadcast %9 : vector<1x32xf32> to vector<2x32xf32>
    %347 = arith.addf %345, %346 : vector<2x32xf32>
    %348 = arith.mulf %335, %347 : vector<2x32xf32>
    %349 = arith.addf %344, %348 : vector<2x32xf32>
    %350 = math.tanh %349 : vector<2x32xf32>
    %cst_56 = arith.constant 1.000000e+00 : f32
    %351 = vector.broadcast %cst_56 : f32 to vector<2x32xf32>
    %352 = arith.subf %351, %343 : vector<2x32xf32>
    %353 = arith.mulf %352, %350 : vector<2x32xf32>
    %354 = arith.mulf %343, %313 : vector<2x32xf32>
    %355 = arith.addf %353, %354 : vector<2x32xf32>
    %356 = vector.extract_strided_slice %14 {offsets = [0, 6], sizes = [2, 1], strides = [1, 1]} : vector<2x8xf32> to vector<2x1xf32>
    %357 = vector.broadcast %356 : vector<2x1xf32> to vector<2x32xf32>
    %358 = arith.mulf %357, %355 : vector<2x32xf32>
    %cst_57 = arith.constant 1.000000e+00 : f32
    %359 = vector.broadcast %cst_57 : f32 to vector<2x1xf32>
    %360 = arith.subf %359, %356 : vector<2x1xf32>
    %361 = vector.broadcast %360 : vector<2x1xf32> to vector<2x32xf32>
    %362 = arith.mulf %361, %313 : vector<2x32xf32>
    %363 = arith.addf %358, %362 : vector<2x32xf32>
    %c6_i32 = arith.constant 6 : i32
    %364 = vector.broadcast %c6_i32 : i32 to vector<1x8x1xi32>
    %365 = arith.cmpi eq, %23, %364 : vector<1x8x1xi32>
    %366 = vector.broadcast %356 : vector<2x1xf32> to vector<2x32xf32>
    %367 = arith.mulf %366, %355 : vector<2x32xf32>
    %368 = vector.shape_cast %367 : vector<2x32xf32> to vector<2x1x32xf32>
    %cst_58 = arith.constant 0.000000e+00 : f32
    %369 = vector.shape_cast %365 : vector<1x8x1xi1> to vector<1x8x1xi1>
    %370 = vector.broadcast %369 : vector<1x8x1xi1> to vector<2x8x32xi1>
    %371 = vector.shape_cast %368 : vector<2x1x32xf32> to vector<2x1x32xf32>
    %372 = vector.broadcast %371 : vector<2x1x32xf32> to vector<2x8x32xf32>
    %373 = vector.broadcast %cst_58 : f32 to vector<2x8x32xf32>
    %374 = arith.select %370, %372, %373 : vector<2x8x32xi1>, vector<2x8x32xf32>
    %375 = arith.addf %325, %374 : vector<2x8x32xf32>
    %376 = vector.extract_strided_slice %18 {offsets = [14, 0], sizes = [2, 128], strides = [1, 1]} : vector<16x128xf32> to vector<2x128xf32>
    %cst_59 = arith.constant dense<0.000000e+00> : vector<2x128xf32>
    %377 = tpu.matmul %363, %1, %cst_59 {dimension_numbers = #tpu.dot_dimension_numbers<[1], [0], [0], [1], [0, 0, 1, 1], [], []>} : vector<2x32xf32>, vector<32x128xf32>, vector<2x128xf32> -> vector<2x128xf32>
    %378 = vector.extract_strided_slice %376 {offsets = [0, 0], sizes = [2, 32], strides = [1, 1]} : vector<2x128xf32> to vector<2x32xf32>
    %379 = vector.extract_strided_slice %377 {offsets = [0, 0], sizes = [2, 32], strides = [1, 1]} : vector<2x128xf32> to vector<2x32xf32>
    %380 = arith.addf %378, %379 : vector<2x32xf32>
    %381 = arith.negf %380 : vector<2x32xf32>
    %382 = math.exp %381 : vector<2x32xf32>
    %cst_60 = arith.constant 1.000000e+00 : f32
    %383 = vector.broadcast %cst_60 : f32 to vector<2x32xf32>
    %384 = arith.addf %383, %382 : vector<2x32xf32>
    %385 = arith.divf %383, %384 : vector<2x32xf32>
    %386 = vector.extract_strided_slice %376 {offsets = [0, 32], sizes = [2, 32], strides = [1, 1]} : vector<2x128xf32> to vector<2x32xf32>
    %387 = vector.extract_strided_slice %377 {offsets = [0, 32], sizes = [2, 32], strides = [1, 1]} : vector<2x128xf32> to vector<2x32xf32>
    %388 = arith.addf %386, %387 : vector<2x32xf32>
    %389 = arith.negf %388 : vector<2x32xf32>
    %390 = math.exp %389 : vector<2x32xf32>
    %cst_61 = arith.constant 1.000000e+00 : f32
    %391 = vector.broadcast %cst_61 : f32 to vector<2x32xf32>
    %392 = arith.addf %391, %390 : vector<2x32xf32>
    %393 = arith.divf %391, %392 : vector<2x32xf32>
    %394 = vector.extract_strided_slice %376 {offsets = [0, 64], sizes = [2, 32], strides = [1, 1]} : vector<2x128xf32> to vector<2x32xf32>
    %395 = vector.extract_strided_slice %377 {offsets = [0, 64], sizes = [2, 32], strides = [1, 1]} : vector<2x128xf32> to vector<2x32xf32>
    %396 = vector.broadcast %9 : vector<1x32xf32> to vector<2x32xf32>
    %397 = arith.addf %395, %396 : vector<2x32xf32>
    %398 = arith.mulf %385, %397 : vector<2x32xf32>
    %399 = arith.addf %394, %398 : vector<2x32xf32>
    %400 = math.tanh %399 : vector<2x32xf32>
    %cst_62 = arith.constant 1.000000e+00 : f32
    %401 = vector.broadcast %cst_62 : f32 to vector<2x32xf32>
    %402 = arith.subf %401, %393 : vector<2x32xf32>
    %403 = arith.mulf %402, %400 : vector<2x32xf32>
    %404 = arith.mulf %393, %363 : vector<2x32xf32>
    %405 = arith.addf %403, %404 : vector<2x32xf32>
    %406 = vector.extract_strided_slice %14 {offsets = [0, 7], sizes = [2, 1], strides = [1, 1]} : vector<2x8xf32> to vector<2x1xf32>
    %407 = vector.broadcast %406 : vector<2x1xf32> to vector<2x32xf32>
    %408 = arith.mulf %407, %405 : vector<2x32xf32>
    %cst_63 = arith.constant 1.000000e+00 : f32
    %409 = vector.broadcast %cst_63 : f32 to vector<2x1xf32>
    %410 = arith.subf %409, %406 : vector<2x1xf32>
    %411 = vector.broadcast %410 : vector<2x1xf32> to vector<2x32xf32>
    %412 = arith.mulf %411, %363 : vector<2x32xf32>
    %413 = arith.addf %408, %412 : vector<2x32xf32>
    %c7_i32 = arith.constant 7 : i32
    %414 = vector.broadcast %c7_i32 : i32 to vector<1x8x1xi32>
    %415 = arith.cmpi eq, %23, %414 : vector<1x8x1xi32>
    %416 = vector.broadcast %406 : vector<2x1xf32> to vector<2x32xf32>
    %417 = arith.mulf %416, %405 : vector<2x32xf32>
    %418 = vector.shape_cast %417 : vector<2x32xf32> to vector<2x1x32xf32>
    %cst_64 = arith.constant 0.000000e+00 : f32
    %419 = vector.shape_cast %415 : vector<1x8x1xi1> to vector<1x8x1xi1>
    %420 = vector.broadcast %419 : vector<1x8x1xi1> to vector<2x8x32xi1>
    %421 = vector.shape_cast %418 : vector<2x1x32xf32> to vector<2x1x32xf32>
    %422 = vector.broadcast %421 : vector<2x1x32xf32> to vector<2x8x32xf32>
    %423 = vector.broadcast %cst_64 : f32 to vector<2x8x32xf32>
    %424 = arith.select %420, %422, %423 : vector<2x8x32xi1>, vector<2x8x32xf32>
    %425 = arith.addf %375, %424 : vector<2x8x32xf32>
    %426 = tpu.iota {dimensions = array<i32: 1>} : vector<1x8x1xi32>
    %cst_65 = arith.constant 0.000000e+00 : f32
    %427 = vector.broadcast %cst_65 : f32 to vector<2x8x32xf32>
    %428 = vector.extract_strided_slice %22 {offsets = [0, 0], sizes = [2, 128], strides = [1, 1]} : vector<16x128xf32> to vector<2x128xf32>
    %cst_66 = arith.constant dense<0.000000e+00> : vector<2x128xf32>
    %429 = tpu.matmul %413, %3, %cst_66 {dimension_numbers = #tpu.dot_dimension_numbers<[1], [0], [0], [1], [0, 0, 1, 1], [], []>} : vector<2x32xf32>, vector<32x128xf32>, vector<2x128xf32> -> vector<2x128xf32>
    %430 = vector.extract_strided_slice %428 {offsets = [0, 0], sizes = [2, 32], strides = [1, 1]} : vector<2x128xf32> to vector<2x32xf32>
    %431 = vector.extract_strided_slice %429 {offsets = [0, 0], sizes = [2, 32], strides = [1, 1]} : vector<2x128xf32> to vector<2x32xf32>
    %432 = arith.addf %430, %431 : vector<2x32xf32>
    %433 = arith.negf %432 : vector<2x32xf32>
    %434 = math.exp %433 : vector<2x32xf32>
    %cst_67 = arith.constant 1.000000e+00 : f32
    %435 = vector.broadcast %cst_67 : f32 to vector<2x32xf32>
    %436 = arith.addf %435, %434 : vector<2x32xf32>
    %437 = arith.divf %435, %436 : vector<2x32xf32>
    %438 = vector.extract_strided_slice %428 {offsets = [0, 32], sizes = [2, 32], strides = [1, 1]} : vector<2x128xf32> to vector<2x32xf32>
    %439 = vector.extract_strided_slice %429 {offsets = [0, 32], sizes = [2, 32], strides = [1, 1]} : vector<2x128xf32> to vector<2x32xf32>
    %440 = arith.addf %438, %439 : vector<2x32xf32>
    %441 = arith.negf %440 : vector<2x32xf32>
    %442 = math.exp %441 : vector<2x32xf32>
    %cst_68 = arith.constant 1.000000e+00 : f32
    %443 = vector.broadcast %cst_68 : f32 to vector<2x32xf32>
    %444 = arith.addf %443, %442 : vector<2x32xf32>
    %445 = arith.divf %443, %444 : vector<2x32xf32>
    %446 = vector.extract_strided_slice %428 {offsets = [0, 64], sizes = [2, 32], strides = [1, 1]} : vector<2x128xf32> to vector<2x32xf32>
    %447 = vector.extract_strided_slice %429 {offsets = [0, 64], sizes = [2, 32], strides = [1, 1]} : vector<2x128xf32> to vector<2x32xf32>
    %448 = vector.broadcast %11 : vector<1x32xf32> to vector<2x32xf32>
    %449 = arith.addf %447, %448 : vector<2x32xf32>
    %450 = arith.mulf %437, %449 : vector<2x32xf32>
    %451 = arith.addf %446, %450 : vector<2x32xf32>
    %452 = math.tanh %451 : vector<2x32xf32>
    %cst_69 = arith.constant 1.000000e+00 : f32
    %453 = vector.broadcast %cst_69 : f32 to vector<2x32xf32>
    %454 = arith.subf %453, %445 : vector<2x32xf32>
    %455 = arith.mulf %454, %452 : vector<2x32xf32>
    %456 = arith.mulf %445, %413 : vector<2x32xf32>
    %457 = arith.addf %455, %456 : vector<2x32xf32>
    %c0_i32_70 = arith.constant 0 : i32
    %458 = vector.broadcast %c0_i32_70 : i32 to vector<1x8x1xi32>
    %459 = arith.cmpi eq, %426, %458 : vector<1x8x1xi32>
    %460 = vector.shape_cast %457 : vector<2x32xf32> to vector<2x1x32xf32>
    %cst_71 = arith.constant 0.000000e+00 : f32
    %461 = vector.shape_cast %459 : vector<1x8x1xi1> to vector<1x8x1xi1>
    %462 = vector.broadcast %461 : vector<1x8x1xi1> to vector<2x8x32xi1>
    %463 = vector.shape_cast %460 : vector<2x1x32xf32> to vector<2x1x32xf32>
    %464 = vector.broadcast %463 : vector<2x1x32xf32> to vector<2x8x32xf32>
    %465 = vector.broadcast %cst_71 : f32 to vector<2x8x32xf32>
    %466 = arith.select %462, %464, %465 : vector<2x8x32xi1>, vector<2x8x32xf32>
    %467 = arith.addf %427, %466 : vector<2x8x32xf32>
    %468 = vector.extract_strided_slice %22 {offsets = [2, 0], sizes = [2, 128], strides = [1, 1]} : vector<16x128xf32> to vector<2x128xf32>
    %cst_72 = arith.constant dense<0.000000e+00> : vector<2x128xf32>
    %469 = tpu.matmul %457, %3, %cst_72 {dimension_numbers = #tpu.dot_dimension_numbers<[1], [0], [0], [1], [0, 0, 1, 1], [], []>} : vector<2x32xf32>, vector<32x128xf32>, vector<2x128xf32> -> vector<2x128xf32>
    %470 = vector.extract_strided_slice %468 {offsets = [0, 0], sizes = [2, 32], strides = [1, 1]} : vector<2x128xf32> to vector<2x32xf32>
    %471 = vector.extract_strided_slice %469 {offsets = [0, 0], sizes = [2, 32], strides = [1, 1]} : vector<2x128xf32> to vector<2x32xf32>
    %472 = arith.addf %470, %471 : vector<2x32xf32>
    %473 = arith.negf %472 : vector<2x32xf32>
    %474 = math.exp %473 : vector<2x32xf32>
    %cst_73 = arith.constant 1.000000e+00 : f32
    %475 = vector.broadcast %cst_73 : f32 to vector<2x32xf32>
    %476 = arith.addf %475, %474 : vector<2x32xf32>
    %477 = arith.divf %475, %476 : vector<2x32xf32>
    %478 = vector.extract_strided_slice %468 {offsets = [0, 32], sizes = [2, 32], strides = [1, 1]} : vector<2x128xf32> to vector<2x32xf32>
    %479 = vector.extract_strided_slice %469 {offsets = [0, 32], sizes = [2, 32], strides = [1, 1]} : vector<2x128xf32> to vector<2x32xf32>
    %480 = arith.addf %478, %479 : vector<2x32xf32>
    %481 = arith.negf %480 : vector<2x32xf32>
    %482 = math.exp %481 : vector<2x32xf32>
    %cst_74 = arith.constant 1.000000e+00 : f32
    %483 = vector.broadcast %cst_74 : f32 to vector<2x32xf32>
    %484 = arith.addf %483, %482 : vector<2x32xf32>
    %485 = arith.divf %483, %484 : vector<2x32xf32>
    %486 = vector.extract_strided_slice %468 {offsets = [0, 64], sizes = [2, 32], strides = [1, 1]} : vector<2x128xf32> to vector<2x32xf32>
    %487 = vector.extract_strided_slice %469 {offsets = [0, 64], sizes = [2, 32], strides = [1, 1]} : vector<2x128xf32> to vector<2x32xf32>
    %488 = vector.broadcast %11 : vector<1x32xf32> to vector<2x32xf32>
    %489 = arith.addf %487, %488 : vector<2x32xf32>
    %490 = arith.mulf %477, %489 : vector<2x32xf32>
    %491 = arith.addf %486, %490 : vector<2x32xf32>
    %492 = math.tanh %491 : vector<2x32xf32>
    %cst_75 = arith.constant 1.000000e+00 : f32
    %493 = vector.broadcast %cst_75 : f32 to vector<2x32xf32>
    %494 = arith.subf %493, %485 : vector<2x32xf32>
    %495 = arith.mulf %494, %492 : vector<2x32xf32>
    %496 = arith.mulf %485, %457 : vector<2x32xf32>
    %497 = arith.addf %495, %496 : vector<2x32xf32>
    %c1_i32_76 = arith.constant 1 : i32
    %498 = vector.broadcast %c1_i32_76 : i32 to vector<1x8x1xi32>
    %499 = arith.cmpi eq, %426, %498 : vector<1x8x1xi32>
    %500 = vector.shape_cast %497 : vector<2x32xf32> to vector<2x1x32xf32>
    %cst_77 = arith.constant 0.000000e+00 : f32
    %501 = vector.shape_cast %499 : vector<1x8x1xi1> to vector<1x8x1xi1>
    %502 = vector.broadcast %501 : vector<1x8x1xi1> to vector<2x8x32xi1>
    %503 = vector.shape_cast %500 : vector<2x1x32xf32> to vector<2x1x32xf32>
    %504 = vector.broadcast %503 : vector<2x1x32xf32> to vector<2x8x32xf32>
    %505 = vector.broadcast %cst_77 : f32 to vector<2x8x32xf32>
    %506 = arith.select %502, %504, %505 : vector<2x8x32xi1>, vector<2x8x32xf32>
    %507 = arith.addf %467, %506 : vector<2x8x32xf32>
    %508 = vector.extract_strided_slice %22 {offsets = [4, 0], sizes = [2, 128], strides = [1, 1]} : vector<16x128xf32> to vector<2x128xf32>
    %cst_78 = arith.constant dense<0.000000e+00> : vector<2x128xf32>
    %509 = tpu.matmul %497, %3, %cst_78 {dimension_numbers = #tpu.dot_dimension_numbers<[1], [0], [0], [1], [0, 0, 1, 1], [], []>} : vector<2x32xf32>, vector<32x128xf32>, vector<2x128xf32> -> vector<2x128xf32>
    %510 = vector.extract_strided_slice %508 {offsets = [0, 0], sizes = [2, 32], strides = [1, 1]} : vector<2x128xf32> to vector<2x32xf32>
    %511 = vector.extract_strided_slice %509 {offsets = [0, 0], sizes = [2, 32], strides = [1, 1]} : vector<2x128xf32> to vector<2x32xf32>
    %512 = arith.addf %510, %511 : vector<2x32xf32>
    %513 = arith.negf %512 : vector<2x32xf32>
    %514 = math.exp %513 : vector<2x32xf32>
    %cst_79 = arith.constant 1.000000e+00 : f32
    %515 = vector.broadcast %cst_79 : f32 to vector<2x32xf32>
    %516 = arith.addf %515, %514 : vector<2x32xf32>
    %517 = arith.divf %515, %516 : vector<2x32xf32>
    %518 = vector.extract_strided_slice %508 {offsets = [0, 32], sizes = [2, 32], strides = [1, 1]} : vector<2x128xf32> to vector<2x32xf32>
    %519 = vector.extract_strided_slice %509 {offsets = [0, 32], sizes = [2, 32], strides = [1, 1]} : vector<2x128xf32> to vector<2x32xf32>
    %520 = arith.addf %518, %519 : vector<2x32xf32>
    %521 = arith.negf %520 : vector<2x32xf32>
    %522 = math.exp %521 : vector<2x32xf32>
    %cst_80 = arith.constant 1.000000e+00 : f32
    %523 = vector.broadcast %cst_80 : f32 to vector<2x32xf32>
    %524 = arith.addf %523, %522 : vector<2x32xf32>
    %525 = arith.divf %523, %524 : vector<2x32xf32>
    %526 = vector.extract_strided_slice %508 {offsets = [0, 64], sizes = [2, 32], strides = [1, 1]} : vector<2x128xf32> to vector<2x32xf32>
    %527 = vector.extract_strided_slice %509 {offsets = [0, 64], sizes = [2, 32], strides = [1, 1]} : vector<2x128xf32> to vector<2x32xf32>
    %528 = vector.broadcast %11 : vector<1x32xf32> to vector<2x32xf32>
    %529 = arith.addf %527, %528 : vector<2x32xf32>
    %530 = arith.mulf %517, %529 : vector<2x32xf32>
    %531 = arith.addf %526, %530 : vector<2x32xf32>
    %532 = math.tanh %531 : vector<2x32xf32>
    %cst_81 = arith.constant 1.000000e+00 : f32
    %533 = vector.broadcast %cst_81 : f32 to vector<2x32xf32>
    %534 = arith.subf %533, %525 : vector<2x32xf32>
    %535 = arith.mulf %534, %532 : vector<2x32xf32>
    %536 = arith.mulf %525, %497 : vector<2x32xf32>
    %537 = arith.addf %535, %536 : vector<2x32xf32>
    %c2_i32_82 = arith.constant 2 : i32
    %538 = vector.broadcast %c2_i32_82 : i32 to vector<1x8x1xi32>
    %539 = arith.cmpi eq, %426, %538 : vector<1x8x1xi32>
    %540 = vector.shape_cast %537 : vector<2x32xf32> to vector<2x1x32xf32>
    %cst_83 = arith.constant 0.000000e+00 : f32
    %541 = vector.shape_cast %539 : vector<1x8x1xi1> to vector<1x8x1xi1>
    %542 = vector.broadcast %541 : vector<1x8x1xi1> to vector<2x8x32xi1>
    %543 = vector.shape_cast %540 : vector<2x1x32xf32> to vector<2x1x32xf32>
    %544 = vector.broadcast %543 : vector<2x1x32xf32> to vector<2x8x32xf32>
    %545 = vector.broadcast %cst_83 : f32 to vector<2x8x32xf32>
    %546 = arith.select %542, %544, %545 : vector<2x8x32xi1>, vector<2x8x32xf32>
    %547 = arith.addf %507, %546 : vector<2x8x32xf32>
    %548 = vector.extract_strided_slice %22 {offsets = [6, 0], sizes = [2, 128], strides = [1, 1]} : vector<16x128xf32> to vector<2x128xf32>
    %cst_84 = arith.constant dense<0.000000e+00> : vector<2x128xf32>
    %549 = tpu.matmul %537, %3, %cst_84 {dimension_numbers = #tpu.dot_dimension_numbers<[1], [0], [0], [1], [0, 0, 1, 1], [], []>} : vector<2x32xf32>, vector<32x128xf32>, vector<2x128xf32> -> vector<2x128xf32>
    %550 = vector.extract_strided_slice %548 {offsets = [0, 0], sizes = [2, 32], strides = [1, 1]} : vector<2x128xf32> to vector<2x32xf32>
    %551 = vector.extract_strided_slice %549 {offsets = [0, 0], sizes = [2, 32], strides = [1, 1]} : vector<2x128xf32> to vector<2x32xf32>
    %552 = arith.addf %550, %551 : vector<2x32xf32>
    %553 = arith.negf %552 : vector<2x32xf32>
    %554 = math.exp %553 : vector<2x32xf32>
    %cst_85 = arith.constant 1.000000e+00 : f32
    %555 = vector.broadcast %cst_85 : f32 to vector<2x32xf32>
    %556 = arith.addf %555, %554 : vector<2x32xf32>
    %557 = arith.divf %555, %556 : vector<2x32xf32>
    %558 = vector.extract_strided_slice %548 {offsets = [0, 32], sizes = [2, 32], strides = [1, 1]} : vector<2x128xf32> to vector<2x32xf32>
    %559 = vector.extract_strided_slice %549 {offsets = [0, 32], sizes = [2, 32], strides = [1, 1]} : vector<2x128xf32> to vector<2x32xf32>
    %560 = arith.addf %558, %559 : vector<2x32xf32>
    %561 = arith.negf %560 : vector<2x32xf32>
    %562 = math.exp %561 : vector<2x32xf32>
    %cst_86 = arith.constant 1.000000e+00 : f32
    %563 = vector.broadcast %cst_86 : f32 to vector<2x32xf32>
    %564 = arith.addf %563, %562 : vector<2x32xf32>
    %565 = arith.divf %563, %564 : vector<2x32xf32>
    %566 = vector.extract_strided_slice %548 {offsets = [0, 64], sizes = [2, 32], strides = [1, 1]} : vector<2x128xf32> to vector<2x32xf32>
    %567 = vector.extract_strided_slice %549 {offsets = [0, 64], sizes = [2, 32], strides = [1, 1]} : vector<2x128xf32> to vector<2x32xf32>
    %568 = vector.broadcast %11 : vector<1x32xf32> to vector<2x32xf32>
    %569 = arith.addf %567, %568 : vector<2x32xf32>
    %570 = arith.mulf %557, %569 : vector<2x32xf32>
    %571 = arith.addf %566, %570 : vector<2x32xf32>
    %572 = math.tanh %571 : vector<2x32xf32>
    %cst_87 = arith.constant 1.000000e+00 : f32
    %573 = vector.broadcast %cst_87 : f32 to vector<2x32xf32>
    %574 = arith.subf %573, %565 : vector<2x32xf32>
    %575 = arith.mulf %574, %572 : vector<2x32xf32>
    %576 = arith.mulf %565, %537 : vector<2x32xf32>
    %577 = arith.addf %575, %576 : vector<2x32xf32>
    %c3_i32_88 = arith.constant 3 : i32
    %578 = vector.broadcast %c3_i32_88 : i32 to vector<1x8x1xi32>
    %579 = arith.cmpi eq, %426, %578 : vector<1x8x1xi32>
    %580 = vector.shape_cast %577 : vector<2x32xf32> to vector<2x1x32xf32>
    %cst_89 = arith.constant 0.000000e+00 : f32
    %581 = vector.shape_cast %579 : vector<1x8x1xi1> to vector<1x8x1xi1>
    %582 = vector.broadcast %581 : vector<1x8x1xi1> to vector<2x8x32xi1>
    %583 = vector.shape_cast %580 : vector<2x1x32xf32> to vector<2x1x32xf32>
    %584 = vector.broadcast %583 : vector<2x1x32xf32> to vector<2x8x32xf32>
    %585 = vector.broadcast %cst_89 : f32 to vector<2x8x32xf32>
    %586 = arith.select %582, %584, %585 : vector<2x8x32xi1>, vector<2x8x32xf32>
    %587 = arith.addf %547, %586 : vector<2x8x32xf32>
    %588 = vector.extract_strided_slice %22 {offsets = [8, 0], sizes = [2, 128], strides = [1, 1]} : vector<16x128xf32> to vector<2x128xf32>
    %cst_90 = arith.constant dense<0.000000e+00> : vector<2x128xf32>
    %589 = tpu.matmul %577, %3, %cst_90 {dimension_numbers = #tpu.dot_dimension_numbers<[1], [0], [0], [1], [0, 0, 1, 1], [], []>} : vector<2x32xf32>, vector<32x128xf32>, vector<2x128xf32> -> vector<2x128xf32>
    %590 = vector.extract_strided_slice %588 {offsets = [0, 0], sizes = [2, 32], strides = [1, 1]} : vector<2x128xf32> to vector<2x32xf32>
    %591 = vector.extract_strided_slice %589 {offsets = [0, 0], sizes = [2, 32], strides = [1, 1]} : vector<2x128xf32> to vector<2x32xf32>
    %592 = arith.addf %590, %591 : vector<2x32xf32>
    %593 = arith.negf %592 : vector<2x32xf32>
    %594 = math.exp %593 : vector<2x32xf32>
    %cst_91 = arith.constant 1.000000e+00 : f32
    %595 = vector.broadcast %cst_91 : f32 to vector<2x32xf32>
    %596 = arith.addf %595, %594 : vector<2x32xf32>
    %597 = arith.divf %595, %596 : vector<2x32xf32>
    %598 = vector.extract_strided_slice %588 {offsets = [0, 32], sizes = [2, 32], strides = [1, 1]} : vector<2x128xf32> to vector<2x32xf32>
    %599 = vector.extract_strided_slice %589 {offsets = [0, 32], sizes = [2, 32], strides = [1, 1]} : vector<2x128xf32> to vector<2x32xf32>
    %600 = arith.addf %598, %599 : vector<2x32xf32>
    %601 = arith.negf %600 : vector<2x32xf32>
    %602 = math.exp %601 : vector<2x32xf32>
    %cst_92 = arith.constant 1.000000e+00 : f32
    %603 = vector.broadcast %cst_92 : f32 to vector<2x32xf32>
    %604 = arith.addf %603, %602 : vector<2x32xf32>
    %605 = arith.divf %603, %604 : vector<2x32xf32>
    %606 = vector.extract_strided_slice %588 {offsets = [0, 64], sizes = [2, 32], strides = [1, 1]} : vector<2x128xf32> to vector<2x32xf32>
    %607 = vector.extract_strided_slice %589 {offsets = [0, 64], sizes = [2, 32], strides = [1, 1]} : vector<2x128xf32> to vector<2x32xf32>
    %608 = vector.broadcast %11 : vector<1x32xf32> to vector<2x32xf32>
    %609 = arith.addf %607, %608 : vector<2x32xf32>
    %610 = arith.mulf %597, %609 : vector<2x32xf32>
    %611 = arith.addf %606, %610 : vector<2x32xf32>
    %612 = math.tanh %611 : vector<2x32xf32>
    %cst_93 = arith.constant 1.000000e+00 : f32
    %613 = vector.broadcast %cst_93 : f32 to vector<2x32xf32>
    %614 = arith.subf %613, %605 : vector<2x32xf32>
    %615 = arith.mulf %614, %612 : vector<2x32xf32>
    %616 = arith.mulf %605, %577 : vector<2x32xf32>
    %617 = arith.addf %615, %616 : vector<2x32xf32>
    %c4_i32_94 = arith.constant 4 : i32
    %618 = vector.broadcast %c4_i32_94 : i32 to vector<1x8x1xi32>
    %619 = arith.cmpi eq, %426, %618 : vector<1x8x1xi32>
    %620 = vector.shape_cast %617 : vector<2x32xf32> to vector<2x1x32xf32>
    %cst_95 = arith.constant 0.000000e+00 : f32
    %621 = vector.shape_cast %619 : vector<1x8x1xi1> to vector<1x8x1xi1>
    %622 = vector.broadcast %621 : vector<1x8x1xi1> to vector<2x8x32xi1>
    %623 = vector.shape_cast %620 : vector<2x1x32xf32> to vector<2x1x32xf32>
    %624 = vector.broadcast %623 : vector<2x1x32xf32> to vector<2x8x32xf32>
    %625 = vector.broadcast %cst_95 : f32 to vector<2x8x32xf32>
    %626 = arith.select %622, %624, %625 : vector<2x8x32xi1>, vector<2x8x32xf32>
    %627 = arith.addf %587, %626 : vector<2x8x32xf32>
    %628 = vector.extract_strided_slice %22 {offsets = [10, 0], sizes = [2, 128], strides = [1, 1]} : vector<16x128xf32> to vector<2x128xf32>
    %cst_96 = arith.constant dense<0.000000e+00> : vector<2x128xf32>
    %629 = tpu.matmul %617, %3, %cst_96 {dimension_numbers = #tpu.dot_dimension_numbers<[1], [0], [0], [1], [0, 0, 1, 1], [], []>} : vector<2x32xf32>, vector<32x128xf32>, vector<2x128xf32> -> vector<2x128xf32>
    %630 = vector.extract_strided_slice %628 {offsets = [0, 0], sizes = [2, 32], strides = [1, 1]} : vector<2x128xf32> to vector<2x32xf32>
    %631 = vector.extract_strided_slice %629 {offsets = [0, 0], sizes = [2, 32], strides = [1, 1]} : vector<2x128xf32> to vector<2x32xf32>
    %632 = arith.addf %630, %631 : vector<2x32xf32>
    %633 = arith.negf %632 : vector<2x32xf32>
    %634 = math.exp %633 : vector<2x32xf32>
    %cst_97 = arith.constant 1.000000e+00 : f32
    %635 = vector.broadcast %cst_97 : f32 to vector<2x32xf32>
    %636 = arith.addf %635, %634 : vector<2x32xf32>
    %637 = arith.divf %635, %636 : vector<2x32xf32>
    %638 = vector.extract_strided_slice %628 {offsets = [0, 32], sizes = [2, 32], strides = [1, 1]} : vector<2x128xf32> to vector<2x32xf32>
    %639 = vector.extract_strided_slice %629 {offsets = [0, 32], sizes = [2, 32], strides = [1, 1]} : vector<2x128xf32> to vector<2x32xf32>
    %640 = arith.addf %638, %639 : vector<2x32xf32>
    %641 = arith.negf %640 : vector<2x32xf32>
    %642 = math.exp %641 : vector<2x32xf32>
    %cst_98 = arith.constant 1.000000e+00 : f32
    %643 = vector.broadcast %cst_98 : f32 to vector<2x32xf32>
    %644 = arith.addf %643, %642 : vector<2x32xf32>
    %645 = arith.divf %643, %644 : vector<2x32xf32>
    %646 = vector.extract_strided_slice %628 {offsets = [0, 64], sizes = [2, 32], strides = [1, 1]} : vector<2x128xf32> to vector<2x32xf32>
    %647 = vector.extract_strided_slice %629 {offsets = [0, 64], sizes = [2, 32], strides = [1, 1]} : vector<2x128xf32> to vector<2x32xf32>
    %648 = vector.broadcast %11 : vector<1x32xf32> to vector<2x32xf32>
    %649 = arith.addf %647, %648 : vector<2x32xf32>
    %650 = arith.mulf %637, %649 : vector<2x32xf32>
    %651 = arith.addf %646, %650 : vector<2x32xf32>
    %652 = math.tanh %651 : vector<2x32xf32>
    %cst_99 = arith.constant 1.000000e+00 : f32
    %653 = vector.broadcast %cst_99 : f32 to vector<2x32xf32>
    %654 = arith.subf %653, %645 : vector<2x32xf32>
    %655 = arith.mulf %654, %652 : vector<2x32xf32>
    %656 = arith.mulf %645, %617 : vector<2x32xf32>
    %657 = arith.addf %655, %656 : vector<2x32xf32>
    %c5_i32_100 = arith.constant 5 : i32
    %658 = vector.broadcast %c5_i32_100 : i32 to vector<1x8x1xi32>
    %659 = arith.cmpi eq, %426, %658 : vector<1x8x1xi32>
    %660 = vector.shape_cast %657 : vector<2x32xf32> to vector<2x1x32xf32>
    %cst_101 = arith.constant 0.000000e+00 : f32
    %661 = vector.shape_cast %659 : vector<1x8x1xi1> to vector<1x8x1xi1>
    %662 = vector.broadcast %661 : vector<1x8x1xi1> to vector<2x8x32xi1>
    %663 = vector.shape_cast %660 : vector<2x1x32xf32> to vector<2x1x32xf32>
    %664 = vector.broadcast %663 : vector<2x1x32xf32> to vector<2x8x32xf32>
    %665 = vector.broadcast %cst_101 : f32 to vector<2x8x32xf32>
    %666 = arith.select %662, %664, %665 : vector<2x8x32xi1>, vector<2x8x32xf32>
    %667 = arith.addf %627, %666 : vector<2x8x32xf32>
    %668 = vector.extract_strided_slice %22 {offsets = [12, 0], sizes = [2, 128], strides = [1, 1]} : vector<16x128xf32> to vector<2x128xf32>
    %cst_102 = arith.constant dense<0.000000e+00> : vector<2x128xf32>
    %669 = tpu.matmul %657, %3, %cst_102 {dimension_numbers = #tpu.dot_dimension_numbers<[1], [0], [0], [1], [0, 0, 1, 1], [], []>} : vector<2x32xf32>, vector<32x128xf32>, vector<2x128xf32> -> vector<2x128xf32>
    %670 = vector.extract_strided_slice %668 {offsets = [0, 0], sizes = [2, 32], strides = [1, 1]} : vector<2x128xf32> to vector<2x32xf32>
    %671 = vector.extract_strided_slice %669 {offsets = [0, 0], sizes = [2, 32], strides = [1, 1]} : vector<2x128xf32> to vector<2x32xf32>
    %672 = arith.addf %670, %671 : vector<2x32xf32>
    %673 = arith.negf %672 : vector<2x32xf32>
    %674 = math.exp %673 : vector<2x32xf32>
    %cst_103 = arith.constant 1.000000e+00 : f32
    %675 = vector.broadcast %cst_103 : f32 to vector<2x32xf32>
    %676 = arith.addf %675, %674 : vector<2x32xf32>
    %677 = arith.divf %675, %676 : vector<2x32xf32>
    %678 = vector.extract_strided_slice %668 {offsets = [0, 32], sizes = [2, 32], strides = [1, 1]} : vector<2x128xf32> to vector<2x32xf32>
    %679 = vector.extract_strided_slice %669 {offsets = [0, 32], sizes = [2, 32], strides = [1, 1]} : vector<2x128xf32> to vector<2x32xf32>
    %680 = arith.addf %678, %679 : vector<2x32xf32>
    %681 = arith.negf %680 : vector<2x32xf32>
    %682 = math.exp %681 : vector<2x32xf32>
    %cst_104 = arith.constant 1.000000e+00 : f32
    %683 = vector.broadcast %cst_104 : f32 to vector<2x32xf32>
    %684 = arith.addf %683, %682 : vector<2x32xf32>
    %685 = arith.divf %683, %684 : vector<2x32xf32>
    %686 = vector.extract_strided_slice %668 {offsets = [0, 64], sizes = [2, 32], strides = [1, 1]} : vector<2x128xf32> to vector<2x32xf32>
    %687 = vector.extract_strided_slice %669 {offsets = [0, 64], sizes = [2, 32], strides = [1, 1]} : vector<2x128xf32> to vector<2x32xf32>
    %688 = vector.broadcast %11 : vector<1x32xf32> to vector<2x32xf32>
    %689 = arith.addf %687, %688 : vector<2x32xf32>
    %690 = arith.mulf %677, %689 : vector<2x32xf32>
    %691 = arith.addf %686, %690 : vector<2x32xf32>
    %692 = math.tanh %691 : vector<2x32xf32>
    %cst_105 = arith.constant 1.000000e+00 : f32
    %693 = vector.broadcast %cst_105 : f32 to vector<2x32xf32>
    %694 = arith.subf %693, %685 : vector<2x32xf32>
    %695 = arith.mulf %694, %692 : vector<2x32xf32>
    %696 = arith.mulf %685, %657 : vector<2x32xf32>
    %697 = arith.addf %695, %696 : vector<2x32xf32>
    %c6_i32_106 = arith.constant 6 : i32
    %698 = vector.broadcast %c6_i32_106 : i32 to vector<1x8x1xi32>
    %699 = arith.cmpi eq, %426, %698 : vector<1x8x1xi32>
    %700 = vector.shape_cast %697 : vector<2x32xf32> to vector<2x1x32xf32>
    %cst_107 = arith.constant 0.000000e+00 : f32
    %701 = vector.shape_cast %699 : vector<1x8x1xi1> to vector<1x8x1xi1>
    %702 = vector.broadcast %701 : vector<1x8x1xi1> to vector<2x8x32xi1>
    %703 = vector.shape_cast %700 : vector<2x1x32xf32> to vector<2x1x32xf32>
    %704 = vector.broadcast %703 : vector<2x1x32xf32> to vector<2x8x32xf32>
    %705 = vector.broadcast %cst_107 : f32 to vector<2x8x32xf32>
    %706 = arith.select %702, %704, %705 : vector<2x8x32xi1>, vector<2x8x32xf32>
    %707 = arith.addf %667, %706 : vector<2x8x32xf32>
    %708 = vector.extract_strided_slice %22 {offsets = [14, 0], sizes = [2, 128], strides = [1, 1]} : vector<16x128xf32> to vector<2x128xf32>
    %cst_108 = arith.constant dense<0.000000e+00> : vector<2x128xf32>
    %709 = tpu.matmul %697, %3, %cst_108 {dimension_numbers = #tpu.dot_dimension_numbers<[1], [0], [0], [1], [0, 0, 1, 1], [], []>} : vector<2x32xf32>, vector<32x128xf32>, vector<2x128xf32> -> vector<2x128xf32>
    %710 = vector.extract_strided_slice %708 {offsets = [0, 0], sizes = [2, 32], strides = [1, 1]} : vector<2x128xf32> to vector<2x32xf32>
    %711 = vector.extract_strided_slice %709 {offsets = [0, 0], sizes = [2, 32], strides = [1, 1]} : vector<2x128xf32> to vector<2x32xf32>
    %712 = arith.addf %710, %711 : vector<2x32xf32>
    %713 = arith.negf %712 : vector<2x32xf32>
    %714 = math.exp %713 : vector<2x32xf32>
    %cst_109 = arith.constant 1.000000e+00 : f32
    %715 = vector.broadcast %cst_109 : f32 to vector<2x32xf32>
    %716 = arith.addf %715, %714 : vector<2x32xf32>
    %717 = arith.divf %715, %716 : vector<2x32xf32>
    %718 = vector.extract_strided_slice %708 {offsets = [0, 32], sizes = [2, 32], strides = [1, 1]} : vector<2x128xf32> to vector<2x32xf32>
    %719 = vector.extract_strided_slice %709 {offsets = [0, 32], sizes = [2, 32], strides = [1, 1]} : vector<2x128xf32> to vector<2x32xf32>
    %720 = arith.addf %718, %719 : vector<2x32xf32>
    %721 = arith.negf %720 : vector<2x32xf32>
    %722 = math.exp %721 : vector<2x32xf32>
    %cst_110 = arith.constant 1.000000e+00 : f32
    %723 = vector.broadcast %cst_110 : f32 to vector<2x32xf32>
    %724 = arith.addf %723, %722 : vector<2x32xf32>
    %725 = arith.divf %723, %724 : vector<2x32xf32>
    %726 = vector.extract_strided_slice %708 {offsets = [0, 64], sizes = [2, 32], strides = [1, 1]} : vector<2x128xf32> to vector<2x32xf32>
    %727 = vector.extract_strided_slice %709 {offsets = [0, 64], sizes = [2, 32], strides = [1, 1]} : vector<2x128xf32> to vector<2x32xf32>
    %728 = vector.broadcast %11 : vector<1x32xf32> to vector<2x32xf32>
    %729 = arith.addf %727, %728 : vector<2x32xf32>
    %730 = arith.mulf %717, %729 : vector<2x32xf32>
    %731 = arith.addf %726, %730 : vector<2x32xf32>
    %732 = math.tanh %731 : vector<2x32xf32>
    %cst_111 = arith.constant 1.000000e+00 : f32
    %733 = vector.broadcast %cst_111 : f32 to vector<2x32xf32>
    %734 = arith.subf %733, %725 : vector<2x32xf32>
    %735 = arith.mulf %734, %732 : vector<2x32xf32>
    %736 = arith.mulf %725, %697 : vector<2x32xf32>
    %737 = arith.addf %735, %736 : vector<2x32xf32>
    %c7_i32_112 = arith.constant 7 : i32
    %738 = vector.broadcast %c7_i32_112 : i32 to vector<1x8x1xi32>
    %739 = arith.cmpi eq, %426, %738 : vector<1x8x1xi32>
    %740 = vector.shape_cast %737 : vector<2x32xf32> to vector<2x1x32xf32>
    %cst_113 = arith.constant 0.000000e+00 : f32
    %741 = vector.shape_cast %739 : vector<1x8x1xi1> to vector<1x8x1xi1>
    %742 = vector.broadcast %741 : vector<1x8x1xi1> to vector<2x8x32xi1>
    %743 = vector.shape_cast %740 : vector<2x1x32xf32> to vector<2x1x32xf32>
    %744 = vector.broadcast %743 : vector<2x1x32xf32> to vector<2x8x32xf32>
    %745 = vector.broadcast %cst_113 : f32 to vector<2x8x32xf32>
    %746 = arith.select %742, %744, %745 : vector<2x8x32xi1>, vector<2x8x32xf32>
    %747 = arith.addf %707, %746 : vector<2x8x32xf32>
    %c0_114 = arith.constant 0 : index
    %c0_115 = arith.constant 0 : index
    %748 = vector.load %arg5[%c0_114, %c0_115] : memref<2x32xf32, #tpu.memory_space<vmem>>, vector<2x32xf32>
    tpu.vector_store %arg5[%c0_114, %c0_115], %737 {strides = array<i32>} : memref<2x32xf32, #tpu.memory_space<vmem>>, vector<2x32xf32>,
    %749 = vector.shape_cast %747 : vector<2x8x32xf32> to vector<2x8x1x32xf32>
    %750 = vector.shape_cast %425 : vector<2x8x32xf32> to vector<2x1x8x32xf32>
    %751 = vector.broadcast %749 : vector<2x8x1x32xf32> to vector<2x8x8x32xf32>
    %752 = vector.broadcast %750 : vector<2x1x8x32xf32> to vector<2x8x8x32xf32>
    %753 = arith.mulf %751, %752 : vector<2x8x8x32xf32>
    %cst_116 = arith.constant dense<0.000000e+00> : vector<2x8x8xf32>
    %754 = vector.multi_reduction <add>, %753, %cst_116 [3] : vector<2x8x8x32xf32> to vector<2x8x8xf32>
    %755 = vector.shape_cast %14 : vector<2x8xf32> to vector<2x1x8xf32>
    %cst_117 = arith.constant 5.000000e-01 : f32
    %756 = vector.broadcast %cst_117 : f32 to vector<2x1x8xf32>
    %757 = arith.cmpf ogt, %755, %756 : vector<2x1x8xf32>
    %cst_118 = arith.constant -1.000000e+30 : f32
    %758 = vector.shape_cast %757 : vector<2x1x8xi1> to vector<2x1x8xi1>
    %759 = vector.broadcast %758 : vector<2x1x8xi1> to vector<2x8x8xi1>
    %760 = vector.broadcast %cst_118 : f32 to vector<2x8x8xf32>
    %761 = arith.select %759, %754, %760 : vector<2x8x8xi1>, vector<2x8x8xf32>
    %cst_119 = arith.constant dense<0xFF800000> : vector<2x8xf32>
    %762 = vector.multi_reduction <maximumf>, %761, %cst_119 [2] : vector<2x8x8xf32> to vector<2x8xf32>
    %763 = vector.shape_cast %762 : vector<2x8xf32> to vector<2x8x1xf32>
    %764 = vector.broadcast %763 : vector<2x8x1xf32> to vector<2x8x8xf32>
    %765 = arith.subf %761, %764 : vector<2x8x8xf32>
    %766 = math.exp %765 : vector<2x8x8xf32>
    %cst_120 = arith.constant dense<0.000000e+00> : vector<2x8xf32>
    %767 = vector.multi_reduction <add>, %766, %cst_120 [2] : vector<2x8x8xf32> to vector<2x8xf32>
    %768 = vector.shape_cast %767 : vector<2x8xf32> to vector<2x8x1xf32>
    %769 = vector.broadcast %768 : vector<2x8x1xf32> to vector<2x8x8xf32>
    %770 = arith.divf %766, %769 : vector<2x8x8xf32>
    %771 = vector.shape_cast %770 : vector<2x8x8xf32> to vector<2x8x8x1xf32>
    %772 = vector.shape_cast %425 : vector<2x8x32xf32> to vector<2x1x8x32xf32>
    %773 = vector.broadcast %771 : vector<2x8x8x1xf32> to vector<2x8x8x32xf32>
    %774 = vector.broadcast %772 : vector<2x1x8x32xf32> to vector<2x8x8x32xf32>
    %775 = arith.mulf %773, %774 : vector<2x8x8x32xf32>
    %cst_121 = arith.constant dense<0.000000e+00> : vector<2x8x32xf32>
    %776 = vector.multi_reduction <add>, %775, %cst_121 [2] : vector<2x8x8x32xf32> to vector<2x8x32xf32>
    %777 = vector.shape_cast %747 : vector<2x8x32xf32> to vector<16x32xf32>
    %778 = vector.shape_cast %776 : vector<2x8x32xf32> to vector<16x32xf32>
    %cst_122 = arith.constant dense<0.000000e+00> : vector<16x32xf32>
    %779 = tpu.matmul %777, %4, %cst_122 {dimension_numbers = #tpu.dot_dimension_numbers<[1], [0], [0], [1], [0, 0, 1, 1], [], []>} : vector<16x32xf32>, vector<32x32xf32>, vector<16x32xf32> -> vector<16x32xf32>
    %cst_123 = arith.constant dense<0.000000e+00> : vector<16x32xf32>
    %780 = tpu.matmul %778, %5, %cst_123 {dimension_numbers = #tpu.dot_dimension_numbers<[1], [0], [0], [1], [0, 0, 1, 1], [], []>} : vector<16x32xf32>, vector<32x32xf32>, vector<16x32xf32> -> vector<16x32xf32>
    %781 = arith.addf %779, %780 : vector<16x32xf32>
    %782 = vector.broadcast %12 : vector<1x32xf32> to vector<16x32xf32>
    %783 = arith.addf %781, %782 : vector<16x32xf32>
    %784 = math.tanh %783 : vector<16x32xf32>
    %cst_124 = arith.constant dense<0.000000e+00> : vector<16x128xf32>
    %785 = tpu.matmul %784, %6, %cst_124 {dimension_numbers = #tpu.dot_dimension_numbers<[1], [0], [0], [1], [0, 0, 1, 1], [], []>} : vector<16x32xf32>, vector<32x128xf32>, vector<16x128xf32> -> vector<16x128xf32>
    %786 = vector.broadcast %13 : vector<1x128xf32> to vector<16x128xf32>
    %787 = arith.addf %785, %786 : vector<16x128xf32>
    %788 = tpu.iota {dimensions = array<i32: 1>} : vector<16x128xi32>
    %c64_i32 = arith.constant 64 : i32
    %789 = vector.broadcast %c64_i32 : i32 to vector<16x128xi32>
    %790 = arith.cmpi slt, %788, %789 : vector<16x128xi32>
    %cst_125 = arith.constant -1.000000e+30 : f32
    %791 = vector.broadcast %cst_125 : f32 to vector<16x128xf32>
    %792 = arith.select %790, %787, %791 : vector<16x128xi1>, vector<16x128xf32>
    %cst_126 = arith.constant dense<0xFF800000> : vector<16xf32>
    %793 = vector.multi_reduction <maximumf>, %792, %cst_126 [1] : vector<16x128xf32> to vector<16xf32>
    %794 = vector.shape_cast %793 : vector<16xf32> to vector<16x1xf32>
    %795 = vector.broadcast %794 : vector<16x1xf32> to vector<16x128xf32>
    %796 = arith.subf %792, %795 : vector<16x128xf32>
    %797 = math.exp %796 : vector<16x128xf32>
    %cst_127 = arith.constant dense<0.000000e+00> : vector<16xf32>
    %798 = vector.multi_reduction <add>, %797, %cst_127 [1] : vector<16x128xf32> to vector<16xf32>
    %799 = vector.shape_cast %798 : vector<16xf32> to vector<16x1xf32>
    %800 = math.log %799 : vector<16x1xf32>
    %801 = arith.addf %794, %800 : vector<16x1xf32>
    %802 = vector.broadcast %801 : vector<16x1xf32> to vector<16x128xf32>
    %803 = arith.subf %792, %802 : vector<16x128xf32>
    %804 = vector.shape_cast %803 : vector<16x128xf32> to vector<2x8x128xf32>
    %c0_128 = arith.constant 0 : index
    %c0_129 = arith.constant 0 : index
    %c0_130 = arith.constant 0 : index
    %805 = vector.load %arg4[%c0_128, %c0_129, %c0_130] : memref<2x8x128xf32, #tpu.memory_space<vmem>>, vector<2x8x128xf32>
    tpu.vector_store %arg4[%c0_128, %c0_129, %c0_130], %804 {strides = array<i32>} : memref<2x8x128xf32, #tpu.memory_space<vmem>>, vector<2x8x128xf32>,
    return
  }
}

</mosaic_0001>

<bundles_post_ra>
// kernel: seq2seq_forward.1
= control target key start
LH: loop header
LB: loop body
LE: loop exit
PB: predicated region body
PF: predicated region fallthrough
CT: control target
= control target key end

     0   :  { %11 = vsyncpa [#allocation3], 0  ;;  %vm57_vm0 = vcmask 261120   ;;  %v53_v3 = vlaneseq  ;;  %s5464_s0 = inlined_call_operand.vmem [shape: f32[32,32], index: 0, kind: input, shape index: {}]   ;;  %s5465_s1 = inlined_call_operand.vmem [shape: f32[224,128], index: 1, kind: input, shape index: {}]   ;;  %s5466_s2 = inlined_call_operand.vmem [shape: f32[8,128], index: 2, kind: input, shape index: {}]   ;;  %s5467_s3 = inlined_call_operand.vmem [shape: f32[2,8], index: 3, kind: input, shape index: {}]   ;;  %s5468_s4 = inlined_call_operand.hbm [shape: f32[2,8,128], index: 4, kind: output, shape index: {0}]   ;;  %s5469_s5 = inlined_call_operand.hbm [shape: f32[2,32], index: 5, kind: output, shape index: {1}]  }
   0x1   :  { %v21_v0 = vld [vmem:[%s5465_s1] sm:$0xff]  ;;  %v22_v1 = vld [vmem:[%s5465_s1 + $0x8] sm:$0xff]  ;;  %v23_v2 = vld [vmem:[%s5465_s1 + $0x10] sm:$0xff] }
   0x2   :  { %v4206_v4 = vpack.c.bf16 %v22_v1, %v21_v0  ;;  %v24_v5 = vld [vmem:[%s5465_s1 + $0x18] sm:$0xff]  ;;  %v51_v6 = vld [vmem:[%s5464_s0] sm:$0xff]  ;;  %v4611_v8 = vshrl.u32 %v53_v3, 7 }
   0x3   :  { %v4210_v7 = vpack.c.bf16 %v24_v5, %v23_v2  ;;  %3983 = vmatprep.mubr.msk.f32.mxu0 %vm57_vm0, %v51_v6  ;;  %v4616_v9 = vld [vmem:[%s5466_s2] sm:$0xff] }
   0x4   :  { %4207 = vmatprep.subr.bf16.mxu0 %v4206_v4 }
   0x5   :  { %12 = vsyncpa [#allocation5], 0  ;;  %4209 = vmatpush3.bf16.msra.mxu0 %v4206_v4  ;;  %v4619_v10 = vsub.s32 1, %v4611_v8  ;;  %v25_v11 = vld [vmem:[%s5465_s1 + $0x20] sm:$0xff]  ;;  %v26_v12 = vld [vmem:[%s5465_s1 + $0x28] sm:$0xff]  ;;  %s4545_s11 = smov 64  }
   0x6   :  { %4211 = vmatprep.subr.bf16.mxu0 %v4210_v7  ;;  %v52_v14 = vld [vmem:[%s5464_s0 + $0x8] sm:$0xff]  ;;  %v4632_v15 = vpack.c.bf16 %v26_v12, %v25_v11  ;;  %v4546_v16 = vmov 0.0|0.0   ;;  %v27_v17 = vld [vmem:[%s5465_s1 + $0x30] sm:$0xff]  ;;  %v28_v18 = vld [vmem:[%s5465_s1 + $0x38] sm:$0xff]  ;;  %vm4547_vm1 = vmmov 0   ;;  %v4548_v20 = vmov 0.0  }
   0x7   :  { %v311_v13 = vrot.slane %v4616_v9, %v4619_v10  ;;  %v4644_v19 = vpack.c.bf16 %v28_v18, %v27_v17  ;;  %v4659_v21 = vsub.s32 0, %v4611_v8  ;;  %v4549_v26 = vmov 0   ;;  %v4677_v36 = vld [vmem:[%s5467_s3] sm:$0x3]  ;;  %v30_v44 = vld [vmem:[%s5465_s1 + $0x48] sm:$0xff]  ;;  %v31_v45 = vld [vmem:[%s5465_s1 + $0x50] sm:$0xff] }
   0x8   :  { %4363 = vset.pattern.permute.xlu1 %v4549_v26  ;;  %4364 = vset.pattern.permute.xlu0 %v4549_v26  ;;  %v4680_v37 = vsub.f32 1.0, %v4677_v36  ;;  %v29_v43 = vld [vmem:[%s5465_s1 + $0x40] sm:$0xff]  ;;  %v32_v47 = vld [vmem:[%s5465_s1 + $0x58] sm:$0xff]  ;;  %v139_v48 = vld [vmem:[%s5464_s0 + $0x10] sm:$0xff]  ;;  %s4550_s28 = smov 96   ;;  %v4719_v62 = vsub.s32 2, %v4611_v8 }
   0x9   :  { %4213 = vmatpush3.bf16.msra.mxu0 %v4210_v7  ;;  %313 = vrot.lane.b32.xlu0 %v311_v13, %s4545_s11  ;;  %v56_v22 = vrot.slane %v4616_v9, %v4659_v21  ;;  %v4214_v46 = vpack.c.bf16 %v30_v44, %v29_v43  ;;  %v4218_v49 = vpack.c.bf16 %v32_v47, %v31_v45  ;;  %v140_v51 = vld [vmem:[%s5464_s0 + $0x18] sm:$0xff]  ;;  %v4551_v5 = vmov 1   ;;  %s4553_s0 = smov 32  }
   0xa   :  { %4222 = vmatprep.subr.bf16.mxu0 %v4546_v16  ;;  %3994 = vmatprep.mubr.msk.f32.mxu1 %vm57_vm0, %v139_v48  ;;  %v4723_v63 = vrot.slane %v4616_v9, %v4719_v62  ;;  %vm518_vm2 = vcmp.eq.s32.totalorder %v4611_v8, 1  ;;  %vm350_vm3 = vcmp.eq.s32.totalorder %v4611_v8, 0  ;;  %vm690_vm4 = vcmp.eq.s32.totalorder %v4611_v8, 2 }
   0xb   :  { %4215 = vmatprep.subr.bf16.mxu1 %v4214_v46  ;;  %vm862_vm5 = vcmp.eq.s32.totalorder %v4611_v8, 3  ;;  %vm1028_vm6 = vcmp.eq.s32.totalorder %v4611_v8, 4  ;;  %vm1196_vm7 = vcmp.eq.s32.totalorder %v4611_v8, 5  ;;  %vm1368_vm8 = vcmp.eq.s32.totalorder %v4611_v8, 6 }
   0xc   :  { %3984 = vmatmul.mubr.msk.f32.vlgmr.msra.gmra.mrb[0].mxu0 %vm57_vm0, %v52_v14  ;;  %4217 = vmatpush3.bf16.msra.mxu1 %v4214_v46  ;;  %vm1540_vm9 = vcmp.eq.s32.totalorder %v4611_v8, 7  ;;  %vm3189_vm11 = vcmask 1041409   ;;  %vm3191_vm12 = vcmask 1042434   ;;  %vm3193_vm13 = vcmask 1043459  }
   0xd   :  { %4224 = vmatpush3.bf16.msra.mxu0 %v4632_v15  ;;  %4005 = vmatprep.mubr.msk.f32.mxu0 %vm4547_vm1, %v4548_v20  ;;  %vm3195_vm14 = vcmask 1044484   ;;  %vm3197_vm15 = vcmask 1045509  }
   0xe   :  { %4225 = vmatprep.subr.bf16.mxu0 %v4546_v16  ;;  %4219 = vmatprep.subr.bf16.mxu1 %v4218_v49 }
  0x10   :  { %4221 = vmatpush3.bf16.msra.mxu1 %v4218_v49  ;;  %v4552_v49 = vmov 2  }
  0x11   :  { %4227 = vmatpush3.bf16.msra.mxu0 %v4644_v19  ;;  %4228 = vmatprep.subr.bf16.mxu1 %v4546_v16 }
  0x12   :  { %4234 = vmatprep.subr.bf16.mxu0 %v4546_v16 }
  0x13   :  { %3995 = vmatmul.mubr.msk.f32.vlgmr.msra.gmra.mrb[0].mxu1 %vm57_vm0, %v140_v51 }
  0x14   :  { %4006 = vmatmul.mubr.f32.vlgmr.msra.gmra.mrb[2].mxu0 %v4548_v20  ;;  %4230 = vmatpush3.bf16.msra.mxu1 %v4632_v15 }
  0x15   :  { %4236 = vmatpush3.bf16.msra.mxu0 %v4632_v15  ;;  %4027 = vmatprep.mubr.msk.f32.mxu0 %vm4547_vm1, %v4548_v20 }
  0x16   :  { %4237 = vmatprep.subr.bf16.mxu0 %v4546_v16  ;;  %4016 = vmatprep.mubr.msk.f32.mxu1 %vm4547_vm1, %v4548_v20 }
  0x17   :  { %4231 = vmatprep.subr.bf16.mxu1 %v4546_v16 }
  0x18   :  { %4233 = vmatpush3.bf16.msra.mxu1 %v4644_v19 }
  0x19   :  { %4239 = vmatpush3.bf16.msra.mxu0 %v4644_v19  ;;  %4240 = vmatprep.subr.bf16.mxu1 %v4546_v16 }
  0x1a   :  { %4246 = vmatprep.subr.bf16.mxu0 %v4546_v16 }
  0x7b   :  { %v4667_v27 = vpop.permute.xlu0 %313 }
  0xdf   :  { %v3985_v23 = vpop.f32.mrb[0].mxu0 }
  0xe0   :  { %v4663_v24 = vadd.f32 %v3985_v23, %v56_v22  ;;  %v130_v25 = vpop.f32.mrb[1].mxu0 }
  0xe1   :  { %v4671_v31 = vadd.f32 %v130_v25, %v56_v22 }
  0xe6   :  { %v3996_v0 = vpop.f32.mrb[0].mxu1 }
  0xe7   :  { %v297_v28 = vpop.f32.mrb[2].mxu0  ;;  %v4726_v1 = vadd.f32 %v3996_v0, %v4723_v63  ;;  %v4728_v2 = vpop.f32.mrb[1].mxu1 }
  0xe8   :  { %v316_v29 = vadd.f32 %v4667_v27, %v297_v28  ;;  %v4007_v30 = vpop.f32.mrb[3].mxu0  ;;  %v301_v32 = vadd.f32 %v297_v28, %v4671_v31 }
  0xea   :  { %318 = vrot.lane.b32.xlu0 %v316_v29, %s4545_s11  ;;  %v3828_v33 = vmul.f32 -1.442695, %v301_v32 }
  0xec   :  { %4378 = vpow2.f32 %v3828_v33 }
  0xee   :  { %345 = vperm.xlu0 %4364, %v4680_v37  }
  0xf2   :  { %4365 = vset.pattern.permute.xlu0 %v4551_v5 }
  0xf6   :  { %v4379_v34 = vpop.eup %4378 }
  0xf7   :  { %v305_v35 = vadd.f32 1.0, %v4379_v34 }
  0xf9   :  { %4380 = vrcp.f32 %v305_v35 }
 0x103   :  { %v4381_v38 = vpop.eup %4380 }
 0x104   :  { %v328_v53 = vsub.f32 1.0, %v4381_v38  ;;  %v334_v56 = vmul.f32 0.0, %v4381_v38 }
 0x15c   :  { %v319_v39 = vpop.permute.xlu0 %318 }
 0x15d   :  { %v321_v40 = vmul.f32 %v4381_v38, %v319_v39 }
 0x15f   :  { %323 = vrot.lane.b32.xlu1 %v321_v40, %s4545_s11 }
 0x163   :  { %338 = vperm.xlu1 %4363, %v4677_v36  }
 0x167   :  { %4366 = vset.pattern.permute.xlu1 %v4551_v5 }
 0x16d   :  { %v346_v55 = vpop.permute.xlu0 %345 }
 0x16e   :  { %v348_v59 = vmul.f32 0.0, %v346_v55 }
 0x1d1   :  { %v324_v41 = vpop.permute.xlu1 %323 }
 0x1d2   :  { %v326_v42 = vadd.f32 %v324_v41, %v4671_v31 }
 0x1d4   :  { %4382 = vtanh.f32 %v326_v42 }
 0x1de   :  { %v4383_v50 = vpop.eup %4382 }
 0x1df   :  { %330 = vrot.lane.b32.xlu1 %v4383_v50, %s4550_s28 }
 0x1e2   :  { %v339_v52 = vpop.permute.xlu1 %338 }
 0x251   :  { %v331_v54 = vpop.permute.xlu1 %330 }
 0x252   :  { %v333_v57 = vmul.f32 %v331_v54, %v328_v53 }
 0x254   :  { %v335_v58 = vadd.f32 %v334_v56, %v333_v57 }
 0x256   :  { %v4714_v60 = vmul.f32 %v339_v52, %v335_v58 }
 0x258   :  { %v349_v61 = vadd.f32 %v348_v59, %v4714_v60 }
 0x25a   :  { %391 = vrot.lane.b32.xlu1 %v349_v61, %s4550_s28  ;;  %v494_v38 = vrot.slane %v349_v61, 6 }
 0x2cc   :  { %v392_v4 = vpop.permute.xlu1 %391 }
 0x2cd   :  { %4017 = vmatmul.mubr.msk.f32.vlgmr.msra.gmra.mrb[2].mxu1 %vm57_vm0, %v392_v4 }
 0x2ce   :  { %4242 = vmatpush3.bf16.msra.mxu1 %v4632_v15  ;;  %4038 = vmatprep.mubr.msk.f32.mxu1 %vm4547_vm1, %v4548_v20 }
 0x2cf   :  { %4243 = vmatprep.subr.bf16.mxu1 %v4546_v16 }
 0x2d2   :  { %4245 = vmatpush3.bf16.msra.mxu1 %v4644_v19 }
 0x2d3   :  { %4252 = vmatprep.subr.bf16.mxu1 %v4546_v16 }
 0x3a0   :  { %v461_v6 = vpop.f32.mrb[2].mxu1 }
 0x3a1   :  { %v475_v7 = vadd.f32 %v461_v6, %v4667_v27  ;;  %v4018_v11 = vpop.f32.mrb[3].mxu1  ;;  %v466_v13 = vrot.slane %v461_v6, 6 }
 0x3a3   :  { %v477_v12 = vrot.slane %v475_v7, 6  ;;  %v468_v14 = vadd.f32 %v466_v13, %v4671_v31 }
 0x3a5   :  { %478 = vrot.lane.b32.xlu0 %v477_v12, %s4545_s11  ;;  %v3830_v17 = vmul.f32 -1.442695, %v468_v14 }
 0x3a7   :  { %4384 = vpow2.f32 %v3830_v17 }
 0x3a9   :  { %509 = vperm.xlu0 %4365, %v4680_v37  }
 0x3ad   :  { %4367 = vset.pattern.permute.xlu0 %v4552_v49 }
 0x3b1   :  { %v4385_v18 = vpop.eup %4384 }
 0x3b2   :  { %v472_v22 = vadd.f32 1.0, %v4385_v18 }
 0x3b4   :  { %4386 = vrcp.f32 %v472_v22 }
 0x3be   :  { %v4387_v23 = vpop.eup %4386 }
 0x3bf   :  { %v488_v35 = vsub.f32 1.0, %v4387_v23  ;;  %v496_v41 = vmul.f32 %v4387_v23, %v494_v38 }
 0x417   :  { %v479_v25 = vpop.permute.xlu0 %478 }
 0x418   :  { %v481_v28 = vmul.f32 %v4387_v23, %v479_v25 }
 0x41a   :  { %483 = vrot.lane.b32.xlu1 %v481_v28, %s4545_s11 }
 0x428   :  { %v510_v33 = vpop.permute.xlu0 %509 }
 0x429   :  { %v512_v34 = vmul.f32 %v510_v33, %v349_v61  ;;  %v4554_v33 = vmov 3  }
 0x48c   :  { %v484_v29 = vpop.permute.xlu1 %483 }
 0x48d   :  { %v486_v30 = vadd.f32 %v484_v29, %v4671_v31 }
 0x48f   :  { %4388 = vtanh.f32 %v486_v30 }
 0x499   :  { %v4389_v32 = vpop.eup %4388 }
 0x49a   :  { %490 = vrot.lane.b32.xlu1 %v4389_v32, %s4550_s28 }
 0x49e   :  { %499 = vperm.xlu1 %4366, %v4677_v36  }
 0x4a2   :  { %514 = vrot.lane.b32.xlu1 %v512_v34, %s4550_s28 }
 0x4a3   :  { %4368 = vset.pattern.permute.xlu1 %v4552_v49 }
 0x50c   :  { %v491_v39 = vpop.permute.xlu1 %490 }
 0x50d   :  { %v493_v40 = vmul.f32 %v491_v39, %v488_v35 }
 0x50f   :  { %v497_v42 = vadd.f32 %v496_v41, %v493_v40 }
 0x511   :  { %v503_v43 = vrot.slane %v497_v42, 2 }
 0x513   :  { %504 = vrot.lane.b32.xlu0 %v503_v43, %s4550_s28 }
 0x51d   :  { %v500_v44 = vpop.permute.xlu1 %499 }
 0x521   :  { %v515_v47 = vpop.permute.xlu1 %514 }
 0x585   :  { %v505_v45 = vpop.permute.xlu0 %504 }
 0x586   :  { %v4747_v46 = vmul.f32 %v505_v45, %v500_v44 }
 0x588   :  { %v517_v48 = vadd.f32 %v515_v47, %v4747_v46 }
 0x58a   :  { %4028 = vmatmul.mubr.msk.f32.vlgmr.msra.gmra.mrb[4].mxu0 %vm57_vm0, %v517_v48  ;;  %v668_v4 = vrot.slane %v517_v48, 4 }
 0x58b   :  { %4248 = vmatpush3.bf16.msra.mxu0 %v4632_v15  ;;  %4049 = vmatprep.mubr.msk.f32.mxu0 %vm4547_vm1, %v4548_v20 }
 0x58c   :  { %4249 = vmatprep.subr.bf16.mxu0 %v4546_v16 }
 0x58f   :  { %4251 = vmatpush3.bf16.msra.mxu0 %v4644_v19 }
 0x590   :  { %4258 = vmatprep.subr.bf16.mxu0 %v4546_v16 }
 0x65d   :  { %v635_v50 = vpop.f32.mrb[4].mxu0 }
 0x65e   :  { %v649_v51 = vadd.f32 %v635_v50, %v4667_v27  ;;  %v4029_v52 = vpop.f32.mrb[5].mxu0  ;;  %v640_v54 = vrot.slane %v635_v50, 4 }
 0x660   :  { %v651_v53 = vrot.slane %v649_v51, 4  ;;  %v642_v55 = vadd.f32 %v640_v54, %v4671_v31 }
 0x662   :  { %652 = vrot.lane.b32.xlu0 %v651_v53, %s4545_s11  ;;  %v3832_v56 = vmul.f32 -1.442695, %v642_v55 }
 0x664   :  { %4390 = vpow2.f32 %v3832_v56 }
 0x66e   :  { %v4391_v57 = vpop.eup %4390 }
 0x66f   :  { %v646_v58 = vadd.f32 1.0, %v4391_v57 }
 0x671   :  { %4392 = vrcp.f32 %v646_v58 }
 0x67b   :  { %v4393_v59 = vpop.eup %4392 }
 0x67c   :  { %v662_v12 = vsub.f32 1.0, %v4393_v59 }
 0x6d4   :  { %v653_v61 = vpop.permute.xlu0 %652 }
 0x6d5   :  { %v655_v0 = vmul.f32 %v4393_v59, %v653_v61 }
 0x6d7   :  { %657 = vrot.lane.b32.xlu1 %v655_v0, %s4545_s11 }
 0x6db   :  { %669 = vrot.lane.b32.xlu1 %v668_v4, %s4553_s0 }
 0x6df   :  { %685 = vperm.xlu1 %4368, %v4680_v37  }
 0x6e3   :  { %4370 = vset.pattern.permute.xlu1 %v4554_v33 }
 0x749   :  { %v658_v5 = vpop.permute.xlu1 %657 }
 0x74a   :  { %v660_v6 = vadd.f32 %v658_v5, %v4671_v31 }
 0x74c   :  { %4394 = vtanh.f32 %v660_v6 }
 0x74d   :  { %v670_v11 = vpop.permute.xlu1 %669 }
 0x74e   :  { %v672_v14 = vmul.f32 %v4393_v59, %v670_v11 }
 0x756   :  { %v4395_v7 = vpop.eup %4394 }
 0x757   :  { %664 = vrot.lane.b32.xlu0 %v4395_v7, %s4550_s28  ;;  %v4555_v7 = vmov 4  }
 0x75b   :  { %675 = vperm.xlu0 %4367, %v4677_v36  }
 0x75e   :  { %v686_v23 = vpop.permute.xlu1 %685 }
 0x75f   :  { %v688_v29 = vmul.f32 %v686_v23, %v517_v48  ;;  %4369 = vset.pattern.permute.xlu0 %v4554_v33 }
 0x7c9   :  { %v665_v13 = vpop.permute.xlu0 %664 }
 0x7ca   :  { %v667_v17 = vmul.f32 %v665_v13, %v662_v12 }
 0x7cc   :  { %v673_v18 = vadd.f32 %v672_v14, %v667_v17 }
 0x7ce   :  { %v679_v22 = vrot.slane %v673_v18, 4 }
 0x7d0   :  { %680 = vrot.lane.b32.xlu1 %v679_v22, %s4550_s28 }
 0x7da   :  { %v676_v25 = vpop.permute.xlu0 %675 }
 0x842   :  { %v681_v28 = vpop.permute.xlu1 %680 }
 0x843   :  { %v4767_v30 = vmul.f32 %v681_v28, %v676_v25 }
 0x845   :  { %v689_v32 = vadd.f32 %v688_v29, %v4767_v30 }
 0x847   :  { %4039 = vmatmul.mubr.msk.f32.vlgmr.msra.gmra.mrb[4].mxu1 %vm57_vm0, %v689_v32  ;;  %v840_v49 = vrot.slane %v689_v32, 2 }
 0x848   :  { %4254 = vmatpush3.bf16.msra.mxu1 %v4632_v15  ;;  %4060 = vmatprep.mubr.msk.f32.mxu1 %vm4547_vm1, %v4548_v20 }
 0x849   :  { %4255 = vmatprep.subr.bf16.mxu1 %v4546_v16 }
 0x84c   :  { %4257 = vmatpush3.bf16.msra.mxu1 %v4644_v19 }
 0x84d   :  { %4264 = vmatprep.subr.bf16.mxu1 %v4546_v16 }
 0x91a   :  { %v807_v34 = vpop.f32.mrb[4].mxu1 }
 0x91b   :  { %v821_v35 = vadd.f32 %v807_v34, %v4667_v27  ;;  %v4040_v38 = vpop.f32.mrb[5].mxu1  ;;  %v812_v40 = vrot.slane %v807_v34, 2 }
 0x91d   :  { %v823_v39 = vrot.slane %v821_v35, 2  ;;  %v814_v41 = vadd.f32 %v812_v40, %v4671_v31 }
 0x91f   :  { %824 = vrot.lane.b32.xlu0 %v823_v39, %s4545_s11  ;;  %v3834_v42 = vmul.f32 -1.442695, %v814_v41 }
 0x921   :  { %4396 = vpow2.f32 %v3834_v42 }
 0x92b   :  { %v4397_v43 = vpop.eup %4396 }
 0x92c   :  { %v818_v44 = vadd.f32 1.0, %v4397_v43 }
 0x92e   :  { %4398 = vrcp.f32 %v818_v44 }
 0x938   :  { %v4399_v45 = vpop.eup %4398 }
 0x939   :  { %v834_v54 = vsub.f32 1.0, %v4399_v45 }
 0x991   :  { %v825_v47 = vpop.permute.xlu0 %824 }
 0x992   :  { %v827_v48 = vmul.f32 %v4399_v45, %v825_v47 }
 0x994   :  { %829 = vrot.lane.b32.xlu1 %v827_v48, %s4545_s11 }
 0x998   :  { %841 = vrot.lane.b32.xlu1 %v840_v49, %s4553_s0 }
 0x99c   :  { %857 = vperm.xlu1 %4370, %v4680_v37  }
 0x9a0   :  { %4372 = vset.pattern.permute.xlu1 %v4555_v7 }
 0xa06   :  { %v830_v50 = vpop.permute.xlu1 %829 }
 0xa07   :  { %v832_v51 = vadd.f32 %v830_v50, %v4671_v31  ;;  %v4556_v50 = vmov 5  }
 0xa09   :  { %4400 = vtanh.f32 %v832_v51 }
 0xa0a   :  { %v842_v53 = vpop.permute.xlu1 %841 }
 0xa0b   :  { %v844_v56 = vmul.f32 %v4399_v45, %v842_v53 }
 0xa13   :  { %v4401_v52 = vpop.eup %4400 }
 0xa14   :  { %836 = vrot.lane.b32.xlu0 %v4401_v52, %s4550_s28 }
 0xa18   :  { %847 = vperm.xlu0 %4369, %v4677_v36  }
 0xa1b   :  { %v858_v61 = vpop.permute.xlu1 %857 }
 0xa1c   :  { %v860_v5 = vmul.f32 %v858_v61, %v689_v32  ;;  %4371 = vset.pattern.permute.xlu0 %v4555_v7 }
 0xa86   :  { %v837_v55 = vpop.permute.xlu0 %836 }
 0xa87   :  { %v839_v57 = vmul.f32 %v837_v55, %v834_v54 }
 0xa89   :  { %v845_v58 = vadd.f32 %v844_v56, %v839_v57 }
 0xa8b   :  { %v851_v59 = vrot.slane %v845_v58, 6 }
 0xa8d   :  { %852 = vrot.lane.b32.xlu1 %v851_v59, %s4550_s28 }
 0xa97   :  { %v848_v0 = vpop.permute.xlu0 %847 }
 0xaff   :  { %v853_v4 = vpop.permute.xlu1 %852 }
 0xb00   :  { %v4787_v31 = vmul.f32 %v853_v4, %v848_v0 }
 0xb02   :  { %v861_v6 = vadd.f32 %v860_v5, %v4787_v31 }
 0xb04   :  { %4050 = vmatmul.mubr.msk.f32.vlgmr.msra.gmra.mrb[6].mxu0 %vm57_vm0, %v861_v6 }
 0xb05   :  { %4260 = vmatpush3.bf16.msra.mxu0 %v4632_v15  ;;  %4071 = vmatprep.mubr.msk.f32.mxu0 %vm4547_vm1, %v4548_v20 }
 0xb06   :  { %4261 = vmatprep.subr.bf16.mxu0 %v4546_v16 }
 0xb09   :  { %4263 = vmatpush3.bf16.msra.mxu0 %v4644_v19 }
 0xb0a   :  { %4270 = vmatprep.subr.bf16.mxu0 %v4546_v16 }
 0xbd7   :  { %v979_v11 = vpop.f32.mrb[6].mxu0 }
 0xbd8   :  { %v990_v12 = vadd.f32 %v979_v11, %v4667_v27  ;;  %v4051_v13 = vpop.f32.mrb[7].mxu0  ;;  %v983_v14 = vadd.f32 %v979_v11, %v4663_v24 }
 0xbda   :  { %992 = vrot.lane.b32.xlu0 %v990_v12, %s4545_s11  ;;  %v3836_v17 = vmul.f32 -1.442695, %v983_v14 }
 0xbdc   :  { %4402 = vpow2.f32 %v3836_v17 }
 0xbde   :  { %1019 = vperm.xlu0 %4371, %v4680_v37  }
 0xbe2   :  { %1008 = vrot.lane.b32.xlu0 %v861_v6, %s4553_s0 }
 0xbe6   :  { %v4403_v18 = vpop.eup %4402 }
 0xbe7   :  { %v987_v22 = vadd.f32 1.0, %v4403_v18 }
 0xbe9   :  { %4404 = vrcp.f32 %v987_v22 }
 0xbf3   :  { %v4405_v23 = vpop.eup %4404 }
 0xbf4   :  { %v1002_v40 = vsub.f32 1.0, %v4405_v23 }
 0xc4c   :  { %v993_v25 = vpop.permute.xlu0 %992 }
 0xc4d   :  { %v995_v28 = vmul.f32 %v4405_v23, %v993_v25 }
 0xc4f   :  { %997 = vrot.lane.b32.xlu1 %v995_v28, %s4545_s11 }
 0xc53   :  { %1014 = vperm.xlu1 %4372, %v4677_v36  }
 0xc57   :  { %4373 = vset.pattern.permute.xlu1 %v4556_v50 }
 0xc5d   :  { %v1020_v34 = vpop.permute.xlu0 %1019 }
 0xc5e   :  { %v1022_v35 = vmul.f32 %v1020_v34, %v861_v6 }
 0xc61   :  { %v1009_v39 = vpop.permute.xlu0 %1008 }
 0xc62   :  { %v1011_v42 = vmul.f32 %v4405_v23, %v1009_v39 }
 0xcc1   :  { %v998_v29 = vpop.permute.xlu1 %997 }
 0xcc2   :  { %v1000_v32 = vadd.f32 %v998_v29, %v4663_v24 }
 0xcc4   :  { %4406 = vtanh.f32 %v1000_v32 }
 0xcce   :  { %v4407_v33 = vpop.eup %4406 }
 0xccf   :  { %1004 = vrot.lane.b32.xlu1 %v4407_v33, %s4550_s28  ;;  %v4557_v33 = vmov 6  }
 0xcd0   :  { %4374 = vset.pattern.permute.xlu0 %v4557_v33 }
 0xcd2   :  { %v1015_v38 = vpop.permute.xlu1 %1014 }
 0xcd3   :  { %1024 = vrot.lane.b32.xlu1 %v1022_v35, %s4553_s0 }
 0xd41   :  { %v1005_v41 = vpop.permute.xlu1 %1004 }
 0xd42   :  { %v1007_v43 = vmul.f32 %v1005_v41, %v1002_v40 }
 0xd44   :  { %v1012_v44 = vadd.f32 %v1011_v42, %v1007_v43 }
 0xd45   :  { %v1025_v47 = vpop.permute.xlu1 %1024 }
 0xd46   :  { %v4807_v45 = vmul.f32 %v1015_v38, %v1012_v44 }
 0xd48   :  { %v1027_v48 = vadd.f32 %v1025_v47, %v4807_v45 }
 0xd4a   :  { %1069 = vrot.lane.b32.xlu0 %v1027_v48, %s4550_s28  ;;  %v1172_v11 = vrot.slane %v1027_v48, 6 }
 0xdbc   :  { %v1070_v49 = vpop.permute.xlu0 %1069 }
 0xdbd   :  { %4061 = vmatmul.mubr.msk.f32.vlgmr.msra.gmra.mrb[6].mxu1 %vm57_vm0, %v1070_v49 }
 0xdbe   :  { %4266 = vmatpush3.bf16.msra.mxu1 %v4632_v15  ;;  %4082 = vmatprep.mubr.msk.f32.mxu1 %vm4547_vm1, %v4548_v20 }
 0xdbf   :  { %4267 = vmatprep.subr.bf16.mxu1 %v4546_v16 }
 0xdc2   :  { %4269 = vmatpush3.bf16.msra.mxu1 %v4644_v19 }
 0xdc3   :  { %4276 = vmatprep.subr.bf16.mxu1 %v4546_v16 }
 0xe90   :  { %v1139_v51 = vpop.f32.mrb[6].mxu1 }
 0xe91   :  { %v1153_v52 = vadd.f32 %v1139_v51, %v4667_v27  ;;  %v4062_v53 = vpop.f32.mrb[7].mxu1  ;;  %v1144_v15 = vrot.slane %v1139_v51, 6 }
 0xe93   :  { %v1155_v54 = vrot.slane %v1153_v52, 6  ;;  %v1146_v55 = vadd.f32 %v1144_v15, %v4663_v24 }
 0xe95   :  { %1156 = vrot.lane.b32.xlu1 %v1155_v54, %s4545_s11  ;;  %v3838_v56 = vmul.f32 -1.442695, %v1146_v55 }
 0xe97   :  { %4408 = vpow2.f32 %v3838_v56 }
 0xe99   :  { %1187 = vperm.xlu1 %4373, %v4680_v37  }
 0xe9d   :  { %1177 = vperm.xlu1 %4373, %v4677_v36  }
 0xea1   :  { %v4409_v19 = vpop.eup %4408  ;;  %4375 = vset.pattern.permute.xlu1 %v4557_v33 }
 0xea2   :  { %v1150_v57 = vadd.f32 1.0, %v4409_v19 }
 0xea4   :  { %4410 = vrcp.f32 %v1150_v57 }
 0xeae   :  { %v4411_v58 = vpop.eup %4410 }
 0xeaf   :  { %v1166_v12 = vsub.f32 1.0, %v4411_v58  ;;  %v1174_v17 = vmul.f32 %v4411_v58, %v1172_v11 }
 0xf07   :  { %v1157_v59 = vpop.permute.xlu1 %1156 }
 0xf08   :  { %v1159_v61 = vmul.f32 %v4411_v58, %v1157_v59 }
 0xf0a   :  { %1161 = vrot.lane.b32.xlu0 %v1159_v61, %s4545_s11 }
 0xf18   :  { %v1188_v0 = vpop.permute.xlu1 %1187 }
 0xf19   :  { %v1190_v4 = vmul.f32 %v1188_v0, %v1027_v48 }
 0xf1b   :  { %1192 = vrot.lane.b32.xlu1 %v1190_v4, %s4550_s28 }
 0xf1c   :  { %v1178_v23 = vpop.permute.xlu1 %1177 }
 0xf7c   :  { %v1162_v5 = vpop.permute.xlu0 %1161 }
 0xf7d   :  { %v1164_v6 = vadd.f32 %v1162_v5, %v4663_v24 }
 0xf7f   :  { %4412 = vtanh.f32 %v1164_v6 }
 0xf89   :  { %v4413_v7 = vpop.eup %4412 }
 0xf8a   :  { %1168 = vrot.lane.b32.xlu0 %v4413_v7, %s4550_s28  ;;  %v4558_v7 = vmov 7  }
 0xf8d   :  { %v1193_v29 = vpop.permute.xlu1 %1192 }
 0xffc   :  { %v1169_v13 = vpop.permute.xlu0 %1168 }
 0xffd   :  { %v1171_v14 = vmul.f32 %v1169_v13, %v1166_v12 }
 0xfff   :  { %v1175_v18 = vadd.f32 %v1174_v17, %v1171_v14 }
0x1001   :  { %v1181_v22 = vrot.slane %v1175_v18, 2 }
0x1003   :  { %1182 = vrot.lane.b32.xlu0 %v1181_v22, %s4550_s28 }
0x1075   :  { %v1183_v25 = vpop.permute.xlu0 %1182 }
0x1076   :  { %v4828_v28 = vmul.f32 %v1183_v25, %v1178_v23 }
0x1078   :  { %v1195_v32 = vadd.f32 %v1193_v29, %v4828_v28 }
0x107a   :  { %4072 = vmatmul.mubr.msk.f32.vlgmr.msra.gmra.mrb[8].mxu0 %vm57_vm0, %v1195_v32  ;;  %v1346_v50 = vrot.slane %v1195_v32, 4 }
0x107b   :  { %4093 = vmatprep.mubr.msk.f32.mxu0 %vm4547_vm1, %v4548_v20 }
0x114d   :  { %v1313_v34 = vpop.f32.mrb[8].mxu0 }
0x114e   :  { %v1327_v35 = vadd.f32 %v1313_v34, %v4667_v27  ;;  %v4073_v38 = vpop.f32.mrb[9].mxu0  ;;  %v1318_v40 = vrot.slane %v1313_v34, 4 }
0x114f   :  { %v33_v38 = vld [vmem:[%s5465_s1 + $0x60] sm:$0xff] }
0x1150   :  { %v1329_v39 = vrot.slane %v1327_v35, 4  ;;  %v1320_v41 = vadd.f32 %v1318_v40, %v4663_v24 }
0x1152   :  { %1330 = vrot.lane.b32.xlu0 %v1329_v39, %s4545_s11  ;;  %v3840_v42 = vmul.f32 -1.442695, %v1320_v41  ;;  %v34_v39 = vld [vmem:[%s5465_s1 + $0x68] sm:$0xff]  ;;  %v36_v41 = vld [vmem:[%s5465_s1 + $0x78] sm:$0xff] }
0x1153   :  { %v4863_v40 = vpack.c.bf16 %v34_v39, %v33_v38 }
0x1154   :  { %4414 = vpow2.f32 %v3840_v42 }
0x1155   :  { %4272 = vmatpush3.bf16.msra.mxu0 %v4863_v40 }
0x1156   :  { %4273 = vmatprep.subr.bf16.mxu0 %v4546_v16 }
0x115e   :  { %v4415_v43 = vpop.eup %4414 }
0x115f   :  { %v1324_v44 = vadd.f32 1.0, %v4415_v43 }
0x1161   :  { %4416 = vrcp.f32 %v1324_v44 }
0x116b   :  { %v4417_v47 = vpop.eup %4416 }
0x116c   :  { %v1340_v15 = vsub.f32 1.0, %v4417_v47 }
0x11c4   :  { %v1331_v48 = vpop.permute.xlu0 %1330 }
0x11c5   :  { %v1333_v49 = vmul.f32 %v4417_v47, %v1331_v48 }
0x11c7   :  { %1335 = vrot.lane.b32.xlu1 %v1333_v49, %s4545_s11 }
0x11cb   :  { %1347 = vrot.lane.b32.xlu1 %v1346_v50, %s4553_s0 }
0x11cf   :  { %1363 = vperm.xlu1 %4375, %v4680_v37  }
0x11d3   :  { %4377 = vset.pattern.permute.xlu1 %v4558_v7 }
0x1239   :  { %v1336_v51 = vpop.permute.xlu1 %1335 }
0x123a   :  { %v1338_v52 = vadd.f32 %v1336_v51, %v4663_v24 }
0x123c   :  { %4418 = vtanh.f32 %v1338_v52 }
0x123d   :  { %v1348_v54 = vpop.permute.xlu1 %1347 }
0x123e   :  { %v1350_v56 = vmul.f32 %v4417_v47, %v1348_v54 }
0x1246   :  { %v4419_v53 = vpop.eup %4418 }
0x1247   :  { %1342 = vrot.lane.b32.xlu0 %v4419_v53, %s4550_s28 }
0x124b   :  { %1353 = vperm.xlu0 %4374, %v4677_v36  }
0x124e   :  { %v1364_v59 = vpop.permute.xlu1 %1363 }
0x124f   :  { %v1366_v4 = vmul.f32 %v1364_v59, %v1195_v32  ;;  %4376 = vset.pattern.permute.xlu0 %v4558_v7 }
0x12b9   :  { %v1343_v55 = vpop.permute.xlu0 %1342 }
0x12ba   :  { %v1345_v19 = vmul.f32 %v1343_v55, %v1340_v15 }
0x12bc   :  { %v1351_v57 = vadd.f32 %v1350_v56, %v1345_v19 }
0x12be   :  { %v1357_v58 = vrot.slane %v1351_v57, 4 }
0x12c0   :  { %1358 = vrot.lane.b32.xlu1 %v1357_v58, %s4550_s28 }
0x12ca   :  { %v1354_v61 = vpop.permute.xlu0 %1353 }
0x1332   :  { %v1359_v0 = vpop.permute.xlu1 %1358 }
0x1333   :  { %v4844_v5 = vmul.f32 %v1359_v0, %v1354_v61  ;;  %v4906_v61 = vadd.f32 %v4728_v2, %v4723_v63 }
0x1335   :  { %v1367_v6 = vadd.f32 %v1366_v4, %v4844_v5 }
0x1337   :  { %4083 = vmatmul.mubr.msk.f32.vlgmr.msra.gmra.mrb[8].mxu1 %vm57_vm0, %v1367_v6  ;;  %v1518_v34 = vrot.slane %v1367_v6, 2 }
0x1338   :  { %4104 = vmatprep.mubr.msk.f32.mxu1 %vm4547_vm1, %v4548_v20  ;;  %4278 = vmatpush3.bf16.msra.mxu1 %v4863_v40 }
0x1339   :  { %4279 = vmatprep.subr.bf16.mxu1 %v4546_v16 }
0x140a   :  { %v1485_v11 = vpop.f32.mrb[8].mxu1 }
0x140b   :  { %v1499_v12 = vadd.f32 %v1485_v11, %v4667_v27  ;;  %v4084_v13 = vpop.f32.mrb[9].mxu1  ;;  %v1490_v17 = vrot.slane %v1485_v11, 2 }
0x140d   :  { %v1501_v14 = vrot.slane %v1499_v12, 2  ;;  %v1492_v18 = vadd.f32 %v1490_v17, %v4663_v24 }
0x140f   :  { %1502 = vrot.lane.b32.xlu0 %v1501_v14, %s4545_s11  ;;  %v3842_v22 = vmul.f32 -1.442695, %v1492_v18 }
0x1411   :  { %4420 = vpow2.f32 %v3842_v22 }
0x141b   :  { %v4421_v23 = vpop.eup %4420 }
0x141c   :  { %v1496_v25 = vadd.f32 1.0, %v4421_v23 }
0x141e   :  { %4422 = vrcp.f32 %v1496_v25 }
0x1428   :  { %v4423_v29 = vpop.eup %4422 }
0x1429   :  { %v1512_v44 = vsub.f32 1.0, %v4423_v29 }
0x1481   :  { %v1503_v32 = vpop.permute.xlu0 %1502 }
0x1482   :  { %v1505_v33 = vmul.f32 %v4423_v29, %v1503_v32 }
0x1484   :  { %1507 = vrot.lane.b32.xlu1 %v1505_v33, %s4545_s11 }
0x1488   :  { %1519 = vrot.lane.b32.xlu1 %v1518_v34, %s4553_s0 }
0x148c   :  { %1535 = vperm.xlu1 %4377, %v4680_v37   ;;  %v35_v37 = vld [vmem:[%s5465_s1 + $0x70] sm:$0xff] }
0x148d   :  { %v4877_v42 = vpack.c.bf16 %v36_v41, %v35_v37 }
0x148f   :  { %4275 = vmatpush3.bf16.msra.mxu0 %v4877_v42  ;;  %4281 = vmatpush3.bf16.msra.mxu1 %v4877_v42 }
0x1490   :  { %4282 = vmatprep.subr.bf16.mxu0 %v4546_v16  ;;  %4288 = vmatprep.subr.bf16.mxu1 %v4546_v16 }
0x14f6   :  { %v1508_v27 = vpop.permute.xlu1 %1507 }
0x14f7   :  { %v1510_v35 = vadd.f32 %v1508_v27, %v4663_v24 }
0x14f9   :  { %4424 = vtanh.f32 %v1510_v35 }
0x14fa   :  { %v1520_v43 = vpop.permute.xlu1 %1519 }
0x14fb   :  { %v1522_v49 = vmul.f32 %v4423_v29, %v1520_v43 }
0x1503   :  { %v4425_v24 = vpop.eup %4424 }
0x1504   :  { %1514 = vrot.lane.b32.xlu0 %v4425_v24, %s4550_s28 }
0x1508   :  { %1525 = vperm.xlu0 %4376, %v4677_v36   ;;  %v4884_v36 = vsub.s32 3, %v4611_v8 }
0x150a   :  { %v1671_v48 = vrot.slane %v4616_v9, %v4884_v36 }
0x150b   :  { %v1536_v53 = vpop.permute.xlu1 %1535 }
0x150c   :  { %1673 = vrot.lane.b32.xlu0 %v1671_v48, %s4545_s11  ;;  %v1538_v55 = vmul.f32 %v1536_v53, %v1367_v6 }
0x1576   :  { %v1515_v47 = vpop.permute.xlu0 %1514 }
0x1577   :  { %v1517_v50 = vmul.f32 %v1515_v47, %v1512_v44 }
0x1579   :  { %v1523_v51 = vadd.f32 %v1522_v49, %v1517_v50 }
0x157b   :  { %v1529_v52 = vrot.slane %v1523_v51, 6  ;;  %v4559_v51 = vmov 1966171168  }
0x157d   :  { %1530 = vrot.lane.b32.xlu1 %v1529_v52, %s4550_s28  ;;  %v353_v52 = vunpack.c.l.s4 %v4559_v51 }
0x157f   :  { %v354_v53 = vunpack.c.0.s8 %v353_v52 }
0x1587   :  { %v1526_v54 = vpop.permute.xlu0 %1525 }
0x158b   :  { %v4900_v9 = vpop.permute.xlu0 %1673 }
0x15ef   :  { %v1531_v15 = vpop.permute.xlu1 %1530 }
0x15f0   :  { %v4890_v56 = vmul.f32 %v1531_v15, %v1526_v54  ;;  %v4928_v54 = vsub.s32 %v354_v53, %v4611_v8 }
0x15f2   :  { %v1539_v19 = vadd.f32 %v1538_v55, %v4890_v56 }
0x15f4   :  { %4094 = vmatmul.mubr.msk.f32.vlgmr.msra.gmra.mrb[10].mxu0 %vm57_vm0, %v1539_v19 }
0x15f5   :  { %4284 = vmatpush3.bf16.msra.mxu0 %v4863_v40  ;;  %4115 = vmatprep.mubr.msk.f32.mxu0 %vm4547_vm1, %v4548_v20 }
0x15f6   :  { %4285 = vmatprep.subr.bf16.mxu0 %v4546_v16 }
0x15f9   :  { %4287 = vmatpush3.bf16.msra.mxu0 %v4877_v42 }
0x15fa   :  { %4294 = vmatprep.subr.bf16.mxu0 %v4546_v16 }
0x16c7   :  { %v1657_v57 = vpop.f32.mrb[10].mxu0 }
0x16c8   :  { %v1676_v58 = vadd.f32 %v4900_v9, %v1657_v57  ;;  %v4095_v59 = vpop.f32.mrb[11].mxu0  ;;  %v1661_v0 = vadd.f32 %v1657_v57, %v4906_v61 }
0x16ca   :  { %1678 = vrot.lane.b32.xlu1 %v1676_v58, %s4545_s11  ;;  %v3844_v4 = vmul.f32 -1.442695, %v1661_v0 }
0x16cc   :  { %4426 = vpow2.f32 %v3844_v4 }
0x16d6   :  { %v4427_v6 = vpop.eup %4426 }
0x16d7   :  { %v1665_v7 = vadd.f32 1.0, %v4427_v6 }
0x16d9   :  { %4428 = vrcp.f32 %v1665_v7 }
0x16e3   :  { %v4429_v11 = vpop.eup %4428 }
0x16e4   :  { %v1688_v18 = vsub.f32 1.0, %v4429_v11 }
0x173c   :  { %v1679_v12 = vpop.permute.xlu1 %1678 }
0x173d   :  { %v1681_v13 = vmul.f32 %v4429_v11, %v1679_v12 }
0x173f   :  { %1683 = vrot.lane.b32.xlu0 %v1681_v13, %s4545_s11 }
0x1743   :  { %1694 = vrot.lane.b32.xlu0 %v1539_v19, %s4553_s0 }
0x17b1   :  { %v1684_v14 = vpop.permute.xlu0 %1683 }
0x17b2   :  { %v1686_v17 = vadd.f32 %v1684_v14, %v4906_v61 }
0x17b4   :  { %4430 = vtanh.f32 %v1686_v17 }
0x17b5   :  { %v1695_v2 = vpop.permute.xlu0 %1694 }
0x17b6   :  { %v1697_v23 = vmul.f32 %v4429_v11, %v1695_v2 }
0x17be   :  { %v4431_v63 = vpop.eup %4430 }
0x17bf   :  { %1690 = vrot.lane.b32.xlu1 %v4431_v63, %s4550_s28 }
0x1831   :  { %v1691_v22 = vpop.permute.xlu1 %1690 }
0x1832   :  { %v1693_v25 = vmul.f32 %v1691_v22, %v1688_v18 }
0x1834   :  { %v1698_v29 = vadd.f32 %v1697_v23, %v1693_v25 }
0x1836   :  { %1736 = vrot.lane.b32.xlu1 %v1698_v29, %s4550_s28  ;;  %v1706_v15 = vrot.slane %v1698_v29, %v4928_v54  ;;  %v1839_v19 = vrot.slane %v1698_v29, 6 }
0x1838   :  { %v1707_v0 = vcombine.high %v1706_v15, %v1706_v15  ;;  %v1714_v6 = vrot.slane %v1706_v15, %v4928_v54 }
0x183a   :  { %v1721_v12 = vrot.slane %v1707_v0, %v4928_v54  ;;  %v1725_v2 = vrot.slane %v1714_v6, %v4659_v21 }
0x183c   :  { %v1729_v23 = vrot.slane %v1721_v12, %v4659_v21 }
0x18a8   :  { %v1737_v32 = vpop.permute.xlu1 %1736 }
0x18a9   :  { %4105 = vmatmul.mubr.msk.f32.vlgmr.msra.gmra.mrb[10].mxu1 %vm57_vm0, %v1737_v32  ;;  %v1732_v32 = vsel %vm350_vm3, %v1725_v2, 0.0 }
0x18aa   :  { %4290 = vmatpush3.bf16.msra.mxu1 %v4863_v40  ;;  %4126 = vmatprep.mubr.msk.f32.mxu1 %vm4547_vm1, %v4548_v20 }
0x18ab   :  { %4291 = vmatprep.subr.bf16.mxu1 %v4546_v16 }
0x18ae   :  { %4293 = vmatpush3.bf16.msra.mxu1 %v4877_v42 }
0x18af   :  { %4300 = vmatprep.subr.bf16.mxu1 %v4546_v16 }
0x197c   :  { %v1806_v33 = vpop.f32.mrb[10].mxu1 }
0x197d   :  { %v1820_v34 = vadd.f32 %v1806_v33, %v4900_v9  ;;  %v4106_v27 = vpop.f32.mrb[11].mxu1  ;;  %v1811_v38 = vrot.slane %v1806_v33, 6 }
0x197e   :  { %v1733_v27 = vsel %vm350_vm3, %v1729_v23, 0.0 }
0x197f   :  { %v1822_v35 = vrot.slane %v1820_v34, 6  ;;  %v1813_v39 = vadd.f32 %v1811_v38, %v4906_v61 }
0x1981   :  { %1823 = vrot.lane.b32.xlu0 %v1822_v35, %s4545_s11  ;;  %v3846_v24 = vmul.f32 -1.442695, %v1813_v39 }
0x1983   :  { %4432 = vpow2.f32 %v3846_v24 }
0x198d   :  { %v4433_v37 = vpop.eup %4432 }
0x198e   :  { %v1817_v41 = vadd.f32 1.0, %v4433_v37 }
0x1990   :  { %4434 = vrcp.f32 %v1817_v41 }
0x199a   :  { %v4435_v43 = vpop.eup %4434 }
0x199b   :  { %v1833_v55 = vsub.f32 1.0, %v4435_v43  ;;  %v1841_v59 = vmul.f32 %v4435_v43, %v1839_v19 }
0x19f3   :  { %v1824_v44 = vpop.permute.xlu0 %1823 }
0x19f4   :  { %v1826_v47 = vmul.f32 %v4435_v43, %v1824_v44 }
0x19f6   :  { %1828 = vrot.lane.b32.xlu1 %v1826_v47, %s4545_s11 }
0x1a68   :  { %v1829_v48 = vpop.permute.xlu1 %1828 }
0x1a69   :  { %v1831_v49 = vadd.f32 %v1829_v48, %v4906_v61 }
0x1a6b   :  { %4436 = vtanh.f32 %v1831_v49 }
0x1a75   :  { %v4437_v50 = vpop.eup %4436 }
0x1a76   :  { %1835 = vrot.lane.b32.xlu0 %v4437_v50, %s4550_s28 }
0x1ae8   :  { %v1836_v57 = vpop.permute.xlu0 %1835 }
0x1ae9   :  { %v1838_v58 = vmul.f32 %v1836_v57, %v1833_v55 }
0x1aeb   :  { %v1842_v4 = vadd.f32 %v1841_v59, %v1838_v58 }
0x1aed   :  { %v1850_v7 = vrot.slane %v1842_v4, %v4928_v54  ;;  %v1882_v11 = vrot.slane %v1842_v4, 2  ;;  %v1986_v57 = vrot.slane %v1842_v4, 6 }
0x1aef   :  { %v1851_v13 = vcombine.high %v1850_v7, %v1850_v7  ;;  %v1858_v14 = vrot.slane %v1850_v7, %v4928_v54  ;;  %1883 = vrot.lane.b32.xlu1 %v1882_v11, %s4550_s28 }
0x1af1   :  { %v1865_v17 = vrot.slane %v1851_v13, %v4928_v54  ;;  %v1866_v63 = vcombine.high %v1858_v14, %v1858_v14 }
0x1af3   :  { %v1867_v18 = vcombine.high %v1865_v17, %v1865_v17  ;;  %v1871_v22 = vrot.slane %v1866_v63, %v4659_v21 }
0x1af5   :  { %v1875_v25 = vrot.slane %v1867_v18, %v4659_v21  ;;  %v1878_v29 = vsel %vm518_vm2, %v1871_v22, 0.0 }
0x1af6   :  { %v1880_v33 = vadd.f32 %v1878_v29, %v1732_v32 }
0x1af7   :  { %v1879_v34 = vsel %vm518_vm2, %v1875_v25, 0.0 }
0x1af8   :  { %v1881_v35 = vadd.f32 %v1879_v34, %v1733_v27 }
0x1b61   :  { %v1884_v38 = vpop.permute.xlu1 %1883 }
0x1b62   :  { %4116 = vmatmul.mubr.msk.f32.vlgmr.msra.gmra.mrb[12].mxu0 %vm57_vm0, %v1884_v38 }
0x1b63   :  { %4296 = vmatpush3.bf16.msra.mxu0 %v4863_v40  ;;  %4137 = vmatprep.mubr.msk.f32.mxu0 %vm4547_vm1, %v4548_v20 }
0x1b64   :  { %4297 = vmatprep.subr.bf16.mxu0 %v4546_v16 }
0x1b67   :  { %4299 = vmatpush3.bf16.msra.mxu0 %v4877_v42 }
0x1b68   :  { %4306 = vmatprep.subr.bf16.mxu0 %v4546_v16 }
0x1c35   :  { %v1953_v39 = vpop.f32.mrb[12].mxu0 }
0x1c36   :  { %v1967_v24 = vadd.f32 %v1953_v39, %v4900_v9  ;;  %v4117_v37 = vpop.f32.mrb[13].mxu0  ;;  %v1958_v43 = vrot.slane %v1953_v39, 4 }
0x1c38   :  { %v1969_v41 = vrot.slane %v1967_v24, 4  ;;  %v1960_v44 = vadd.f32 %v1958_v43, %v4906_v61 }
0x1c3a   :  { %1970 = vrot.lane.b32.xlu0 %v1969_v41, %s4545_s11  ;;  %v3848_v47 = vmul.f32 -1.442695, %v1960_v44 }
0x1c3c   :  { %4438 = vpow2.f32 %v3848_v47 }
0x1c46   :  { %v4439_v48 = vpop.eup %4438 }
0x1c47   :  { %v1964_v49 = vadd.f32 1.0, %v4439_v48 }
0x1c49   :  { %4440 = vrcp.f32 %v1964_v49 }
0x1c53   :  { %v4441_v50 = vpop.eup %4440 }
0x1c54   :  { %v1980_v19 = vsub.f32 1.0, %v4441_v50  ;;  %v1988_v59 = vmul.f32 %v4441_v50, %v1986_v57 }
0x1cac   :  { %v1971_v51 = vpop.permute.xlu0 %1970 }
0x1cad   :  { %v1973_v52 = vmul.f32 %v4441_v50, %v1971_v51 }
0x1caf   :  { %1975 = vrot.lane.b32.xlu1 %v1973_v52, %s4545_s11 }
0x1d21   :  { %v1976_v53 = vpop.permute.xlu1 %1975 }
0x1d22   :  { %v1978_v15 = vadd.f32 %v1976_v53, %v4906_v61 }
0x1d24   :  { %4442 = vtanh.f32 %v1978_v15 }
0x1d2e   :  { %v4443_v55 = vpop.eup %4442 }
0x1d2f   :  { %1982 = vrot.lane.b32.xlu0 %v4443_v55, %s4550_s28 }
0x1da1   :  { %v1983_v58 = vpop.permute.xlu0 %1982 }
0x1da2   :  { %v1985_v0 = vmul.f32 %v1983_v58, %v1980_v19 }
0x1da4   :  { %v1989_v6 = vadd.f32 %v1988_v59, %v1985_v0 }
0x1da6   :  { %v1991_v7 = vcombine.high %v1989_v6, %v1989_v6  ;;  %v2028_v11 = vrot.slane %v1989_v6, 4  ;;  %v2132_v50 = vrot.slane %v1989_v6, 6 }
0x1da8   :  { %v1998_v12 = vrot.slane %v1991_v7, %v4928_v54  ;;  %2029 = vrot.lane.b32.xlu1 %v2028_v11, %s4550_s28 }
0x1daa   :  { %v1999_v13 = vcombine.high %v1998_v12, %v1998_v12  ;;  %v2006_v14 = vrot.slane %v1998_v12, %v4928_v54 }
0x1dac   :  { %v2013_v17 = vrot.slane %v1999_v13, %v4928_v54  ;;  %v2017_v63 = vrot.slane %v2006_v14, %v4659_v21 }
0x1dae   :  { %v2021_v4 = vrot.slane %v2013_v17, %v4659_v21  ;;  %v2024_v2 = vsel %vm690_vm4, %v2017_v63, 0.0 }
0x1daf   :  { %v2026_v18 = vadd.f32 %v2024_v2, %v1880_v33 }
0x1db0   :  { %v2025_v22 = vsel %vm690_vm4, %v2021_v4, 0.0 }
0x1db1   :  { %v2027_v23 = vadd.f32 %v2025_v22, %v1881_v35 }
0x1e1a   :  { %v2030_v25 = vpop.permute.xlu1 %2029 }
0x1e1b   :  { %4127 = vmatmul.mubr.msk.f32.vlgmr.msra.gmra.mrb[12].mxu1 %vm57_vm0, %v2030_v25 }
0x1e1c   :  { %4302 = vmatpush3.bf16.msra.mxu1 %v4863_v40  ;;  %4148 = vmatprep.mubr.msk.f32.mxu1 %vm4547_vm1, %v4548_v20 }
0x1e1d   :  { %4303 = vmatprep.subr.bf16.mxu1 %v4546_v16 }
0x1e20   :  { %4305 = vmatpush3.bf16.msra.mxu1 %v4877_v42 }
0x1e21   :  { %4312 = vmatprep.subr.bf16.mxu1 %v4546_v16 }
0x1eee   :  { %v2099_v29 = vpop.f32.mrb[12].mxu1 }
0x1eef   :  { %v2113_v32 = vadd.f32 %v2099_v29, %v4900_v9  ;;  %v4128_v33 = vpop.f32.mrb[13].mxu1  ;;  %v2104_v27 = vrot.slane %v2099_v29, 2 }
0x1ef1   :  { %v2115_v34 = vrot.slane %v2113_v32, 2  ;;  %v2106_v35 = vadd.f32 %v2104_v27, %v4906_v61 }
0x1ef3   :  { %2116 = vrot.lane.b32.xlu0 %v2115_v34, %s4545_s11  ;;  %v3850_v38 = vmul.f32 -1.442695, %v2106_v35 }
0x1ef5   :  { %4444 = vpow2.f32 %v3850_v38 }
0x1eff   :  { %v4445_v39 = vpop.eup %4444 }
0x1f00   :  { %v2110_v24 = vadd.f32 1.0, %v4445_v39 }
0x1f02   :  { %4446 = vrcp.f32 %v2110_v24 }
0x1f0c   :  { %v4447_v37 = vpop.eup %4446 }
0x1f0d   :  { %v2126_v49 = vsub.f32 1.0, %v4447_v37  ;;  %v2134_v52 = vmul.f32 %v4447_v37, %v2132_v50 }
0x1f65   :  { %v2117_v41 = vpop.permute.xlu0 %2116 }
0x1f66   :  { %v2119_v43 = vmul.f32 %v4447_v37, %v2117_v41 }
0x1f68   :  { %2121 = vrot.lane.b32.xlu1 %v2119_v43, %s4545_s11 }
0x1fda   :  { %v2122_v44 = vpop.permute.xlu1 %2121 }
0x1fdb   :  { %v2124_v47 = vadd.f32 %v2122_v44, %v4906_v61 }
0x1fdd   :  { %4448 = vtanh.f32 %v2124_v47 }
0x1fe7   :  { %v4449_v48 = vpop.eup %4448 }
0x1fe8   :  { %2128 = vrot.lane.b32.xlu0 %v4449_v48, %s4550_s28 }
0x205a   :  { %v2129_v51 = vpop.permute.xlu0 %2128 }
0x205b   :  { %v2131_v53 = vmul.f32 %v2129_v51, %v2126_v49 }
0x205d   :  { %v2135_v15 = vadd.f32 %v2134_v52, %v2131_v53 }
0x205f   :  { %v2137_v55 = vcombine.high %v2135_v15, %v2135_v15  ;;  %v2176_v19 = vrot.slane %v2135_v15, 6 }
0x2061   :  { %v2144_v57 = vrot.slane %v2137_v55, %v4928_v54  ;;  %2177 = vrot.lane.b32.xlu1 %v2176_v19, %s4550_s28 }
0x2063   :  { %v2145_v58 = vcombine.high %v2144_v57, %v2144_v57  ;;  %v2152_v59 = vrot.slane %v2144_v57, %v4928_v54 }
0x2065   :  { %v2159_v61 = vrot.slane %v2145_v58, %v4928_v54  ;;  %v2160_v0 = vcombine.high %v2152_v59, %v2152_v59 }
0x2067   :  { %v2161_v7 = vcombine.high %v2159_v61, %v2159_v61  ;;  %v2165_v11 = vrot.slane %v2160_v0, %v4659_v21 }
0x2069   :  { %v2169_v6 = vrot.slane %v2161_v7, %v4659_v21  ;;  %v2172_v12 = vsel %vm862_vm5, %v2165_v11, 0.0 }
0x206a   :  { %v2174_v13 = vadd.f32 %v2172_v12, %v2026_v18 }
0x206b   :  { %v2173_v14 = vsel %vm862_vm5, %v2169_v6, 0.0 }
0x206c   :  { %v2175_v17 = vadd.f32 %v2173_v14, %v2027_v23 }
0x20d3   :  { %v2178_v63 = vpop.permute.xlu1 %2177 }
0x20d4   :  { %4138 = vmatmul.mubr.msk.f32.vlgmr.msra.gmra.mrb[14].mxu0 %vm57_vm0, %v2178_v63 }
0x20d5   :  { %4308 = vmatpush3.bf16.msra.mxu0 %v4863_v40  ;;  %4159 = vmatprep.mubr.msk.f32.mxu0 %vm4547_vm1, %v4548_v20 }
0x20d6   :  { %4309 = vmatprep.subr.bf16.mxu0 %v4546_v16 }
0x20d9   :  { %4311 = vmatpush3.bf16.msra.mxu0 %v4877_v42 }
0x21a7   :  { %v2247_v4 = vpop.f32.mrb[14].mxu0 }
0x21a8   :  { %v2258_v2 = vadd.f32 %v2247_v4, %v4900_v9  ;;  %v4139_v18 = vpop.f32.mrb[15].mxu0  ;;  %v2251_v22 = vadd.f32 %v2247_v4, %v4726_v1 }
0x21aa   :  { %2260 = vrot.lane.b32.xlu0 %v2258_v2, %s4545_s11  ;;  %v3852_v23 = vmul.f32 -1.442695, %v2251_v22 }
0x21ac   :  { %4450 = vpow2.f32 %v3852_v23 }
0x21b6   :  { %v4451_v25 = vpop.eup %4450 }
0x21b7   :  { %v2255_v29 = vadd.f32 1.0, %v4451_v25 }
0x21b9   :  { %4452 = vrcp.f32 %v2255_v29 }
0x21c3   :  { %v4453_v32 = vpop.eup %4452 }
0x21c4   :  { %v2270_v39 = vsub.f32 1.0, %v4453_v32  ;;  %v2277_v37 = vmul.f32 %v4453_v32, %v2176_v19 }
0x221c   :  { %v2261_v33 = vpop.permute.xlu0 %2260 }
0x221d   :  { %v2263_v34 = vmul.f32 %v4453_v32, %v2261_v33 }
0x221f   :  { %2265 = vrot.lane.b32.xlu1 %v2263_v34, %s4545_s11 }
0x2291   :  { %v2266_v27 = vpop.permute.xlu1 %2265 }
0x2292   :  { %v2268_v35 = vadd.f32 %v2266_v27, %v4726_v1 }
0x2294   :  { %4454 = vtanh.f32 %v2268_v35 }
0x229e   :  { %v4455_v38 = vpop.eup %4454 }
0x229f   :  { %2272 = vrot.lane.b32.xlu0 %v4455_v38, %s4550_s28 }
0x2311   :  { %v2273_v24 = vpop.permute.xlu0 %2272 }
0x2312   :  { %v2275_v41 = vmul.f32 %v2273_v24, %v2270_v39 }
0x2314   :  { %v2278_v43 = vadd.f32 %v2277_v37, %v2275_v41 }
0x2316   :  { %v2286_v44 = vrot.slane %v2278_v43, %v4928_v54  ;;  %2316 = vrot.lane.b32.xlu1 %v2278_v43, %s4550_s28  ;;  %v2419_v63 = vrot.slane %v2278_v43, 6 }
0x2318   :  { %v2287_v47 = vcombine.high %v2286_v44, %v2286_v44  ;;  %v2294_v48 = vrot.slane %v2286_v44, %v4928_v54 }
0x231a   :  { %v2301_v49 = vrot.slane %v2287_v47, %v4928_v54  ;;  %v2305_v50 = vrot.slane %v2294_v48, %v4659_v21 }
0x231c   :  { %v2309_v51 = vrot.slane %v2301_v49, %v4659_v21  ;;  %v2312_v52 = vsel %vm1028_vm6, %v2305_v50, 0.0 }
0x231d   :  { %v2314_v53 = vadd.f32 %v2312_v52, %v2174_v13 }
0x231e   :  { %v2313_v15 = vsel %vm1028_vm6, %v2309_v51, 0.0 }
0x231f   :  { %v2315_v55 = vadd.f32 %v2313_v15, %v2175_v17 }
0x2388   :  { %v2317_v19 = vpop.permute.xlu1 %2316 }
0x2389   :  { %4149 = vmatmul.mubr.msk.f32.vlgmr.msra.gmra.mrb[14].mxu1 %vm57_vm0, %v2317_v19 }
0x238a   :  { %4314 = vmatpush3.bf16.msra.mxu1 %v4863_v40  ;;  %4170 = vmatprep.mubr.msk.f32.mxu1 %vm4547_vm1, %v4548_v20 }
0x238b   :  { %4315 = vmatprep.subr.bf16.mxu1 %v4546_v16 }
0x238e   :  { %4317 = vmatpush3.bf16.msra.mxu1 %v4877_v42 }
0x245c   :  { %v2386_v57 = vpop.f32.mrb[14].mxu1 }
0x245d   :  { %v2400_v58 = vadd.f32 %v2386_v57, %v4900_v9  ;;  %v4150_v59 = vpop.f32.mrb[15].mxu1  ;;  %v2391_v0 = vrot.slane %v2386_v57, 6 }
0x245f   :  { %v2402_v61 = vrot.slane %v2400_v58, 6  ;;  %v2393_v7 = vadd.f32 %v2391_v0, %v4726_v1 }
0x2461   :  { %2403 = vrot.lane.b32.xlu0 %v2402_v61, %s4545_s11  ;;  %v3854_v11 = vmul.f32 -1.442695, %v2393_v7 }
0x2463   :  { %4456 = vpow2.f32 %v3854_v11 }
0x246d   :  { %v4457_v40 = vpop.eup %4456 }
0x246e   :  { %v2397_v6 = vadd.f32 1.0, %v4457_v40 }
0x2470   :  { %4458 = vrcp.f32 %v2397_v6 }
0x247a   :  { %v4459_v20 = vpop.eup %4458 }
0x247b   :  { %v2413_v17 = vsub.f32 1.0, %v4459_v20  ;;  %v2421_v18 = vmul.f32 %v4459_v20, %v2419_v63 }
0x24d3   :  { %v2404_v12 = vpop.permute.xlu0 %2403 }
0x24d4   :  { %v2406_v16 = vmul.f32 %v4459_v20, %v2404_v12 }
0x24d6   :  { %2408 = vrot.lane.b32.xlu1 %v2406_v16, %s4545_s11 }
0x2548   :  { %v2409_v42 = vpop.permute.xlu1 %2408 }
0x2549   :  { %v2411_v13 = vadd.f32 %v2409_v42, %v4726_v1 }
0x254b   :  { %4460 = vtanh.f32 %v2411_v13 }
0x2555   :  { %v4461_v14 = vpop.eup %4460 }
0x2556   :  { %2415 = vrot.lane.b32.xlu0 %v4461_v14, %s4550_s28 }
0x25c8   :  { %v2416_v4 = vpop.permute.xlu0 %2415 }
0x25c9   :  { %v2418_v2 = vmul.f32 %v2416_v4, %v2413_v17 }
0x25cb   :  { %v2422_v22 = vadd.f32 %v2421_v18, %v2418_v2 }
0x25cd   :  { %v2430_v23 = vrot.slane %v2422_v22, %v4928_v54  ;;  %v2462_v25 = vrot.slane %v2422_v22, 2  ;;  %v2566_v7 = vrot.slane %v2422_v22, 6 }
0x25cf   :  { %v2431_v29 = vcombine.high %v2430_v23, %v2430_v23  ;;  %v2438_v32 = vrot.slane %v2430_v23, %v4928_v54  ;;  %2463 = vrot.lane.b32.xlu1 %v2462_v25, %s4550_s28 }
0x25d1   :  { %v2445_v33 = vrot.slane %v2431_v29, %v4928_v54  ;;  %v2446_v34 = vcombine.high %v2438_v32, %v2438_v32 }
0x25d3   :  { %v2447_v27 = vcombine.high %v2445_v33, %v2445_v33  ;;  %v2451_v35 = vrot.slane %v2446_v34, %v4659_v21 }
0x25d5   :  { %v2455_v38 = vrot.slane %v2447_v27, %v4659_v21  ;;  %v2458_v39 = vsel %vm1196_vm7, %v2451_v35, 0.0 }
0x25d6   :  { %v2460_v24 = vadd.f32 %v2458_v39, %v2314_v53 }
0x25d7   :  { %v2459_v37 = vsel %vm1196_vm7, %v2455_v38, 0.0 }
0x25d8   :  { %v2461_v41 = vadd.f32 %v2459_v37, %v2315_v55  ;;  %v526_v37 = vrot.slane %v4747_v46, %v4928_v54 }
0x2641   :  { %v2464_v43 = vpop.permute.xlu1 %2463 }
0x2642   :  { %4160 = vmatmul.mubr.msk.f32.vlgmr.msra.gmra.mrb[16].mxu0 %vm57_vm0, %v2464_v43 }
0x2715   :  { %v2533_v44 = vpop.f32.mrb[16].mxu0 }
0x2716   :  { %v2547_v47 = vadd.f32 %v2533_v44, %v4900_v9  ;;  %v4161_v48 = vpop.f32.mrb[17].mxu0  ;;  %v2538_v50 = vrot.slane %v2533_v44, 4 }
0x2718   :  { %v2549_v49 = vrot.slane %v2547_v47, 4  ;;  %v2540_v51 = vadd.f32 %v2538_v50, %v4726_v1 }
0x271a   :  { %2550 = vrot.lane.b32.xlu0 %v2549_v49, %s4545_s11  ;;  %v3856_v52 = vmul.f32 -1.442695, %v2540_v51  ;;  %v870_v49 = vrot.slane %v4787_v31, %v4928_v54  ;;  %v1376_v31 = vrot.slane %v4844_v5, %v4928_v54 }
0x271c   :  { %4462 = vpow2.f32 %v3856_v52  ;;  %v878_v46 = vrot.slane %v870_v49, %v4928_v54 }
0x2726   :  { %v4463_v53 = vpop.eup %4462 }
0x2727   :  { %v2544_v15 = vadd.f32 1.0, %v4463_v53 }
0x2729   :  { %4464 = vrcp.f32 %v2544_v15 }
0x2733   :  { %v4465_v19 = vpop.eup %4464 }
0x2734   :  { %v2560_v0 = vsub.f32 1.0, %v4465_v19  ;;  %v2568_v40 = vmul.f32 %v4465_v19, %v2566_v7 }
0x278c   :  { %v2551_v55 = vpop.permute.xlu0 %2550 }
0x278d   :  { %v2553_v57 = vmul.f32 %v4465_v19, %v2551_v55  ;;  %v891_v19 = vrot.slane %v878_v46, %v4659_v21  ;;  %v1548_v55 = vrot.slane %v4890_v56, %v4928_v54 }
0x278f   :  { %2555 = vrot.lane.b32.xlu1 %v2553_v57, %s4545_s11  ;;  %v898_v57 = vsel %vm862_vm5, %v891_v19, 0.0  ;;  %v1556_v5 = vrot.slane %v1548_v55, %v4928_v54 }
0x2791   :  { %v1569_v56 = vrot.slane %v1556_v5, %v4659_v21 }
0x2793   :  { %v1576_v7 = vsel %vm1540_vm9, %v1569_v56, 0.0 }
0x2801   :  { %v2556_v58 = vpop.permute.xlu1 %2555 }
0x2802   :  { %v2558_v59 = vadd.f32 %v2556_v58, %v4726_v1 }
0x2804   :  { %4466 = vtanh.f32 %v2558_v59 }
0x280e   :  { %v4467_v61 = vpop.eup %4466 }
0x280f   :  { %2562 = vrot.lane.b32.xlu0 %v4467_v61, %s4550_s28 }
0x2881   :  { %v2563_v11 = vpop.permute.xlu0 %2562 }
0x2882   :  { %v2565_v6 = vmul.f32 %v2563_v11, %v2560_v0  ;;  %v358_v11 = vrot.slane %v4714_v60, %v4928_v54 }
0x2884   :  { %v5052_v20 = vadd.f32 %v2568_v40, %v2565_v6  ;;  %v366_v6 = vrot.slane %v358_v11, %v4928_v54 }
0x2886   :  { %v2571_v12 = vcombine.high %v5052_v20, %v5052_v20  ;;  %v2608_v16 = vrot.slane %v5052_v20, 4 }
0x2888   :  { %v2578_v42 = vrot.slane %v2571_v12, %v4928_v54  ;;  %2609 = vrot.lane.b32.xlu1 %v2608_v16, %s4550_s28  ;;  %v1036_v16 = vrot.slane %v4807_v45, %v4928_v54 }
0x288a   :  { %v2579_v13 = vcombine.high %v2578_v42, %v2578_v42  ;;  %v2586_v14 = vrot.slane %v2578_v42, %v4928_v54  ;;  %v379_v42 = vrot.slane %v366_v6, %v4659_v21 }
0x288c   :  { %v2593_v17 = vrot.slane %v2579_v13, %v4928_v54  ;;  %v2597_v63 = vrot.slane %v2586_v14, %v4659_v21  ;;  %v527_v14 = vcombine.high %v526_v37, %v526_v37 }
0x288e   :  { %v2601_v4 = vrot.slane %v2593_v17, %v4659_v21  ;;  %v2604_v2 = vsel %vm1368_vm8, %v2597_v63, 0.0  ;;  %v1044_v17 = vrot.slane %v1036_v16, %v4928_v54  ;;  %v386_v63 = vsel %vm350_vm3, %v379_v42, 0.0 }
0x288f   :  { %v5066_v18 = vadd.f32 %v2604_v2, %v2460_v24 }
0x2890   :  { %v2605_v22 = vsel %vm1368_vm8, %v2601_v4, 0.0 }
0x2891   :  { %v5070_v23 = vadd.f32 %v2605_v22, %v2461_v41  ;;  %v698_v41 = vrot.slane %v4767_v30, %v4928_v54  ;;  %v1204_v30 = vrot.slane %v4828_v28, %v4928_v54  ;;  %v1384_v28 = vrot.slane %v1376_v31, %v4928_v54 }
0x2892   :  { %v541_v22 = vrot.slane %v527_v14, %v4928_v54 }
0x2893   :  { %v706_v48 = vrot.slane %v698_v41, %v4928_v54  ;;  %v1212_v53 = vrot.slane %v1204_v30, %v4928_v54  ;;  %v1397_v61 = vrot.slane %v1384_v28, %v4659_v21  ;;  %v699_v60 = vcombine.high %v698_v41, %v698_v41 }
0x2894   :  { %v359_v28 = vcombine.high %v358_v11, %v358_v11 }
0x2895   :  { %v719_v52 = vrot.slane %v706_v48, %v4659_v21  ;;  %v1225_v58 = vrot.slane %v1212_v53, %v4659_v21  ;;  %v1404_v0 = vsel %vm1368_vm8, %v1397_v61, 0.0 }
0x2896   :  { %v373_v5 = vrot.slane %v359_v28, %v4928_v54 }
0x2897   :  { %v726_v15 = vsel %vm690_vm4, %v719_v52, 0.0  ;;  %v1232_v59 = vsel %vm1196_vm7, %v1225_v58, 0.0 }
0x28fa   :  { %v2610_v25 = vpop.permute.xlu1 %2609 }
0x28fb   :  { %4171 = vmatmul.mubr.msk.f32.vlgmr.msra.gmra.mrb[16].mxu1 %vm57_vm0, %v2610_v25 }
0x29ce   :  { %v2679_v29 = vpop.f32.mrb[16].mxu1 }
0x29cf   :  { %v2693_v32 = vadd.f32 %v2679_v29, %v4900_v9  ;;  %v4172_v33 = vpop.f32.mrb[17].mxu1  ;;  %v2684_v27 = vrot.slane %v2679_v29, 2  ;;  %v534_v9 = vrot.slane %v526_v37, %v4928_v54 }
0x29d1   :  { %v2695_v34 = vrot.slane %v2693_v32, 2  ;;  %v2686_v35 = vadd.f32 %v2684_v27, %v4726_v1  ;;  %v547_v50 = vrot.slane %v534_v9, %v4659_v21  ;;  %v871_v32 = vcombine.high %v870_v49, %v870_v49 }
0x29d2   :  { %v713_v27 = vrot.slane %v699_v60, %v4928_v54  ;;  %v1377_v9 = vcombine.high %v1376_v31, %v1376_v31  ;;  %v1549_v49 = vcombine.high %v1548_v55, %v1548_v55 }
0x29d3   :  { %2696 = vrot.lane.b32.xlu0 %v2695_v34, %s4545_s11  ;;  %v3858_v38 = vmul.f32 -1.442695, %v2686_v35  ;;  %v554_v51 = vsel %vm518_vm2, %v547_v50, 0.0  ;;  %v551_v34 = vrot.slane %v541_v22, %v4659_v21  ;;  %v885_v41 = vrot.slane %v871_v32, %v4928_v54 }
0x29d4   :  { %v723_v37 = vrot.slane %v713_v27, %v4659_v21  ;;  %v1563_v53 = vrot.slane %v1549_v49, %v4928_v54 }
0x29d5   :  { %4468 = vpow2.f32 %v3858_v38 }
0x29df   :  { %v4469_v39 = vpop.eup %4468 }
0x29e0   :  { %v2690_v24 = vadd.f32 1.0, %v4469_v39  ;;  %v1205_v39 = vcombine.high %v1204_v30, %v1204_v30  ;;  %v1391_v30 = vrot.slane %v1377_v9, %v4928_v54 }
0x29e2   :  { %4470 = vrcp.f32 %v2690_v24  ;;  %v555_v24 = vsel %vm518_vm2, %v551_v34, 0.0  ;;  %v1219_v48 = vrot.slane %v1205_v39, %v4928_v54  ;;  %v1401_v52 = vrot.slane %v1391_v30, %v4659_v21 }
0x29e3   :  { %vm3199_vm2 = vcmask 1046534  }
0x29e4   :  { %v1229_v46 = vrot.slane %v1219_v48, %v4659_v21  ;;  %v1405_v31 = vsel %vm1368_vm8, %v1401_v52, 0.0 }
0x29ec   :  { %v5081_v43 = vpop.eup %4470 }
0x29ed   :  { %v2706_v55 = vsub.f32 1.0, %v5081_v43 }
0x2a45   :  { %v2697_v44 = vpop.permute.xlu0 %2696 }
0x2a46   :  { %v2699_v47 = vmul.f32 %v5081_v43, %v2697_v44  ;;  %v727_v44 = vsel %vm690_vm4, %v723_v37, 0.0  ;;  %vm3214_vm4 = vcmask 64512  }
0x2a48   :  { %2701 = vrot.lane.b32.xlu1 %v2699_v47, %s4545_s11  ;;  %v895_v47 = vrot.slane %v885_v41, %v4659_v21 }
0x2a4a   :  { %v899_v50 = vsel %vm862_vm5, %v895_v47, 0.0 }
0x2a4c   :  { %558 = vrot.lane.b32.xlu1 %v554_v51, %s4553_s0  ;;  %v1233_v51 = vsel %vm1196_vm7, %v1229_v46, 0.0  ;;  %vm3365_vm7 = vcmask 523520  }
0x2a50   :  { %730 = vrot.lane.b32.xlu1 %v726_v15, %s4553_s0  ;;  %v1573_v15 = vrot.slane %v1563_v53, %v4659_v21 }
0x2a52   :  { %v1577_v19 = vsel %vm1540_vm9, %v1573_v15, 0.0 }
0x2a54   :  { %902 = vrot.lane.b32.xlu1 %v898_v57, %s4553_s0  ;;  %v2712_v57 = vrot.slane %v5052_v20, 6 }
0x2a58   :  { %1236 = vrot.lane.b32.xlu1 %v1232_v59, %s4553_s0  ;;  %v2714_v59 = vmul.f32 %v5081_v43, %v2712_v57 }
0x2a5c   :  { %1408 = vrot.lane.b32.xlu1 %v1404_v0, %s4553_s0  ;;  %v1037_v0 = vcombine.high %v1036_v16, %v1036_v16 }
0x2a60   :  { %1580 = vrot.lane.b32.xlu1 %v1576_v7, %s4553_s0  ;;  %v383_v7 = vrot.slane %v373_v5, %v4659_v21 }
0x2a62   :  { %v387_v42 = vsel %vm350_vm3, %v383_v7, 0.0  ;;  %vm3201_vm3 = vcmask 1047559  }
0x2aba   :  { %v2702_v40 = vpop.permute.xlu1 %2701 }
0x2abb   :  { %v2704_v12 = vadd.f32 %v2702_v40, %v4726_v1  ;;  %v1057_v1 = vrot.slane %v1044_v17, %v4659_v21 }
0x2abd   :  { %4472 = vtanh.f32 %v2704_v12  ;;  %v1064_v35 = vsel %vm1028_vm6, %v1057_v1, 0.0  ;;  %v1051_v12 = vrot.slane %v1037_v0, %v4928_v54 }
0x2abe   :  { %v559_v13 = vpop.permute.xlu1 %558 }
0x2abf   :  { %v564_v2 = vadd.f32 %v559_v13, %v386_v63  ;;  %v1061_v17 = vrot.slane %v1051_v12, %v4659_v21 }
0x2ac2   :  { %v731_v4 = vpop.permute.xlu1 %730 }
0x2ac3   :  { %v736_v25 = vadd.f32 %v731_v4, %v564_v2 }
0x2ac6   :  { %v903_v29 = vpop.permute.xlu1 %902 }
0x2ac7   :  { %v4473_v45 = vpop.eup %4472  ;;  %v908_v33 = vadd.f32 %v903_v29, %v736_v25 }
0x2ac8   :  { %2708 = vrot.lane.b32.xlu0 %v4473_v45, %s4550_s28  ;;  %v1065_v45 = vsel %vm1028_vm6, %v1061_v17, 0.0 }
0x2ac9   :  { %v1066_v38 = vadd.f32 %v1064_v35, %v908_v33 }
0x2aca   :  { %v1237_v11 = vpop.permute.xlu1 %1236 }
0x2acb   :  { %v1242_v39 = vadd.f32 %v1237_v11, %v1066_v38 }
0x2acc   :  { %560 = vrot.lane.b32.xlu0 %v555_v24, %s4553_s0 }
0x2ace   :  { %v1409_v2 = vpop.permute.xlu1 %1408 }
0x2acf   :  { %v1414_v47 = vadd.f32 %v1409_v2, %v1242_v39 }
0x2ad0   :  { %732 = vrot.lane.b32.xlu0 %v727_v44, %s4553_s0 }
0x2ad2   :  { %v1581_v37 = vpop.permute.xlu1 %1580 }
0x2ad4   :  { %904 = vrot.lane.b32.xlu0 %v899_v50, %s4553_s0  ;;  %v5204_v50 = vadd.f32 %v1581_v37, %v1414_v47 }
0x2ad8   :  { %1238 = vrot.lane.b32.xlu0 %v1233_v51, %s4553_s0 }
0x2adc   :  { %1410 = vrot.lane.b32.xlu0 %v1405_v31, %s4553_s0 }
0x2ae0   :  { %1582 = vrot.lane.b32.xlu0 %v1577_v19, %s4553_s0 }
0x2b3a   :  { %v2709_v58 = vpop.permute.xlu0 %2708 }
0x2b3b   :  { %v2711_v61 = vmul.f32 %v2709_v58, %v2706_v55 }
0x2b3d   :  { %v5171_v56 = vadd.f32 %v2714_v59, %v2711_v61 }
0x2b3e   :  { %v561_v40 = vpop.permute.xlu0 %560 }
0x2b3f   :  { %v2717_v6 = vcombine.high %v5171_v56, %v5171_v56  ;;  %v565_v14 = vadd.f32 %v561_v40, %v387_v42 }
0x2b41   :  { %v2724_v20 = vrot.slane %v2717_v6, %v4928_v54 }
0x2b42   :  { %v733_v13 = vpop.permute.xlu0 %732 }
0x2b43   :  { %v2725_v43 = vcombine.high %v2724_v20, %v2724_v20  ;;  %v2732_v16 = vrot.slane %v2724_v20, %v4928_v54  ;;  %v737_v60 = vadd.f32 %v733_v13, %v565_v14 }
0x2b45   :  { %v2739_v63 = vrot.slane %v2725_v43, %v4928_v54  ;;  %v2740_v4 = vcombine.high %v2732_v16, %v2732_v16 }
0x2b46   :  { %v905_v22 = vpop.permute.xlu0 %904 }
0x2b47   :  { %v2741_v1 = vcombine.high %v2739_v63, %v2739_v63  ;;  %v2745_v25 = vrot.slane %v2740_v4, %v4659_v21  ;;  %v909_v29 = vadd.f32 %v905_v22, %v737_v60 }
0x2b49   :  { %v2749_v32 = vrot.slane %v2741_v1, %v4659_v21  ;;  %v2752_v33 = vsel %vm1540_vm9, %v2745_v25, 0.0  ;;  %v1067_v34 = vadd.f32 %v1065_v45, %v909_v29 }
0x2b4a   :  { %v5190_v27 = vadd.f32 %v2752_v33, %v5066_v18  ;;  %v1239_v35 = vpop.permute.xlu0 %1238 }
0x2b4b   :  { %v2753_v24 = vsel %vm1540_vm9, %v2749_v32, 0.0  ;;  %v1243_v46 = vadd.f32 %v1239_v35, %v1067_v34 }
0x2b4c   :  { %v5195_v41 = vadd.f32 %v2753_v24, %v5070_v23  ;;  %v2770_v9 = vrot.slane %v5190_v27, %v4928_v54  ;;  %v2763_v44 = vcombine.high %v5190_v27, %v5190_v27 }
0x2b4e   :  { %v1411_v48 = vpop.permute.xlu0 %1410  ;;  %v2786_v18 = vrot.slane %v2770_v9, %v4928_v54  ;;  %v2778_v49 = vcombine.high %v2770_v9, %v2770_v9  ;;  %v2819_v38 = vrot.slane %v5195_v41, %v4928_v54  ;;  %v2777_v23 = vrot.slane %v2763_v44, %v4928_v54 }
0x2b4f   :  { %v1415_v31 = vadd.f32 %v1411_v48, %v1243_v46  ;;  %v2812_v58 = vcombine.high %v5195_v41, %v5195_v41 }
0x2b50   :  { %v2864_v30 = vrot.slane %v2786_v18, %v4659_v21  ;;  %v2800_v51 = vrot.slane %v2778_v49, %v4928_v54  ;;  %v2808_v52 = vcombine.high %v2786_v18, %v2786_v18  ;;  %v2835_v53 = vrot.slane %v2819_v38, %v4928_v54 }
0x2b51   :  { %v2827_v15 = vcombine.high %v2819_v38, %v2819_v38  ;;  %v2793_v7 = vrot.slane %v2777_v23, %v4928_v54  ;;  %v2826_v12 = vrot.slane %v2812_v58, %v4928_v54  ;;  %v2779_v43 = vcombine.high %v2777_v23, %v2777_v23 }
0x2b52   :  { %v1583_v19 = vpop.permute.xlu0 %1582  ;;  %v2941_v28 = vmul.f32 %v2864_v30, %v5204_v50  ;;  %v2868_v55 = vrot.slane %v2800_v51, %v4659_v21  ;;  %v2872_v57 = vrot.slane %v2808_v52, %v4659_v21  ;;  %v2896_v0 = vrot.slane %v2835_v53, %v4659_v21 }
0x2b53   :  { %v2849_v5 = vrot.slane %v2827_v15, %v4928_v54  ;;  %v5216_v59 = vadd.f32 %v1583_v19, %v1415_v31  ;;  %v2857_v11 = vcombine.high %v2835_v53, %v2835_v53  ;;  %v2810_v20 = vcombine.high %v2800_v51, %v2800_v51 }
0x2b54   :  { %2973 = vrot.lane.b32.xlu1 %v2941_v28, %s4550_s28  ;;  %v2942_v61 = vmul.f32 %v2868_v55, %v5204_v50  ;;  %v2943_v40 = vmul.f32 %v2872_v57, %v5204_v50  ;;  %v2880_v13 = vrot.slane %v2793_v7, %v4659_v21  ;;  %v2842_v17 = vrot.slane %v2826_v12, %v4928_v54 }
0x2b55   :  { %v2900_v6 = vrot.slane %v2849_v5, %v4659_v21  ;;  %v2949_v42 = vmul.f32 %v2896_v0, %v5216_v59  ;;  %v2904_v14 = vrot.slane %v2857_v11, %v4659_v21  ;;  %v2876_v4 = vrot.slane %v2810_v20, %v4659_v21 }
0x2b56   :  { %2975 = vrot.lane.b32.xlu0 %v2942_v61, %s4550_s28  ;;  %v2945_v63 = vmul.f32 %v2880_v13, %v5204_v50  ;;  %v2807_v60 = vrot.slane %v2779_v43, %v4928_v54  ;;  %v2912_v22 = vrot.slane %v2842_v17, %v4659_v21  ;;  %v2859_v1 = vcombine.high %v2849_v5, %v2849_v5 }
0x2b57   :  { %v2950_v16 = vmul.f32 %v2900_v6, %v5216_v59  ;;  %v2951_v2 = vmul.f32 %v2904_v14, %v5216_v59  ;;  %v2828_v25 = vcombine.high %v2826_v12, %v2826_v12  ;;  %v2944_v29 = vmul.f32 %v2876_v4, %v5204_v50 }
0x2b58   :  { %2977 = vrot.lane.b32.xlu1 %v2943_v40, %s4550_s28  ;;  %v2884_v45 = vrot.slane %v2807_v60, %v4659_v21  ;;  %v2809_v32 = vcombine.high %v2793_v7, %v2793_v7  ;;  %v2953_v33 = vmul.f32 %v2912_v22, %v5216_v59  ;;  %v2908_v34 = vrot.slane %v2859_v1, %v4659_v21 }
0x2b59   :  { %v2856_v35 = vrot.slane %v2828_v25, %v4928_v54  ;;  %v2811_v37 = vcombine.high %v2807_v60, %v2807_v60  ;;  %v2858_v47 = vcombine.high %v2842_v17, %v2842_v17 }
0x2b5a   :  { %2989 = vrot.lane.b32.xlu0 %v2949_v42, %s4550_s28  ;;  %v2946_v39 = vmul.f32 %v2884_v45, %v5204_v50  ;;  %v2888_v24 = vrot.slane %v2809_v32, %v4659_v21  ;;  %v2952_v9 = vmul.f32 %v2908_v34, %v5216_v59 }
0x2b5b   :  { %v2916_v44 = vrot.slane %v2856_v35, %v4659_v21  ;;  %v2892_v18 = vrot.slane %v2811_v37, %v4659_v21  ;;  %v2860_v49 = vcombine.high %v2856_v35, %v2856_v35  ;;  %v2920_v46 = vrot.slane %v2858_v47, %v4659_v21 }
0x2b5c   :  { %2991 = vrot.lane.b32.xlu1 %v2950_v16, %s4550_s28  ;;  %v2947_v48 = vmul.f32 %v2888_v24, %v5204_v50 }
0x2b5d   :  { %v2954_v38 = vmul.f32 %v2916_v44, %v5216_v59  ;;  %v2948_v23 = vmul.f32 %v2892_v18, %v5204_v50  ;;  %v2924_v30 = vrot.slane %v2860_v49, %v4659_v21  ;;  %v2955_v51 = vmul.f32 %v2920_v46, %v5216_v59 }
0x2b5e   :  { %2981 = vrot.lane.b32.xlu0 %v2945_v63, %s4550_s28 }
0x2b5f   :  { %v2956_v52 = vmul.f32 %v2924_v30, %v5216_v59 }
0x2b60   :  { %2993 = vrot.lane.b32.xlu1 %v2951_v2, %s4550_s28 }
0x2b62   :  { %2979 = vrot.lane.b32.xlu0 %v2944_v29, %s4550_s28 }
0x2b64   :  { %2997 = vrot.lane.b32.xlu1 %v2953_v33, %s4550_s28 }
0x2b66   :  { %2983 = vrot.lane.b32.xlu0 %v2946_v39, %s4550_s28  ;;  %v4496_v39 = vld.sshfl [vmem:[%s5467_s3] sm:$0x11 pattern:$0x75316420] }
0x2b67   :  { %v3083_v44 = vrot.slane %v4496_v39, %v4928_v54  ;;  %v3076_v18 = vcombine.high %v4496_v39, %v4496_v39 }
0x2b68   :  { %2995 = vrot.lane.b32.xlu1 %v2952_v9, %s4550_s28  ;;  %v5287_v9 = vand.u32 127, %v53_v3 }
0x2b69   :  { %vm3093_vm10 = vcmp.gt.f32.partialorder %v3083_v44, 0.5 }
0x2b6a   :  { %2985 = vrot.lane.b32.xlu0 %v2947_v48, %s4550_s28  ;;  %v3127_v49 = vsub.s32 %v5287_v9, %v4611_v8  ;;  %vm3767_vm8 = vcmp.lt.s32.totalorder %v5287_v9, 64 }
0x2b6c   :  { %2999 = vrot.lane.b32.xlu1 %v2954_v38, %s4550_s28 }
0x2b6e   :  { %2987 = vrot.lane.b32.xlu0 %v2948_v23, %s4550_s28 }
0x2b70   :  { %3001 = vrot.lane.b32.xlu1 %v2955_v51, %s4550_s28  ;;  %v3090_v51 = vrot.slane %v3076_v18, %v4928_v54 }
0x2b72   :  { %3003 = vrot.lane.b32.xlu0 %v2956_v52, %s4550_s28  ;;  %vm3094_vm1 = vcmp.gt.f32.partialorder %v3090_v51, 0.5 }
0x2bc6   :  { %v2974_v53 = vpop.permute.xlu1 %2973 }
0x2bc7   :  { %v3021_v31 = vsel %vm57_vm0, %v2974_v53, 0.0  ;;  %v3095_v53 = vsel %vm3093_vm10, 1, %v4549_v26 }
0x2bc8   :  { %v2976_v15 = vpop.permute.xlu0 %2975  ;;  %3022 = vadd.xlane.f32.xlu1 %v3021_v31 }
0x2bc9   :  { %v3024_v19 = vsel %vm57_vm0, %v2976_v15, 0.0 }
0x2bca   :  { %v2978_v28 = vpop.permute.xlu1 %2977  ;;  %3025 = vadd.xlane.f32.xlu0 %v3024_v19 }
0x2bcb   :  { %v3027_v57 = vsel %vm57_vm0, %v2978_v28, 0.0 }
0x2bcc   :  { %v2990_v55 = vpop.permute.xlu0 %2989 }
0x2bcd   :  { %v3045_v58 = vsel %vm57_vm0, %v2990_v55, 0.0 }
0x2bce   :  { %v2992_v5 = vpop.permute.xlu1 %2991  ;;  %3046 = vadd.xlane.f32.xlu1 %v3045_v58  ;;  %3028 = vadd.xlane.f32.xlu0 %v3027_v57 }
0x2bcf   :  { %v3048_v0 = vsel %vm57_vm0, %v2992_v5, 0.0  ;;  %v3100_v5 = vrot.slane %v3095_v53, %v4659_v21 }
0x2bd0   :  { %v2982_v61 = vpop.permute.xlu0 %2981 }
0x2bd1   :  { %v3033_v7 = vsel %vm57_vm0, %v2982_v61, 0.0  ;;  %vm3105_vm5 = vcmp.eq.s32.totalorder %v3100_v5, 1 }
0x2bd2   :  { %v2994_v40 = vpop.permute.xlu1 %2993  ;;  %3034 = vadd.xlane.f32.xlu1 %v3033_v7  ;;  %3049 = vadd.xlane.f32.xlu0 %v3048_v0 }
0x2bd3   :  { %v3051_v11 = vsel %vm57_vm0, %v2994_v40, 0.0 }
0x2bd4   :  { %v2980_v6 = vpop.permute.xlu0 %2979 }
0x2bd5   :  { %v3030_v12 = vsel %vm57_vm0, %v2980_v6, 0.0  ;;  %v3096_v6 = vsel %vm3094_vm1, 1, %v4549_v26 }
0x2bd6   :  { %v2998_v20 = vpop.permute.xlu1 %2997  ;;  %3031 = vadd.xlane.f32.xlu1 %v3030_v12  ;;  %3052 = vadd.xlane.f32.xlu0 %v3051_v11  ;;  %v3104_v26 = vrot.slane %v3096_v6, %v4659_v21 }
0x2bd7   :  { %v3057_v13 = vsel %vm57_vm0, %v2998_v20, 0.0 }
0x2bd8   :  { %v2984_v42 = vpop.permute.xlu0 %2983  ;;  %vm3106_vm6 = vcmp.eq.s32.totalorder %v3104_v26, 1 }
0x2bd9   :  { %v3036_v43 = vsel %vm57_vm0, %v2984_v42, 0.0 }
0x2bda   :  { %v2996_v16 = vpop.permute.xlu1 %2995  ;;  %3037 = vadd.xlane.f32.xlu1 %v3036_v43  ;;  %3058 = vadd.xlane.f32.xlu0 %v3057_v13 }
0x2bdb   :  { %v3054_v17 = vsel %vm57_vm0, %v2996_v16, 0.0 }
0x2bdc   :  { %v2986_v14 = vpop.permute.xlu0 %2985 }
0x2bdd   :  { %v3039_v63 = vsel %vm57_vm0, %v2986_v14, 0.0 }
0x2bde   :  { %3040 = vadd.xlane.f32.xlu1 %v3039_v63  ;;  %v3000_v4 = vpop.permute.xlu1 %2999  ;;  %3055 = vadd.xlane.f32.xlu0 %v3054_v17 }
0x2bdf   :  { %v3060_v2 = vsel %vm57_vm0, %v3000_v4, 0.0 }
0x2be0   :  { %v2988_v60 = vpop.permute.xlu0 %2987 }
0x2be1   :  { %v3042_v22 = vsel %vm57_vm0, %v2988_v60, 0.0 }
0x2be2   :  { %3043 = vadd.xlane.f32.xlu1 %v3042_v22  ;;  %v3002_v1 = vpop.permute.xlu1 %3001  ;;  %3061 = vadd.xlane.f32.xlu0 %v3060_v2 }
0x2be3   :  { %v3063_v29 = vsel %vm57_vm0, %v3002_v1, 0.0 }
0x2be4   :  { %v3004_v25 = vpop.permute.xlu0 %3003 }
0x2be5   :  { %v3066_v45 = vsel %vm57_vm0, %v3004_v25, 0.0 }
0x2be6   :  { %3064 = vadd.xlane.f32.xlu0 %v3063_v29  ;;  %3067 = vadd.xlane.f32.xlu1 %v3066_v45 }
0x2c55   :  { %v3023_v32 = vpop.xlane.xlu1 %3022 }
0x2c56   :  { %v3128_v52 = vrot.slane %v3023_v32, %v3127_v49 }
0x2c57   :  { %v3026_v33 = vpop.xlane.xlu0 %3025 }
0x2c58   :  { %v3132_v38 = vrot.slane %v3026_v33, %v3127_v49 }
0x2c5a   :  { %v3190_v31 = vsel %vm3189_vm11, %v3132_v38, %v3128_v52 }
0x2c5b   :  { %v3047_v34 = vpop.xlane.xlu1 %3046  ;;  %v3029_v35 = vpop.xlane.xlu0 %3028 }
0x2c5c   :  { %v3136_v46 = vrot.slane %v3029_v35, %v3127_v49  ;;  %v3160_v61 = vrot.slane %v3047_v34, %v3127_v49 }
0x2c5e   :  { %v3192_v15 = vsel %vm3191_vm12, %v3136_v46, %v3190_v31 }
0x2c5f   :  { %v3035_v24 = vpop.xlane.xlu1 %3034  ;;  %v3050_v37 = vpop.xlane.xlu0 %3049 }
0x2c60   :  { %v3164_v19 = vrot.slane %v3050_v37, %v3127_v49  ;;  %v3144_v0 = vrot.slane %v3035_v24, %v3127_v49 }
0x2c62   :  { %v3203_v11 = vsel %vm3189_vm11, %v3164_v19, %v3160_v61  ;;  %v5325_v61 = vsub.s32 5, %v4611_v8 }
0x2c63   :  { %v3032_v47 = vpop.xlane.xlu1 %3031  ;;  %v3053_v48 = vpop.xlane.xlu0 %3052 }
0x2c64   :  { %v3140_v3 = vrot.slane %v3032_v47, %v3127_v49  ;;  %v3168_v58 = vrot.slane %v3053_v48, %v3127_v49 }
0x2c66   :  { %v3194_v57 = vsel %vm3193_vm13, %v3140_v3, %v3192_v15  ;;  %v3204_v13 = vsel %vm3191_vm12, %v3168_v58, %v3203_v11  ;;  %v5320_v58 = vsub.s32 4, %v4611_v8 }
0x2c67   :  { %v3038_v23 = vpop.xlane.xlu1 %3037  ;;  %v3059_v30 = vpop.xlane.xlu0 %3058  ;;  %v3196_v12 = vsel %vm3195_vm14, %v3144_v0, %v3194_v57 }
0x2c68   :  { %v3148_v54 = vrot.slane %v3038_v23, %v3127_v49  ;;  %v3176_v4 = vrot.slane %v3059_v30, %v3127_v49 }
0x2c6a   :  { %v3198_v43 = vsel %vm3197_vm15, %v3148_v54, %v3196_v12 }
0x2c6b   :  { %v3041_v28 = vpop.xlane.xlu1 %3040  ;;  %v3056_v55 = vpop.xlane.xlu0 %3055 }
0x2c6c   :  { %v3152_v7 = vrot.slane %v3041_v28, %v3127_v49  ;;  %v3172_v40 = vrot.slane %v3056_v55, %v3127_v49 }
0x2c6e   :  { %v3200_v14 = vsel %vm3199_vm2, %v3152_v7, %v3198_v43  ;;  %v3205_v17 = vsel %vm3193_vm13, %v3172_v40, %v3204_v13  ;;  %v3281_v40 = vsub.s32 6, %v4611_v8 }
0x2c6f   :  { %v3044_v20 = vpop.xlane.xlu1 %3043  ;;  %v3062_v42 = vpop.xlane.xlu0 %3061  ;;  %v3206_v25 = vsel %vm3195_vm14, %v3176_v4, %v3205_v17 }
0x2c70   :  { %v3156_v16 = vrot.slane %v3044_v20, %v3127_v49  ;;  %v3180_v63 = vrot.slane %v3062_v42, %v3127_v49  ;;  %v3288_v20 = vsub.s32 7, %v4611_v8 }
0x2c72   :  { %v3202_v60 = vsel %vm3201_vm3, %v3156_v16, %v3200_v14  ;;  %v3207_v33 = vsel %vm3197_vm15, %v3180_v63, %v3206_v25 }
0x2c73   :  { %v3068_v2 = vpop.xlane.xlu1 %3067  ;;  %v3065_v22 = vpop.xlane.xlu0 %3064  ;;  %v3212_v1 = vsel %vm3105_vm5, %v3202_v60, -1e+30 }
0x2c74   :  { %v3188_v29 = vrot.slane %v3068_v2, %v3127_v49  ;;  %v3184_v45 = vrot.slane %v3065_v22, %v3127_v49  ;;  %v3215_v32 = vsel %vm3214_vm4, %v3212_v1, -inf }
0x2c75   :  { %3216 = vmax.xlane.f32.xlu0 %v3215_v32 }
0x2c76   :  { %v3208_v34 = vsel %vm3199_vm2, %v3184_v45, %v3207_v33 }
0x2c77   :  { %v3209_v35 = vsel %vm3201_vm3, %v3188_v29, %v3208_v34 }
0x2c78   :  { %v3213_v39 = vsel %vm3106_vm6, %v3209_v35, -1e+30 }
0x2c79   :  { %v3218_v24 = vsel %vm3214_vm4, %v3213_v39, -inf }
0x2c7a   :  { %3219 = vmax.xlane.f32.xlu1 %v3218_v24 }
0x2d02   :  { %v3217_v37 = vpop.xlane.xlu0 %3216 }
0x2d03   :  { %v3221_v44 = vsub.f32 %v3212_v1, %v3217_v37 }
0x2d05   :  { %v3223_v47 = vmul.f32 1.442695, %v3221_v44 }
0x2d07   :  { %4474 = vpow2.f32 %v3223_v47  ;;  %v3220_v48 = vpop.xlane.xlu1 %3219 }
0x2d08   :  { %v3222_v18 = vsub.f32 %v3213_v39, %v3220_v48 }
0x2d0a   :  { %v3225_v49 = vmul.f32 1.442695, %v3222_v18 }
0x2d0c   :  { %4476 = vpow2.f32 %v3225_v49 }
0x2d11   :  { %v4475_v38 = vpop.eup %4474 }
0x2d12   :  { %v3227_v46 = vsel %vm3214_vm4, %v4475_v38, 0.0 }
0x2d13   :  { %3228 = vadd.xlane.f32.xlu0 %v3227_v46 }
0x2d16   :  { %v4477_v23 = vpop.eup %4476 }
0x2d17   :  { %v3230_v30 = vsel %vm3214_vm4, %v4477_v23, 0.0 }
0x2d18   :  { %3231 = vadd.xlane.f32.xlu1 %v3230_v30 }
0x2da0   :  { %v3229_v51 = vpop.xlane.xlu0 %3228 }
0x2da1   :  { %4478 = vrcp.f32 %v3229_v51 }
0x2da5   :  { %v3232_v52 = vpop.xlane.xlu1 %3231 }
0x2da6   :  { %4480 = vrcp.f32 %v3232_v52 }
0x2dab   :  { %v4479_v3 = vpop.eup %4478 }
0x2dac   :  { %v3234_v53 = vmul.f32 %v4479_v3, %v4475_v38 }
0x2dae   :  { %v3247_v31 = vrot.slane %v3234_v53, %v4619_v10  ;;  %v3240_v15 = vrot.slane %v3234_v53, %v4659_v21  ;;  %v3254_v55 = vrot.slane %v3234_v53, %v4719_v62  ;;  %v3261_v57 = vrot.slane %v3234_v53, %v4884_v36 }
0x2daf   :  { %v3268_v5 = vrot.slane %v3234_v53, %v5320_v58  ;;  %v3275_v7 = vrot.slane %v3234_v53, %v5325_v61  ;;  %v3282_v11 = vrot.slane %v3234_v53, %v3281_v40  ;;  %v3289_v42 = vrot.slane %v3234_v53, %v3288_v20 }
0x2db0   :  { %v4481_v19 = vpop.eup %4480  ;;  %3249 = vbcast.lane.b32.xlu1 %v3247_v31, 256  ;;  %3242 = vbcast.lane.b32.xlu0 %v3240_v15, 256 }
0x2db1   :  { %v3236_v28 = vmul.f32 %v4481_v19, %v4477_v23 }
0x2db3   :  { %v3303_v54 = vrot.slane %v3236_v28, %v4619_v10  ;;  %v3310_v0 = vrot.slane %v3236_v28, %v4719_v62  ;;  %v3317_v6 = vrot.slane %v3236_v28, %v4884_v36  ;;  %v3324_v10 = vrot.slane %v3236_v28, %v5320_v58  ;;  %v41_v36 = vld [vmem:[%s5465_s1 + $0xa0] sm:$0xff] }
0x2db4   :  { %3256 = vbcast.lane.b32.xlu1 %v3254_v55, 256  ;;  %3263 = vbcast.lane.b32.xlu0 %v3261_v57, 256  ;;  %v3296_v12 = vrot.slane %v3236_v28, %v4659_v21  ;;  %v3331_v62 = vrot.slane %v3236_v28, %v5325_v61  ;;  %v3338_v13 = vrot.slane %v3236_v28, %v3281_v40  ;;  %v42_v21 = vld [vmem:[%s5465_s1 + $0xa8] sm:$0xff] }
0x2db5   :  { %v3345_v43 = vrot.slane %v3236_v28, %v3288_v20  ;;  %v4318_v8 = vpack.c.bf16 %v42_v21, %v41_v36 }
0x2db7   :  { %4319 = vmatprep.subr.bf16.mxu0 %v4318_v8 }
0x2db8   :  { %3305 = vbcast.lane.b32.xlu1 %v3303_v54, 256  ;;  %3270 = vbcast.lane.b32.xlu0 %v3268_v5, 256 }
0x2db9   :  { %4321 = vmatpush3.bf16.msra.mxu0 %v4318_v8 }
0x2dbc   :  { %3312 = vbcast.lane.b32.xlu1 %v3310_v0, 256  ;;  %3277 = vbcast.lane.b32.xlu0 %v3275_v7, 256 }
0x2dc0   :  { %3319 = vbcast.lane.b32.xlu1 %v3317_v6, 256  ;;  %3284 = vbcast.lane.b32.xlu0 %v3282_v11, 256 }
0x2dc4   :  { %3326 = vbcast.lane.b32.xlu1 %v3324_v10, 256  ;;  %3298 = vbcast.lane.b32.xlu0 %v3296_v12, 256 }
0x2dc8   :  { %3333 = vbcast.lane.b32.xlu1 %v3331_v62, 256  ;;  %3291 = vbcast.lane.b32.xlu0 %v3289_v42, 256 }
0x2dcc   :  { %3340 = vbcast.lane.b32.xlu1 %v3338_v13, 256  ;;  %3347 = vbcast.lane.b32.xlu0 %v3345_v43, 256 }
0x2e22   :  { %v3250_v16 = vpop.permute.xlu1 %3249  ;;  %v3243_v14 = vpop.permute.xlu0 %3242 }
0x2e23   :  { %v3350_v17 = vmul.f32 %v3250_v16, %v5204_v50  ;;  %v3349_v63 = vmul.f32 %v3243_v14, %v5204_v50 }
0x2e25   :  { %v3373_v26 = vsel %vm3365_vm7, %v3350_v17, 0.0  ;;  %v3366_v4 = vsel %vm3365_vm7, %v3349_v63, 0.0 }
0x2e26   :  { %v3374_v60 = vrot.slane %v3373_v26, 4  ;;  %v3367_v2 = vrot.slane %v3366_v4, 4  ;;  %v3257_v22 = vpop.permute.xlu1 %3256  ;;  %v3264_v1 = vpop.permute.xlu0 %3263 }
0x2e27   :  { %v3351_v25 = vmul.f32 %v3257_v22, %v5204_v50  ;;  %v3352_v29 = vmul.f32 %v3264_v1, %v5204_v50 }
0x2e28   :  { %v3375_v45 = vadd.f32 %v3374_v60, %v3373_v26  ;;  %v3368_v32 = vadd.f32 %v3367_v2, %v3366_v4 }
0x2e29   :  { %v3380_v33 = vsel %vm3365_vm7, %v3351_v25, 0.0  ;;  %v3387_v34 = vsel %vm3365_vm7, %v3352_v29, 0.0 }
0x2e2a   :  { %v3376_v35 = vrot.slane %v3375_v45, 2  ;;  %v3369_v39 = vrot.slane %v3368_v32, 2  ;;  %v3381_v24 = vrot.slane %v3380_v33, 4  ;;  %v3388_v37 = vrot.slane %v3387_v34, 4  ;;  %v3306_v44 = vpop.permute.xlu1 %3305  ;;  %v3271_v47 = vpop.permute.xlu0 %3270 }
0x2e2b   :  { %v3358_v48 = vmul.f32 %v3306_v44, %v5216_v59  ;;  %v3353_v18 = vmul.f32 %v3271_v47, %v5204_v50 }
0x2e2c   :  { %v3377_v49 = vadd.f32 %v3376_v35, %v3375_v45  ;;  %v3370_v38 = vadd.f32 %v3369_v39, %v3368_v32  ;;  %v3382_v46 = vadd.f32 %v3381_v24, %v3380_v33  ;;  %v3389_v23 = vadd.f32 %v3388_v37, %v3387_v34 }
0x2e2d   :  { %v3429_v30 = vsel %vm3365_vm7, %v3358_v48, 0.0  ;;  %v3394_v51 = vsel %vm3365_vm7, %v3353_v18, 0.0 }
0x2e2e   :  { %v3378_v52 = vrot.slane %v3377_v49, 1  ;;  %v3371_v3 = vrot.slane %v3370_v38, 1  ;;  %v3383_v53 = vrot.slane %v3382_v46, 2  ;;  %v3390_v31 = vrot.slane %v3389_v23, 2  ;;  %v3313_v15 = vpop.permute.xlu1 %3312  ;;  %v3278_v19 = vpop.permute.xlu0 %3277 }
0x2e2f   :  { %v3430_v28 = vrot.slane %v3429_v30, 4  ;;  %v3395_v55 = vrot.slane %v3394_v51, 4  ;;  %v3359_v57 = vmul.f32 %v3313_v15, %v5216_v59  ;;  %v3354_v54 = vmul.f32 %v3278_v19, %v5204_v50 }
0x2e30   :  { %v3379_v5 = vadd.f32 %v3378_v52, %v3377_v49  ;;  %v3384_v0 = vadd.f32 %v3383_v53, %v3382_v46  ;;  %v3391_v7 = vadd.f32 %v3390_v31, %v3389_v23  ;;  %v3372_v12 = vadd.f32 %v3371_v3, %v3370_v38 }
0x2e31   :  { %v3431_v40 = vadd.f32 %v3430_v28, %v3429_v30  ;;  %v3396_v6 = vadd.f32 %v3395_v55, %v3394_v51  ;;  %v3436_v11 = vsel %vm3365_vm7, %v3359_v57, 0.0  ;;  %v3401_v10 = vsel %vm3365_vm7, %v3354_v54, 0.0 }
0x2e32   :  { %v3385_v20 = vrot.slane %v3384_v0, 1  ;;  %v3392_v62 = vrot.slane %v3391_v7, 1  ;;  %v3437_v42 = vrot.slane %v3436_v11, 4  ;;  %v3320_v13 = vpop.permute.xlu1 %3319  ;;  %v3285_v43 = vpop.permute.xlu0 %3284  ;;  %v3402_v8 = vrot.slane %v3401_v10, 4 }
0x2e33   :  { %v3432_v36 = vrot.slane %v3431_v40, 2  ;;  %v3397_v21 = vrot.slane %v3396_v6, 2  ;;  %v3360_v16 = vmul.f32 %v3320_v13, %v5216_v59  ;;  %v3355_v63 = vmul.f32 %v3285_v43, %v5204_v50 }
0x2e34   :  { %v3386_v14 = vadd.f32 %v3385_v20, %v3384_v0  ;;  %v3438_v17 = vadd.f32 %v3437_v42, %v3436_v11  ;;  %v3403_v4 = vadd.f32 %v3402_v8, %v3401_v10  ;;  %v3494_v2 = vsel %vm3189_vm11, %v3379_v5, %v3372_v12 }
0x2e35   :  { %v3433_v26 = vadd.f32 %v3432_v36, %v3431_v40  ;;  %v3443_v60 = vsel %vm3365_vm7, %v3360_v16, 0.0  ;;  %v3393_v22 = vadd.f32 %v3392_v62, %v3391_v7  ;;  %v3408_v25 = vsel %vm3365_vm7, %v3355_v63, 0.0 }
0x2e36   :  { %v3444_v1 = vrot.slane %v3443_v60, 4  ;;  %v3327_v29 = vpop.permute.xlu1 %3326  ;;  %v3299_v45 = vpop.permute.xlu0 %3298  ;;  %v3495_v32 = vsel %vm3191_vm12, %v3386_v14, %v3494_v2  ;;  %v3398_v33 = vadd.f32 %v3397_v21, %v3396_v6  ;;  %v3439_v34 = vrot.slane %v3438_v17, 2 }
0x2e37   :  { %v3404_v35 = vrot.slane %v3403_v4, 2  ;;  %v3409_v24 = vrot.slane %v3408_v25, 4  ;;  %v3361_v37 = vmul.f32 %v3327_v29, %v5216_v59  ;;  %v3434_v44 = vrot.slane %v3433_v26, 1 }
0x2e38   :  { %v3445_v39 = vadd.f32 %v3444_v1, %v3443_v60  ;;  %v3357_v47 = vmul.f32 %v3299_v45, %v5216_v59  ;;  %v5366_v48 = vsel %vm3193_vm13, %v3393_v22, %v3495_v32  ;;  %v3399_v30 = vrot.slane %v3398_v33, 1  ;;  %v44_v1 = vld [vmem:[%s5465_s1 + $0xb8] sm:$0xff] }
0x2e39   :  { %v3410_v49 = vadd.f32 %v3409_v24, %v3408_v25  ;;  %v3450_v38 = vsel %vm3365_vm7, %v3361_v37, 0.0  ;;  %v3440_v53 = vadd.f32 %v3439_v34, %v3438_v17  ;;  %v3405_v31 = vadd.f32 %v3404_v35, %v3403_v4  ;;  %v38_v34 = vld [vmem:[%s5465_s1 + $0x88] sm:$0xff] }
0x2e3a   :  { %v3446_v18 = vrot.slane %v3445_v39, 2  ;;  %v3334_v46 = vpop.permute.xlu1 %3333  ;;  %v3292_v23 = vpop.permute.xlu0 %3291  ;;  %v3451_v51 = vrot.slane %v3450_v38, 4  ;;  %v3422_v52 = vsel %vm3365_vm7, %v3357_v47, 0.0  ;;  %v3435_v28 = vadd.f32 %v3434_v44, %v3433_v26 }
0x2e3b   :  { %v3362_v3 = vmul.f32 %v3334_v46, %v5216_v59  ;;  %v3411_v15 = vrot.slane %v3410_v49, 2  ;;  %v3423_v19 = vrot.slane %v3422_v52, 4  ;;  %v3356_v54 = vmul.f32 %v3292_v23, %v5204_v50 }
0x2e3c   :  { %v3452_v55 = vadd.f32 %v3451_v51, %v3450_v38  ;;  %v3447_v5 = vadd.f32 %v3446_v18, %v3445_v39  ;;  %v3441_v42 = vrot.slane %v3440_v53, 1  ;;  %v3406_v13 = vrot.slane %v3405_v31, 1 }
0x2e3d   :  { %v3457_v57 = vsel %vm3365_vm7, %v3362_v3, 0.0  ;;  %v3412_v0 = vadd.f32 %v3411_v15, %v3410_v49  ;;  %v3424_v7 = vadd.f32 %v3423_v19, %v3422_v52  ;;  %v3415_v12 = vsel %vm3365_vm7, %v3356_v54, 0.0 }
0x2e3e   :  { %v3458_v40 = vrot.slane %v3457_v57, 4  ;;  %v3341_v6 = vpop.permute.xlu1 %3340  ;;  %v3348_v11 = vpop.permute.xlu0 %3347  ;;  %v3453_v10 = vrot.slane %v3452_v55, 2  ;;  %v3416_v8 = vrot.slane %v3415_v12, 4  ;;  %v3400_v14 = vadd.f32 %v3399_v30, %v3398_v33  ;;  %v37_v33 = vld [vmem:[%s5465_s1 + $0x80] sm:$0xff] }
0x2e3f   :  { %v3363_v20 = vmul.f32 %v3341_v6, %v5216_v59  ;;  %v3364_v62 = vmul.f32 %v3348_v11, %v5216_v59  ;;  %v3425_v43 = vrot.slane %v3424_v7, 2  ;;  %v3448_v4 = vrot.slane %v3447_v5, 1  ;;  %v43_v59 = vld [vmem:[%s5465_s1 + $0xb0] sm:$0xff] }
0x2e40   :  { %v3459_v36 = vadd.f32 %v3458_v40, %v3457_v57  ;;  %v3454_v21 = vadd.f32 %v3453_v10, %v3452_v55  ;;  %v3413_v60 = vrot.slane %v3412_v0, 1  ;;  %v3417_v2 = vadd.f32 %v3416_v8, %v3415_v12 }
0x2e41   :  { %v3464_v50 = vsel %vm3365_vm7, %v3363_v20, 0.0  ;;  %v3471_v16 = vsel %vm3365_vm7, %v3364_v62, 0.0  ;;  %v3426_v17 = vadd.f32 %v3425_v43, %v3424_v7  ;;  %v3442_v35 = vadd.f32 %v3441_v42, %v3440_v53  ;;  %v39_v42 = vld [vmem:[%s5465_s1 + $0x90] sm:$0xff] }
0x2e42   :  { %v3460_v63 = vrot.slane %v3459_v36, 2  ;;  %v3465_v26 = vrot.slane %v3464_v50, 4  ;;  %v3472_v22 = vrot.slane %v3471_v16, 4  ;;  %v3455_v25 = vrot.slane %v3454_v21, 1 }
0x2e43   :  { %v3427_v29 = vrot.slane %v3426_v17, 1  ;;  %v3407_v39 = vadd.f32 %v3406_v13, %v3405_v31  ;;  %v3418_v24 = vrot.slane %v3417_v2, 2  ;;  %v4322_v49 = vpack.c.bf16 %v44_v1, %v43_v59  ;;  %v40_v13 = vld [vmem:[%s5465_s1 + $0x98] sm:$0xff] }
0x2e44   :  { %v3461_v45 = vadd.f32 %v3460_v63, %v3459_v36  ;;  %v3466_v32 = vadd.f32 %v3465_v26, %v3464_v50  ;;  %v3473_v37 = vadd.f32 %v3472_v22, %v3471_v16  ;;  %v3449_v38 = vadd.f32 %v3448_v4, %v3447_v5  ;;  %v46_v50 = vld [vmem:[%s5465_s1 + $0xc8] sm:$0xff]  ;;  %v47_v16 = vld [vmem:[%s5465_s1 + $0xd0] sm:$0xff]  ;;  %v4495_v26 = vld [vmem:[%s5466_s2] sm:$0xff] }
0x2e45   :  { %v3428_v44 = vadd.f32 %v3427_v29, %v3426_v17  ;;  %v3419_v46 = vadd.f32 %v3418_v24, %v3417_v2  ;;  %v4326_v30 = vpack.c.bf16 %v38_v34, %v37_v33  ;;  %v3414_v51 = vadd.f32 %v3413_v60, %v3412_v0  ;;  %4323 = vmatprep.subr.bf16.mxu0 %v4322_v49  ;;  %v48_v17 = vld [vmem:[%s5465_s1 + $0xd8] sm:$0xff] }
0x2e46   :  { %v3462_v47 = vrot.slane %v3461_v45, 1  ;;  %v3467_v18 = vrot.slane %v3466_v32, 2  ;;  %v3474_v23 = vrot.slane %v3473_v37, 2  ;;  %v3456_v52 = vadd.f32 %v3455_v25, %v3454_v21  ;;  %4325 = vmatpush3.bf16.msra.mxu0 %v4322_v49 }
0x2e47   :  { %v3501_v3 = vsel %vm3189_vm11, %v3435_v28, %v3428_v44  ;;  %v3420_v31 = vrot.slane %v3419_v46, 1  ;;  %v3497_v54 = vsel %vm3195_vm14, %v3400_v14, %v5366_v48  ;;  %4327 = vmatprep.subr.bf16.mxu0 %v4326_v30  ;;  %v4330_v36 = vpack.c.bf16 %v40_v13, %v39_v42 }
0x2e48   :  { %v3468_v15 = vadd.f32 %v3467_v18, %v3466_v32  ;;  %v3502_v19 = vsel %vm3191_vm12, %v3442_v35, %v3501_v3  ;;  %v3463_v53 = vadd.f32 %v3462_v47, %v3461_v45  ;;  %v3475_v55 = vadd.f32 %v3474_v23, %v3473_v37 }
0x2e49   :  { %v3503_v5 = vsel %vm3193_vm13, %v3449_v38, %v3502_v19  ;;  %v3421_v7 = vadd.f32 %v3420_v31, %v3419_v46  ;;  %v3498_v40 = vsel %vm3197_vm15, %v3407_v39, %v3497_v54  ;;  %v4338_v63 = vpack.c.bf16 %v48_v17, %v47_v16 }
0x2e4a   :  { %v3469_v57 = vrot.slane %v3468_v15, 1  ;;  %v3476_v0 = vrot.slane %v3475_v55, 1  ;;  %v3504_v28 = vsel %vm3195_vm14, %v3456_v52, %v3503_v5  ;;  %v3499_v11 = vsel %vm3199_vm2, %v3414_v51, %v3498_v40 }
0x2e4b   :  { %v3500_v12 = vsel %vm3201_vm3, %v3421_v7, %v3499_v11  ;;  %v3505_v20 = vsel %vm3197_vm15, %v3463_v53, %v3504_v28  ;;  %v3677_v4 = vrot.slane %v4495_v26, %v5320_v58  ;;  %v3685_v29 = vrot.slane %v4495_v26, %v5325_v61 }
0x2e4c   :  { %v3470_v6 = vadd.f32 %v3469_v57, %v3468_v15  ;;  %v3477_v10 = vadd.f32 %v3476_v0, %v3475_v55  ;;  %3508 = vrot.lane.b32.xlu1 %v3500_v12, %s4550_s28 }
0x2e4e   :  { %v3506_v48 = vsel %vm3199_vm2, %v3470_v6, %v3505_v20 }
0x2e4f   :  { %v3507_v62 = vsel %vm3201_vm3, %v3477_v10, %v3506_v48 }
0x2e50   :  { %3510 = vrot.lane.b32.xlu0 %v3507_v62, %s4550_s28  ;;  %3591 = vrot.lane.b32.xlu1 %v5190_v27, %s4550_s28 }
0x2e54   :  { %3593 = vrot.lane.b32.xlu0 %v5195_v41, %s4550_s28  ;;  %v45_v41 = vld [vmem:[%s5465_s1 + $0xc0] sm:$0xff]  ;;  %s4560_s1 = smov [#allocation4]  }
0x2e55   :  { %v4334_v14 = vpack.c.bf16 %v46_v50, %v45_v41  ;;  %s3812_s2 = sshll.u32 %s4560_s1, 4  ;;  %s3813_s2 = int_to_ptr.vmem [resolvable:$true] %s3812_s2 }
0x2e56   :  { %s4497_s3 = scalar_lea.vmem %s3813_s2, 32  ;;  %p4502_p1 = scmp.lt.s32.totalorder %s3813_s2, %s3813_s2 }
0x2e57   :  { %4335 = vmatprep.subr.bf16.mxu1 %v4334_v14  ;;  %p4498_p0 = scmp.ne.s32.totalorder %s3813_s2, %s4497_s3  ;;  %p4503_p2 = scmp.lt.s32.totalorder %s4497_s3, %s4497_s3 }
0x2e58   :  { %4337 = vmatpush3.bf16.msra.mxu1 %v4334_v14 }
0x2e59   :  { %4339 = vmatprep.subr.bf16.mxu1 %v4338_v63  ;;  %p4504_p3 = por %p4503_p2, %p4502_p1 }
0x2e5b   :  { %p4505_p4 = pnand %p4504_p3, %p4498_p0 }
0x2e5c   :  { %4341 = vmatpush3.bf16.msra.mxu1 %v4338_v63 }
0x2ebe   :  { %v3509_v43 = vpop.permute.xlu1 %3508 }
0x2ebf   :  { %4181 = vmatprep.mubr.msk.f32.mxu0 %vm57_vm0, %v3509_v43 }
0x2ec2   :  { %v3511_v21 = vpop.permute.xlu0 %3510  ;;  %v3592_v8 = vpop.permute.xlu1 %3591 }
0x2ec3   :  { %4182 = vmatmul.mubr.msk.f32.vlgmr.msra.gmra.mrb[18].mxu0 %vm57_vm0, %v3511_v21 }
0x2ec4   :  { %4329 = vmatpush3.bf16.msra.mxu0 %v4326_v30  ;;  %4192 = vmatprep.mubr.msk.f32.mxu0 %vm57_vm0, %v3592_v8 }
0x2ec5   :  { %4331 = vmatprep.subr.bf16.mxu0 %v4330_v36 }
0x2ec6   :  { %v3594_v27 = vpop.permute.xlu0 %3593 }
0x2ec8   :  { %4333 = vmatpush3.bf16.msra.mxu0 %v4330_v36 }
0x2ecb   :  { %4193 = vmatmul.mubr.msk.f32.vlgmr.msra.gmra.mrb[18].mxu0 %vm57_vm0, %v3594_v27 }
0x2f9e   :  { %v4194_v60 = vpop.f32.mrb[18].mxu0 }
0x2f9f   :  { %v3679_v2 = vadd.f32 %v4194_v60, %v3677_v4  ;;  %v3665_v22 = vpop.f32.mrb[19].mxu0 }
0x2fa0   :  { %v3678_v59 = vadd.f32 %v3677_v4, %v3665_v22 }
0x2fa2   :  { %4482 = vtanh.f32 %v3678_v59 }
0x2fa3   :  { %4484 = vtanh.f32 %v3679_v2 }
0x2fac   :  { %v4483_v1 = vpop.eup %4482 }
0x2fad   :  { %v4485_v25 = vpop.eup %4484  ;;  %4203 = vmatprep.mubr.msk.f32.mxu1 %vm57_vm0, %v4483_v1 }
0x2fae   :  { %4204 = vmatmul.mubr.msk.f32.vlgmr.msra.gmra.mrb[18].mxu1 %vm57_vm0, %v4485_v25  ;;  %vm2759_vm0 = vcmask 261126  }
0x3081   :  { %v4205_v45 = vpop.f32.mrb[18].mxu1 }
0x3082   :  { %v3764_v32 = vadd.f32 %v4205_v45, %v3685_v29  ;;  %v3758_v33 = vpop.f32.mrb[19].mxu1 }
0x3083   :  { %v3759_v58 = vadd.f32 %v3758_v33, %v3685_v29 }
0x3084   :  { %v3769_v34 = vsel %vm3767_vm8, %v3764_v32, -1e+30 }
0x3085   :  { %3772 = vmax.xlane.f32.xlu0 %v3769_v34  ;;  %v3768_v35 = vsel %vm3767_vm8, %v3759_v58, -1e+30 }
0x3086   :  { %3770 = vmax.xlane.f32.xlu1 %v3768_v35 }
0x3112   :  { %v3773_v39 = vpop.xlane.xlu0 %3772 }
0x3113   :  { %v3775_v24 = vsub.f32 %v3769_v34, %v3773_v39  ;;  %v3771_v37 = vpop.xlane.xlu1 %3770 }
0x3114   :  { %v3774_v44 = vsub.f32 %v3768_v35, %v3771_v37 }
0x3115   :  { %v3778_v47 = vmul.f32 1.442695, %v3775_v24 }
0x3116   :  { %v3776_v18 = vmul.f32 1.442695, %v3774_v44 }
0x3117   :  { %4486 = vpow2.f32 %v3778_v47 }
0x3118   :  { %4488 = vpow2.f32 %v3776_v18 }
0x3121   :  { %v4487_v49 = vpop.eup %4486 }
0x3122   :  { %v4489_v61 = vpop.eup %4488  ;;  %3782 = vadd.xlane.f32.xlu1 %v4487_v49 }
0x3123   :  { %3780 = vadd.xlane.f32.xlu0 %v4489_v61 }
0x3139   :  { %2756 = vrot.lane.b32.xlu0 %v5171_v56, %s4550_s28 }
0x31af   :  { %v3783_v9 = vpop.xlane.xlu1 %3782 }
0x31b0   :  { %4490 = vlog2.f32 %v3783_v9  ;;  %v3781_v38 = vpop.xlane.xlu0 %3780 }
0x31b1   :  { %4492 = vlog2.f32 %v3781_v38 }
0x31b4   :  { %v2757_v46 = vpop.permute.xlu0 %2756 }
0x31b5   :  { %2760 = vst.msk [vmem:[#allocation4 - $0x6] sm:$0xc0] %vm2759_vm0, %v2757_v46 }
0x31b6   :  { %4508 = shalt.err (!%p4505_p4)
}
0x31b7   :  { %s4509_s28 = scalar_lea.hbm %s5469_s5, 32 }
0x31b8   :  { %p4510_p5 = scmp.ne.s32.totalorder %s5469_s5, %s4509_s28  ;;  %p4513_p6 = scmp.lt.u32.totalorder %s4509_s28, %s5469_s5 }
0x31ba   :  { %p4515_p7 = pnand %p4513_p6, %p4510_p5 }
0x31bc   :  { %4518 = shalt.err (!%p4515_p7)
}
0x31bd   :  { %3815 = dma.vmem_to_hbm [thread:$0]  %s3813_s2, 32, %s5469_s5, [#allocation5]   ;;  %v4491_v56 = vpop.eup %4490 }
0x31be   :  { %v4493_v23 = vpop.eup %4492  ;;  %v3787_v30 = vmul.f32 0.6931472, %v4491_v56  ;;  %s4561_s24 = smov [#allocation2]  }
0x31bf   :  { %v3785_v51 = vmul.f32 0.6931472, %v4493_v23  ;;  %s3799_s25 = sshll.u32 %s4561_s24, 4  ;;  %s3800_s25 = int_to_ptr.vmem [resolvable:$true] %s3799_s25 }
0x31c0   :  { %v3789_v52 = vadd.f32 %v3787_v30, %v3773_v39  ;;  %s4519_s26 = scalar_lea.vmem %s3800_s25, 256  ;;  %p4524_p9 = scmp.lt.s32.totalorder %s3800_s25, %s3800_s25 }
0x31c1   :  { %v3788_v3 = vadd.f32 %v3785_v51, %v3771_v37  ;;  %p4520_p8 = scmp.ne.s32.totalorder %s3800_s25, %s4519_s26  ;;  %p4525_p10 = scmp.lt.s32.totalorder %s4519_s26, %s4519_s26 }
0x31c2   :  { %v3791_v15 = vsub.f32 %v3769_v34, %v3789_v52 }
0x31c3   :  { %v3790_v19 = vsub.f32 %v3768_v35, %v3788_v3  ;;  %p4526_p11 = por %p4525_p10, %p4524_p9 }
0x31c4   :  { %3793 = vst [vmem:[#allocation2 + $0x8] sm:$0xff] %v3791_v15 }
0x31c5   :  { %3792 = vst [vmem:[#allocation2] sm:$0xff] %v3790_v19  ;;  %p4527_p12 = pnand %p4526_p11, %p4520_p8 }
0x31c7   :  { %4530 = shalt.err (!%p4527_p12)
}
0x31c8   :  { %s4531_s29 = scalar_lea.hbm %s5468_s4, 256 }
0x31c9   :  { %p4532_p13 = scmp.ne.s32.totalorder %s5468_s4, %s4531_s29  ;;  %p4535_p0 = scmp.lt.u32.totalorder %s4531_s29, %s5468_s4 }
0x31cb   :  { %p4537_p1 = pnand %p4535_p0, %p4532_p13 }
0x31cd   :  { %4540 = shalt.err (!%p4537_p1)
}
0x31ce   :  { %s4562_s8 = smov 128   ;;  %s4563_s9 = smov 8  }
0x31cf   :  { %3805 = dma.vmem_to_hbm [thread:$0]  %s3800_s25, 256, %s5468_s4, [#allocation3], %s4562_s8, %s4562_s8, %s4563_s9  }
0x31d0   :  { %4541 = dma.done.wait [#allocation3], 256  }
0x31d1   :  { %4542 = vsyncadd [#allocation3], 4294967040 }
0x31d2   :  { %4543 = dma.done.wait [#allocation5], 32  }
0x31d3   :  { %4544 = vsyncadd [#allocation5], 4294967264 }
0x31d4   :  { %3822 = vsyncpa [#allocation3], 1 }
0x31d5   :  { %3823 = vsyncpa [#allocation5], 1 }

</bundles_post_ra>
